<compile_context>
chip_gen: v7x
topology: tpu7x:2x2x1
jax: 0.10.0
libtpu: 0.0.40
codegen_flags: <defaults>
</compile_context>

<pallas_src>
import functools
import math

import jax
import jax.numpy as jnp
from jax import lax
from jax.experimental import pallas as pl
from jax.experimental.pallas import tpu as pltpu


# --------------------------------------------------------------------------------------
# helpers
# --------------------------------------------------------------------------------------
def _pick_block(M, target, mult=8):
    """Largest row block <= target dividing M and a multiple of `mult` (else M = full dim)."""
    if M <= target:
        return M
    for cand in range(target, mult - 1, -1):
        if M % cand == 0 and cand % mult == 0:
            return cand
    return M


def _tree_sum(terms):
    """Balanced-tree sum of a list of arrays (keeps the running sum in vregs)."""
    while len(terms) > 1:
        nxt = []
        for i in range(0, len(terms) - 1, 2):
            nxt.append(terms[i] + terms[i + 1])
        if len(terms) % 2:
            nxt.append(terms[-1])
        terms = nxt
    return terms[0]


# --------------------------------------------------------------------------------------
# Kernel 1: value projection over src, fused padding-mask, bf16 output (row-tiled)
# --------------------------------------------------------------------------------------
def _value_proj_kernel(x_ref, w_ref, b_ref, keep_ref, o_ref):
    y = jnp.dot(x_ref[...].astype(jnp.bfloat16), w_ref[...],
                preferred_element_type=jnp.float32) + b_ref[...]
    o_ref[...] = (y * keep_ref[...]).astype(o_ref.dtype)           # fused masked_fill + bf16 store


def value_proj_rows(x, w_bf, b, keep, *, row_target=1024):
    M, K = x.shape
    N = w_bf.shape[1]
    tm = _pick_block(M, row_target, mult=16)                        # bf16 output -> 16-row packing
    return pl.pallas_call(
        _value_proj_kernel,
        out_shape=jax.ShapeDtypeStruct((M, N), jnp.bfloat16),
        grid=(M // tm,),
        in_specs=[pl.BlockSpec((tm, K), lambda i: (i, 0)),
                  pl.BlockSpec((K, N), lambda i: (0, 0)),
                  pl.BlockSpec((1, N), lambda i: (0, 0)),
                  pl.BlockSpec((tm, 1), lambda i: (i, 0))],
        out_specs=pl.BlockSpec((tm, N), lambda i: (i, 0)),
        compiler_params=pltpu.CompilerParams(dimension_semantics=("parallel",)),
    )(x, w_bf, b, keep)


# --------------------------------------------------------------------------------------
# Kernel 2: fused self-attention sublayer (+ fused sampling-offset/attn-weight projection)
# --------------------------------------------------------------------------------------
def _self_attn_kernel(tgt_ref, pos_ref, wqk_ref, bqk_ref, wv_ref, bv_ref,
                      wo_ref, bo_ref, g_ref, bb_ref, wow_ref, bow_ref,
                      tgt2_ref, ow_ref, attn_scr, *, n_heads):
    H = n_heads
    _, Lq, E = tgt_ref.shape
    Dh = E // H
    scale = 1.0 / math.sqrt(Dh)

    tgt = tgt_ref[0]                                   # (Lq, E) f32
    pos = pos_ref[0]
    qk = (tgt + pos).astype(jnp.bfloat16)

    # fused q/k projection (2E lanes) + separate v (different input); weights arrive in bf16
    qkp = jnp.dot(qk, wqk_ref[...], preferred_element_type=jnp.float32) + bqk_ref[...]
    v = jnp.dot(tgt.astype(jnp.bfloat16), wv_ref[...],
                preferred_element_type=jnp.float32) + bv_ref[...]
    q = qkp[:, :E]
    k = qkp[:, E:]

    for h in range(H):                                 # static head loop: heads live on lanes
        qh = (q[:, h * Dh:(h + 1) * Dh] * scale).astype(jnp.bfloat16)
        kh = k[:, h * Dh:(h + 1) * Dh].astype(jnp.bfloat16)
        vh = v[:, h * Dh:(h + 1) * Dh].astype(jnp.bfloat16)
        s = lax.dot_general(qh, kh, (((1,), (1,)), ((), ())),
                            preferred_element_type=jnp.float32)     # (Lq, Lq), no explicit .T
        s = s - jnp.max(s, axis=-1, keepdims=True)
        p = jnp.exp(s)
        p = p * pl.reciprocal(jnp.sum(p, axis=-1, keepdims=True), approx=True)
        # write each head straight into its lane slice (no lane-packing concat)
        attn_scr[:, h * Dh:(h + 1) * Dh] = jnp.dot(p.astype(jnp.bfloat16), vh,
                                                   preferred_element_type=jnp.float32)
    attn = attn_scr[...]

    sa = jnp.dot(attn.astype(jnp.bfloat16), wo_ref[...],
                 preferred_element_type=jnp.float32) + bo_ref[...]
    h1 = tgt + sa
    mu = jnp.mean(h1, axis=-1, keepdims=True)
    var = jnp.mean(jnp.square(h1 - mu), axis=-1, keepdims=True)
    t2 = (h1 - mu) * lax.rsqrt(var + 1e-5) * g_ref[...] + bb_ref[...]
    tgt2_ref[0] = t2

    # cross-attn query = LN-output + pos; fused sampling-offset + attention-weight projection
    query = (t2 + pos).astype(jnp.bfloat16)
    ow_ref[0] = jnp.dot(query, wow_ref[...], preferred_element_type=jnp.float32) + bow_ref[...]


def self_attn_block(tgt, query_pos, wqk_bf, bqk, wv_bf, bv, wo_bf, bo, g2, b2,
                    wow_bf, bow, *, n_heads):
    B, Lq, E = tgt.shape
    N_ow = wow_bf.shape[1]
    act_spec = pl.BlockSpec((1, Lq, E), lambda b: (b, 0, 0))

    def full(a):
        return pl.BlockSpec(a.shape, lambda b: (0, 0))

    return pl.pallas_call(
        functools.partial(_self_attn_kernel, n_heads=n_heads),
        out_shape=(jax.ShapeDtypeStruct((B, Lq, E), jnp.float32),
                   jax.ShapeDtypeStruct((B, Lq, N_ow), jnp.float32)),
        grid=(B,),
        in_specs=[act_spec, act_spec,
                  full(wqk_bf), full(bqk), full(wv_bf), full(bv),
                  full(wo_bf), full(bo), full(g2), full(b2),
                  full(wow_bf), full(bow)],
        out_specs=(act_spec, pl.BlockSpec((1, Lq, N_ow), lambda b: (b, 0, 0))),
        scratch_shapes=[pltpu.VMEM((Lq, E), jnp.float32)],
        compiler_params=pltpu.CompilerParams(dimension_semantics=("parallel",)),
    )(tgt, query_pos, wqk_bf, bqk, wv_bf, bv, wo_bf, bo, g2, b2, wow_bf, bow)


# --------------------------------------------------------------------------------------
# Kernel 3: MSDeformAttn sampling + out-proj + residual + LN   (Len_in-tiled accumulation)
#   flat_ref / wgt_ref are precomputed on the host:
#     flat[b,h,q,c] = global row index of corner sample c (or -1 if outside the feature map)
#     wgt [b,h,q,c] = bilinear corner weight * softmaxed attention weight (0 if invalid)
# --------------------------------------------------------------------------------------
def _msda_kernel(flat_ref, wgt_ref, value_ref, tgt_ref, wo_ref, bo_ref, g_ref, bb_ref,
                 o_ref, acc_ref, *, n_heads, head_dim):
    H, Dh = n_heads, head_dim
    _, tile_len, E = value_ref.shape
    _, _, Lq, NC = flat_ref.shape
    t = pl.program_id(1)

    @pl.when(t == 0)
    def _init():
        acc_ref[...] = jnp.zeros_like(acc_ref)

    base = t * tile_len                                # fold the tile offset into the small array
    pos = lax.broadcasted_iota(jnp.int32, (Lq, tile_len), 1)   # tile-local column index
    value = value_ref[0]                               # (tile_len, E) bf16 straight from HBM

    for h in range(H):                                 # static head loop
        flat = flat_ref[0, h] - base                   # (Lq, NC) int32; -1 rows never match
        wgt = wgt_ref[0, h]                            # (Lq, NC) f32
        # combined bilinear+attention scatter matrix, built once per tile with a tree-sum
        terms = [jnp.where(flat[:, c:c + 1] == pos, wgt[:, c:c + 1], 0.0) for c in range(NC)]
        scat = _tree_sum(terms)                        # (Lq, tile_len) f32, accumulated in vregs
        vh = value[:, h * Dh:(h + 1) * Dh]             # head slice on lanes (no transpose)
        acc_ref[:, h * Dh:(h + 1) * Dh] += jnp.dot(
            scat.astype(jnp.bfloat16), vh, preferred_element_type=jnp.float32)

    @pl.when(t == pl.num_programs(1) - 1)
    def _finish():
        sampled = acc_ref[...]
        ca = jnp.dot(sampled.astype(jnp.bfloat16), wo_ref[...],
                     preferred_element_type=jnp.float32) + bo_ref[...]
        hres = tgt_ref[0] + ca
        mu = jnp.mean(hres, axis=-1, keepdims=True)
        var = jnp.mean(jnp.square(hres - mu), axis=-1, keepdims=True)
        o_ref[0] = (hres - mu) * lax.rsqrt(var + 1e-5) * g_ref[...] + bb_ref[...]


def msda_block(flat, wgt, value, tgt2, wo_bf, bo, gamma, beta, *, n_heads, head_dim, tile):
    B, H, Lq, NC = flat.shape
    _, Len_pad, E = value.shape
    nt = Len_pad // tile

    samp_spec = pl.BlockSpec((1, H, Lq, NC), lambda b, t: (b, 0, 0, 0))

    def full2(a):
        return pl.BlockSpec(a.shape, lambda b, t: (0, 0))

    return pl.pallas_call(
        functools.partial(_msda_kernel, n_heads=n_heads, head_dim=head_dim),
        out_shape=jax.ShapeDtypeStruct((B, Lq, E), jnp.float32),
        grid=(B, nt),
        in_specs=[samp_spec, samp_spec,
                  pl.BlockSpec((1, tile, E), lambda b, t: (b, t, 0)),   # bf16 value, Len_in-tiled
                  pl.BlockSpec((1, Lq, E), lambda b, t: (b, 0, 0)),     # residual
                  full2(wo_bf), full2(bo), full2(gamma), full2(beta)],
        out_specs=pl.BlockSpec((1, Lq, E), lambda b, t: (b, 0, 0)),
        scratch_shapes=[pltpu.VMEM((Lq, E), jnp.float32)],
        compiler_params=pltpu.CompilerParams(
            dimension_semantics=("parallel", "arbitrary")),
    )(flat, wgt, value, tgt2, wo_bf, bo, gamma, beta)


# --------------------------------------------------------------------------------------
# Kernel 4: fused FFN sublayer (linear1 + relu + linear2 + residual + LN), row-tiled
# --------------------------------------------------------------------------------------
def _ffn_ln_kernel(x_ref, w1_ref, b1_ref, w2_ref, b2_ref, g_ref, bb_ref, o_ref):
    x = x_ref[...]
    h = jnp.dot(x.astype(jnp.bfloat16), w1_ref[...],
                preferred_element_type=jnp.float32) + b1_ref[...]
    h = jnp.maximum(h, 0.0)                                              # relu
    y = jnp.dot(h.astype(jnp.bfloat16), w2_ref[...],
                preferred_element_type=jnp.float32) + b2_ref[...]
    r = x + y
    mu = jnp.mean(r, axis=-1, keepdims=True)
    var = jnp.mean(jnp.square(r - mu), axis=-1, keepdims=True)
    o_ref[...] = (r - mu) * lax.rsqrt(var + 1e-5) * g_ref[...] + bb_ref[...]


def ffn_ln_block(x, w1_bf, b1, w2_bf, b2, gamma, beta, *, row_target=1024):
    M, E = x.shape
    tm = _pick_block(M, row_target)

    def full(a):
        return pl.BlockSpec(a.shape, lambda i: (0, 0))

    return pl.pallas_call(
        _ffn_ln_kernel,
        out_shape=jax.ShapeDtypeStruct((M, E), jnp.float32),
        grid=(M // tm,),
        in_specs=[pl.BlockSpec((tm, E), lambda i: (i, 0)),
                  full(w1_bf), full(b1), full(w2_bf), full(b2), full(gamma), full(beta)],
        out_specs=pl.BlockSpec((tm, E), lambda i: (i, 0)),
        compiler_params=pltpu.CompilerParams(dimension_semantics=("parallel",)),
    )(x, w1_bf, b1, w2_bf, b2, gamma, beta)


# --------------------------------------------------------------------------------------
# Decoder-layer forward (glue in plain JAX; all heavy compute in the 4 Pallas kernels above)
# --------------------------------------------------------------------------------------
def deformable_decoder_layer_forward(params, tgt, query_pos, reference_points, src,
                                     src_padding_mask=None, *,
                                     spatial_shapes, level_start_index,
                                     n_heads, n_levels, n_points, len_tile_target=1024):
    B, Lq, E = tgt.shape
    H, L, P = n_heads, n_levels, n_points
    Dh = E // H
    Len_in = src.shape[1]

    # one-time fused / bf16 pre-cast weights (folded under jit; halves weight DMA bytes)
    wqk_bf = jnp.concatenate([params['sa_wq_t'], params['sa_wk_t']], axis=1).astype(jnp.bfloat16)
    bqk = jnp.concatenate([params['sa_bq'], params['sa_bk']], axis=1)
    wow_bf = jnp.concatenate([params['ca_wso_t'], params['ca_waw_t']], axis=1).astype(jnp.bfloat16)
    bow = jnp.concatenate([params['ca_bso'], params['ca_baw']], axis=1)
    sa_wv_bf = params['sa_wv_t'].astype(jnp.bfloat16)
    sa_wo_bf = params['sa_wo_t'].astype(jnp.bfloat16)
    ca_wv_bf = params['ca_wv_t'].astype(jnp.bfloat16)
    ca_wo_bf = params['ca_wo_t'].astype(jnp.bfloat16)
    ffn_w1_bf = params['ffn_w1_t'].astype(jnp.bfloat16)
    ffn_w2_bf = params['ffn_w2_t'].astype(jnp.bfloat16)

    # ---- robust Len_in tiling: pick a tile, pad Len_in up to a multiple of it ----
    tile = min(len_tile_target, Len_in)
    tile = max(16, ((tile + 15) // 16) * 16)                 # bf16 value -> 16-row packing
    Len_pad = ((Len_in + tile - 1) // tile) * tile
    pad = Len_pad - Len_in

    # ---- value projection over src (row-tiled, bf16 output, fused padding-mask zeroing) ----
    if src_padding_mask is None:
        keep = jnp.ones((B, Len_in), jnp.float32)
    else:
        keep = 1.0 - src_padding_mask.astype(jnp.float32)
    keep = jnp.pad(keep, ((0, 0), (0, pad)))                 # padded rows -> zero value
    src_p = jnp.pad(src, ((0, 0), (0, pad), (0, 0)))
    value = value_proj_rows(src_p.reshape(B * Len_pad, E), ca_wv_bf, params['ca_bv'],
                            keep.reshape(B * Len_pad, 1))
    value = value.reshape(B, Len_pad, E)                     # (B, Len_pad, E) bf16, no transpose

    # ---- self-attention sublayer + fused offsets/weights projection (one kernel) ----
    tgt2, ow = self_attn_block(tgt, query_pos, wqk_bf, bqk,
                               sa_wv_bf, params['sa_bv'],
                               sa_wo_bf, params['sa_bo'],
                               params['norm2_g'], params['norm2_b'],
                               wow_bf, bow, n_heads=H)

    # ---- tile-invariant sampling math hoisted to host glue: O(B*Lq*H*L*P) only ----
    off = ow[..., :H * L * P * 2].reshape(B, Lq, H, L, P, 2)
    logits = ow[..., H * L * P * 2:].reshape(B, Lq, H, L * P)
    attn_w = jax.nn.softmax(logits, axis=-1).reshape(B, Lq, H, L, P)

    Wl = jnp.asarray([float(s[1]) for s in spatial_shapes], jnp.float32)
    Hl = jnp.asarray([float(s[0]) for s in spatial_shapes], jnp.float32)
    Sl = jnp.asarray(level_start_index, jnp.int32)
    norm = jnp.stack([Wl, Hl], axis=-1)                      # (L, 2) = (W_l, H_l)
    loc = (reference_points[:, :, None, :, None, :]
           + off / norm[None, None, None, :, None, :])       # (B, Lq, H, L, P, 2)

    # grid_sample(align_corners=False, padding_mode='zeros') corner indices/weights
    x = loc[..., 0] * Wl[None, None, None, :, None] - 0.5
    y = loc[..., 1] * Hl[None, None, None, :, None] - 0.5
    x0f = jnp.floor(x); y0f = jnp.floor(y)
    fx = x - x0f; fy = y - y0f
    x0 = x0f.astype(jnp.int32); y0 = y0f.astype(jnp.int32)
    Wli = Wl.astype(jnp.int32)[None, None, None, :, None]
    Hli = Hl.astype(jnp.int32)[None, None, None, :, None]
    Sli = Sl[None, None, None, :, None]
    flats, wgts = [], []
    for dy in (0, 1):
        for dx in (0, 1):
            xi = x0 + dx
            yi = y0 + dy
            valid = (xi >= 0) & (xi < Wli) & (yi >= 0) & (yi < Hli)
            w = (fx if dx else 1.0 - fx) * (fy if dy else 1.0 - fy) * attn_w
            wgts.append(jnp.where(valid, w, 0.0))
            flats.append(jnp.where(valid, Sli + yi * Wli + xi, -1))   # -1 never matches a row
    NC = L * P * 4
    flat = jnp.stack(flats, axis=-1).transpose(0, 2, 1, 3, 4, 5).reshape(B, H, Lq, NC)
    wgt = jnp.stack(wgts, axis=-1).transpose(0, 2, 1, 3, 4, 5).reshape(B, H, Lq, NC)

    # ---- deformable cross attention + out-proj + residual + LN (one kernel, Len_in-tiled) ----
    tgt3 = msda_block(flat, wgt, value, tgt2,
                      ca_wo_bf, params['ca_bo'],
                      params['norm1_g'], params['norm1_b'],
                      n_heads=H, head_dim=Dh, tile=tile)

    # ---- FFN + residual + LN (one kernel) ----
    out = ffn_ln_block(tgt3.reshape(B * Lq, E),
                       ffn_w1_bf, params['ffn_b1'],
                       ffn_w2_bf, params['ffn_b2'],
                       params['norm3_g'], params['norm3_b'])
    return out.reshape(B, Lq, E)


# --------------------------------------------------------------------------------------
# Pure-JAX f32 reference (for correctness check)
# --------------------------------------------------------------------------------------
def reference_forward(params, tgt, query_pos, reference_points, src, spatial_shapes,
                      level_start_index, *, n_heads, n_levels, n_points):
    def lin(x, w_t, b):
        return x @ w_t + b

    def ln(x, g, b):
        mu = x.mean(-1, keepdims=True)
        var = ((x - mu) ** 2).mean(-1, keepdims=True)
        return (x - mu) / jnp.sqrt(var + 1e-5) * g + b

    B, Lq, E = tgt.shape
    H, L, P = n_heads, n_levels, n_points
    Dh = E // H
    Len_in = src.shape[1]

    qk = tgt + query_pos
    q = lin(qk, params['sa_wq_t'], params['sa_bq']).reshape(B, Lq, H, Dh).transpose(0, 2, 1, 3)
    k = lin(qk, params['sa_wk_t'], params['sa_bk']).reshape(B, Lq, H, Dh).transpose(0, 2, 1, 3)
    v = lin(tgt, params['sa_wv_t'], params['sa_bv']).reshape(B, Lq, H, Dh).transpose(0, 2, 1, 3)
    s = jnp.einsum('bhqd,bhkd->bhqk', q, k) / math.sqrt(Dh)
    p = jax.nn.softmax(s, axis=-1)
    o = jnp.einsum('bhqk,bhkd->bhqd', p, v).transpose(0, 2, 1, 3).reshape(B, Lq, E)
    x = ln(tgt + lin(o, params['sa_wo_t'], params['sa_bo']), params['norm2_g'], params['norm2_b'])

    query = x + query_pos
    value = lin(src, params['ca_wv_t'], params['ca_bv']).reshape(B, Len_in, H, Dh)
    samp_off = lin(query, params['ca_wso_t'], params['ca_bso']).reshape(B, Lq, H, L, P, 2)
    attn_w = lin(query, params['ca_waw_t'], params['ca_baw']).reshape(B, Lq, H, L * P)
    attn_w = jax.nn.softmax(attn_w, -1).reshape(B, Lq, H, L, P)
    shp = jnp.asarray(spatial_shapes, jnp.float32)
    norm = jnp.stack([shp[:, 1], shp[:, 0]], -1)
    loc = reference_points[:, :, None, :, None, :] + samp_off / norm[None, None, None, :, None, :]

    out = jnp.zeros((B, Lq, H, Dh), jnp.float32)
    b_idx = jnp.arange(B)[:, None, None, None]
    h_idx = jnp.arange(H)[None, None, :, None]
    for l, (Hl, Wl) in enumerate(spatial_shapes):
        start = level_start_index[l]
        vl = value[:, start:start + Hl * Wl].reshape(B, Hl, Wl, H, Dh)
        x_ = loc[:, :, :, l, :, 0] * Wl - 0.5
        y_ = loc[:, :, :, l, :, 1] * Hl - 0.5
        x0 = jnp.floor(x_)
        y0 = jnp.floor(y_)
        fx = x_ - x0
        fy = y_ - y0
        for dy in (0, 1):
            for dx in (0, 1):
                xi = (x0 + dx).astype(jnp.int32)
                yi = (y0 + dy).astype(jnp.int32)
                wgt = (fx if dx else 1 - fx) * (fy if dy else 1 - fy)
                valid = (xi >= 0) & (xi < Wl) & (yi >= 0) & (yi < Hl)
                xi_c = jnp.clip(xi, 0, Wl - 1)
                yi_c = jnp.clip(yi, 0, Hl - 1)
                gathered = vl[b_idx, yi_c, xi_c, h_idx, :]
                w_all = (wgt * valid.astype(jnp.float32) * attn_w[:, :, :, l, :])[..., None]
                out = out + (gathered * w_all).sum(3)
    out = out.reshape(B, Lq, E)
    x = ln(x + lin(out, params['ca_wo_t'], params['ca_bo']), params['norm1_g'], params['norm1_b'])

    h = jnp.maximum(lin(x, params['ffn_w1_t'], params['ffn_b1']), 0.0)
    x = ln(x + lin(h, params['ffn_w2_t'], params['ffn_b2']), params['norm3_g'], params['norm3_b'])
    return x


# --------------------------------------------------------------------------------------
# Deterministic parameter init
# --------------------------------------------------------------------------------------
def init_params(key, E, F, H, L, P):
    keys = iter(jax.random.split(key, 32))

    def w(shape, scale):
        return jax.random.normal(next(keys), shape, jnp.float32) * scale

    def b(n):
        return jax.random.normal(next(keys), (1, n), jnp.float32) * 0.01

    sE = 1.0 / math.sqrt(E)
    p = {}
    p['sa_wq_t'] = w((E, E), sE); p['sa_bq'] = b(E)
    p['sa_wk_t'] = w((E, E), sE); p['sa_bk'] = b(E)
    p['sa_wv_t'] = w((E, E), sE); p['sa_bv'] = b(E)
    p['sa_wo_t'] = w((E, E), sE); p['sa_bo'] = b(E)
    p['ca_wv_t'] = w((E, E), sE); p['ca_bv'] = b(E)
    p['ca_wso_t'] = w((E, H * L * P * 2), 0.1 * sE); p['ca_bso'] = b(H * L * P * 2)
    p['ca_waw_t'] = w((E, H * L * P), sE); p['ca_baw'] = b(H * L * P)
    p['ca_wo_t'] = w((E, E), sE); p['ca_bo'] = b(E)
    p['ffn_w1_t'] = w((E, F), sE); p['ffn_b1'] = b(F)
    p['ffn_w2_t'] = w((F, E), 1.0 / math.sqrt(F)); p['ffn_b2'] = b(E)
    for name in ('norm1', 'norm2', 'norm3'):
        p[f'{name}_g'] = jnp.ones((1, E), jnp.float32)
        p[f'{name}_b'] = jnp.zeros((1, E), jnp.float32)
    return p


if __name__ == "__main__":
    # small config: d_model=32, n_heads=4, d_ffn=64, n_levels=2, n_points=2
    B, Lq, E, H, L, P, F = 2, 8, 32, 4, 2, 2, 64
    spatial_shapes = [(8, 8), (4, 4)]
    level_start_index = [0, 64]
    Len_in = sum(h_ * w_ for h_, w_ in spatial_shapes)

    key = jax.random.PRNGKey(0)
    kp, k1, k2, k3, k4 = jax.random.split(key, 5)
    params = init_params(kp, E, F, H, L, P)

    tgt = jax.random.normal(k1, (B, Lq, E), jnp.float32)
    query_pos = jax.random.normal(k2, (B, Lq, E), jnp.float32)
    reference_points = jax.random.uniform(k3, (B, Lq, L, 2), jnp.float32, 0.05, 0.95)
    src = jax.random.normal(k4, (B, Len_in, E), jnp.float32)

    # len_tile_target=48 -> Len_in (80) padded to 96, tile 48, 2 chunks: exercises the tiled
    # accumulation path AND the non-divisible-Len_in padding path.
    fwd = jax.jit(functools.partial(
        deformable_decoder_layer_forward,
        spatial_shapes=tuple(spatial_shapes), level_start_index=tuple(level_start_index),
        n_heads=H, n_levels=L, n_points=P, len_tile_target=48))

    out = fwd(params, tgt, query_pos, reference_points, src)
    out = jax.block_until_ready(out)

    ref = reference_forward(
        params, tgt, query_pos, reference_points, src,
        spatial_shapes, level_start_index,
        n_heads=H, n_levels=L, n_points=P)

    assert out.shape == (B, Lq, E)
    assert bool(jnp.all(jnp.isfinite(out)))
    # bf16 MXU operands / bf16 weights vs an f32 reference -> relaxed tolerance
    assert bool(jnp.allclose(out, ref, atol=5e-2, rtol=5e-2)), \
        f"max abs err {float(jnp.max(jnp.abs(out - ref)))}"
    print("KERNEL_OK")
</pallas_src>

<mosaic_0001>
module attributes {stable_mosaic.version = 11 : i64} {
  func.func @_self_attn_kernel(%arg0: i32, %arg1: memref<1x8x32xf32, #tpu.memory_space<vmem>>, %arg2: memref<1x8x32xf32, #tpu.memory_space<vmem>>, %arg3: memref<32x64xbf16, #tpu.memory_space<vmem>>, %arg4: memref<1x64xf32, #tpu.memory_space<vmem>>, %arg5: memref<32x32xbf16, #tpu.memory_space<vmem>>, %arg6: memref<1x32xf32, #tpu.memory_space<vmem>>, %arg7: memref<32x32xbf16, #tpu.memory_space<vmem>>, %arg8: memref<1x32xf32, #tpu.memory_space<vmem>>, %arg9: memref<1x32xf32, #tpu.memory_space<vmem>>, %arg10: memref<1x32xf32, #tpu.memory_space<vmem>>, %arg11: memref<32x48xbf16, #tpu.memory_space<vmem>>, %arg12: memref<1x48xf32, #tpu.memory_space<vmem>>, %arg13: memref<1x8x32xf32, #tpu.memory_space<vmem>>, %arg14: memref<1x8x48xf32, #tpu.memory_space<vmem>>, %arg15: memref<8x32xf32, #tpu.memory_space<vmem>>) attributes {dimension_semantics = [#tpu.dimension_semantics<parallel>], iteration_bounds = array<i64: 2>, scalar_prefetch = 0 : i64, scratch_operands = 1 : i64, tpu.core_type = #tpu.core_type<tc>, window_params = [{transform_indices = @transform_0, window_bounds = array<i64: 1, 8, 32>}, {transform_indices = @transform_1, window_bounds = array<i64: 1, 8, 32>}, {pipeline_mode = #tpu.pipeline_mode<synchronous>, transform_indices = @transform_2, window_bounds = array<i64: 32, 64>}, {pipeline_mode = #tpu.pipeline_mode<synchronous>, transform_indices = @transform_3, window_bounds = array<i64: 1, 64>}, {pipeline_mode = #tpu.pipeline_mode<synchronous>, transform_indices = @transform_4, window_bounds = array<i64: 32, 32>}, {pipeline_mode = #tpu.pipeline_mode<synchronous>, transform_indices = @transform_5, window_bounds = array<i64: 1, 32>}, {pipeline_mode = #tpu.pipeline_mode<synchronous>, transform_indices = @transform_6, window_bounds = array<i64: 32, 32>}, {pipeline_mode = #tpu.pipeline_mode<synchronous>, transform_indices = @transform_7, window_bounds = array<i64: 1, 32>}, {pipeline_mode = #tpu.pipeline_mode<synchronous>, transform_indices = @transform_8, window_bounds = array<i64: 1, 32>}, {pipeline_mode = #tpu.pipeline_mode<synchronous>, transform_indices = @transform_9, window_bounds = array<i64: 1, 32>}, {pipeline_mode = #tpu.pipeline_mode<synchronous>, transform_indices = @transform_10, window_bounds = array<i64: 32, 48>}, {pipeline_mode = #tpu.pipeline_mode<synchronous>, transform_indices = @transform_11, window_bounds = array<i64: 1, 48>}, {transform_indices = @transform_12, window_bounds = array<i64: 1, 8, 32>}, {transform_indices = @transform_13, window_bounds = array<i64: 1, 8, 48>}]} {
    %c0 = arith.constant 0 : index
    %c0_0 = arith.constant 0 : index
    %c0_1 = arith.constant 0 : index
    %0 = vector.load %arg1[%c0, %c0_0, %c0_1] : memref<1x8x32xf32, #tpu.memory_space<vmem>>, vector<1x8x32xf32>
    %1 = vector.shape_cast %0 : vector<1x8x32xf32> to vector<8x32xf32>
    %c0_2 = arith.constant 0 : index
    %c0_3 = arith.constant 0 : index
    %c0_4 = arith.constant 0 : index
    %2 = vector.load %arg2[%c0_2, %c0_3, %c0_4] : memref<1x8x32xf32, #tpu.memory_space<vmem>>, vector<1x8x32xf32>
    %3 = vector.shape_cast %2 : vector<1x8x32xf32> to vector<8x32xf32>
    %4 = arith.addf %1, %3 : vector<8x32xf32>
    %5 = arith.truncf %4 : vector<8x32xf32> to vector<8x32xbf16>
    %c0_5 = arith.constant 0 : index
    %c0_6 = arith.constant 0 : index
    %6 = vector.load %arg3[%c0_5, %c0_6] : memref<32x64xbf16, #tpu.memory_space<vmem>>, vector<32x64xbf16>
    %cst = arith.constant dense<0.000000e+00> : vector<8x64xf32>
    %7 = tpu.matmul %5, %6, %cst {dimension_numbers = #tpu.dot_dimension_numbers<[1], [0], [0], [1], [0, 0, 1, 1], [], []>} : vector<8x32xbf16>, vector<32x64xbf16>, vector<8x64xf32> -> vector<8x64xf32>
    %c0_7 = arith.constant 0 : index
    %c0_8 = arith.constant 0 : index
    %8 = vector.load %arg4[%c0_7, %c0_8] : memref<1x64xf32, #tpu.memory_space<vmem>>, vector<1x64xf32>
    %9 = vector.broadcast %8 : vector<1x64xf32> to vector<8x64xf32>
    %10 = arith.addf %7, %9 : vector<8x64xf32>
    %11 = arith.truncf %1 : vector<8x32xf32> to vector<8x32xbf16>
    %c0_9 = arith.constant 0 : index
    %c0_10 = arith.constant 0 : index
    %12 = vector.load %arg5[%c0_9, %c0_10] : memref<32x32xbf16, #tpu.memory_space<vmem>>, vector<32x32xbf16>
    %cst_11 = arith.constant dense<0.000000e+00> : vector<8x32xf32>
    %13 = tpu.matmul %11, %12, %cst_11 {dimension_numbers = #tpu.dot_dimension_numbers<[1], [0], [0], [1], [0, 0, 1, 1], [], []>} : vector<8x32xbf16>, vector<32x32xbf16>, vector<8x32xf32> -> vector<8x32xf32>
    %c0_12 = arith.constant 0 : index
    %c0_13 = arith.constant 0 : index
    %14 = vector.load %arg6[%c0_12, %c0_13] : memref<1x32xf32, #tpu.memory_space<vmem>>, vector<1x32xf32>
    %15 = vector.broadcast %14 : vector<1x32xf32> to vector<8x32xf32>
    %16 = arith.addf %13, %15 : vector<8x32xf32>
    %17 = vector.extract_strided_slice %10 {offsets = [0, 0], sizes = [8, 32], strides = [1, 1]} : vector<8x64xf32> to vector<8x32xf32>
    %18 = vector.extract_strided_slice %10 {offsets = [0, 32], sizes = [8, 32], strides = [1, 1]} : vector<8x64xf32> to vector<8x32xf32>
    %19 = vector.extract_strided_slice %17 {offsets = [0, 0], sizes = [8, 8], strides = [1, 1]} : vector<8x32xf32> to vector<8x8xf32>
    %cst_14 = arith.constant 0.353553385 : f32
    %20 = vector.broadcast %cst_14 : f32 to vector<8x8xf32>
    %21 = arith.mulf %19, %20 : vector<8x8xf32>
    %22 = arith.truncf %21 : vector<8x8xf32> to vector<8x8xbf16>
    %23 = vector.extract_strided_slice %18 {offsets = [0, 0], sizes = [8, 8], strides = [1, 1]} : vector<8x32xf32> to vector<8x8xf32>
    %24 = arith.truncf %23 : vector<8x8xf32> to vector<8x8xbf16>
    %25 = vector.extract_strided_slice %16 {offsets = [0, 0], sizes = [8, 8], strides = [1, 1]} : vector<8x32xf32> to vector<8x8xf32>
    %26 = arith.truncf %25 : vector<8x8xf32> to vector<8x8xbf16>
    %cst_15 = arith.constant dense<0.000000e+00> : vector<8x8xf32>
    %27 = tpu.matmul %22, %24, %cst_15 {dimension_numbers = #tpu.dot_dimension_numbers<[1], [1], [0], [0], [0, 0, 1, 0], [], []>} : vector<8x8xbf16>, vector<8x8xbf16>, vector<8x8xf32> -> vector<8x8xf32>
    %cst_16 = arith.constant dense<0xFF800000> : vector<8xf32>
    %28 = vector.multi_reduction <maximumf>, %27, %cst_16 [1] : vector<8x8xf32> to vector<8xf32>
    %29 = vector.shape_cast %28 : vector<8xf32> to vector<8x1xf32>
    %30 = vector.broadcast %29 : vector<8x1xf32> to vector<8x8xf32>
    %31 = arith.subf %27, %30 : vector<8x8xf32>
    %32 = math.exp %31 : vector<8x8xf32>
    %cst_17 = arith.constant dense<0.000000e+00> : vector<8xf32>
    %33 = vector.multi_reduction <add>, %32, %cst_17 [1] : vector<8x8xf32> to vector<8xf32>
    %34 = vector.shape_cast %33 : vector<8xf32> to vector<8x1xf32>
    %35 = tpu.reciprocal %34 {approx = true} : vector<8x1xf32> -> vector<8x1xf32>
    %36 = vector.broadcast %35 : vector<8x1xf32> to vector<8x8xf32>
    %37 = arith.mulf %32, %36 : vector<8x8xf32>
    %38 = arith.truncf %37 : vector<8x8xf32> to vector<8x8xbf16>
    %cst_18 = arith.constant dense<0.000000e+00> : vector<8x8xf32>
    %39 = tpu.matmul %38, %26, %cst_18 {dimension_numbers = #tpu.dot_dimension_numbers<[1], [0], [0], [1], [0, 0, 1, 1], [], []>} : vector<8x8xbf16>, vector<8x8xbf16>, vector<8x8xf32> -> vector<8x8xf32>
    %c0_19 = arith.constant 0 : index
    %c0_20 = arith.constant 0 : index
    %40 = vector.load %arg15[%c0_19, %c0_20] : memref<8x32xf32, #tpu.memory_space<vmem>>, vector<8x8xf32>
    tpu.vector_store %arg15[%c0_19, %c0_20], %39 {strides = array<i32>} : memref<8x32xf32, #tpu.memory_space<vmem>>, vector<8x8xf32>,
    %41 = vector.extract_strided_slice %17 {offsets = [0, 8], sizes = [8, 8], strides = [1, 1]} : vector<8x32xf32> to vector<8x8xf32>
    %cst_21 = arith.constant 0.353553385 : f32
    %42 = vector.broadcast %cst_21 : f32 to vector<8x8xf32>
    %43 = arith.mulf %41, %42 : vector<8x8xf32>
    %44 = arith.truncf %43 : vector<8x8xf32> to vector<8x8xbf16>
    %45 = vector.extract_strided_slice %18 {offsets = [0, 8], sizes = [8, 8], strides = [1, 1]} : vector<8x32xf32> to vector<8x8xf32>
    %46 = arith.truncf %45 : vector<8x8xf32> to vector<8x8xbf16>
    %47 = vector.extract_strided_slice %16 {offsets = [0, 8], sizes = [8, 8], strides = [1, 1]} : vector<8x32xf32> to vector<8x8xf32>
    %48 = arith.truncf %47 : vector<8x8xf32> to vector<8x8xbf16>
    %cst_22 = arith.constant dense<0.000000e+00> : vector<8x8xf32>
    %49 = tpu.matmul %44, %46, %cst_22 {dimension_numbers = #tpu.dot_dimension_numbers<[1], [1], [0], [0], [0, 0, 1, 0], [], []>} : vector<8x8xbf16>, vector<8x8xbf16>, vector<8x8xf32> -> vector<8x8xf32>
    %cst_23 = arith.constant dense<0xFF800000> : vector<8xf32>
    %50 = vector.multi_reduction <maximumf>, %49, %cst_23 [1] : vector<8x8xf32> to vector<8xf32>
    %51 = vector.shape_cast %50 : vector<8xf32> to vector<8x1xf32>
    %52 = vector.broadcast %51 : vector<8x1xf32> to vector<8x8xf32>
    %53 = arith.subf %49, %52 : vector<8x8xf32>
    %54 = math.exp %53 : vector<8x8xf32>
    %cst_24 = arith.constant dense<0.000000e+00> : vector<8xf32>
    %55 = vector.multi_reduction <add>, %54, %cst_24 [1] : vector<8x8xf32> to vector<8xf32>
    %56 = vector.shape_cast %55 : vector<8xf32> to vector<8x1xf32>
    %57 = tpu.reciprocal %56 {approx = true} : vector<8x1xf32> -> vector<8x1xf32>
    %58 = vector.broadcast %57 : vector<8x1xf32> to vector<8x8xf32>
    %59 = arith.mulf %54, %58 : vector<8x8xf32>
    %60 = arith.truncf %59 : vector<8x8xf32> to vector<8x8xbf16>
    %cst_25 = arith.constant dense<0.000000e+00> : vector<8x8xf32>
    %61 = tpu.matmul %60, %48, %cst_25 {dimension_numbers = #tpu.dot_dimension_numbers<[1], [0], [0], [1], [0, 0, 1, 1], [], []>} : vector<8x8xbf16>, vector<8x8xbf16>, vector<8x8xf32> -> vector<8x8xf32>
    %c0_26 = arith.constant 0 : index
    %c8 = arith.constant 8 : index
    %62 = vector.load %arg15[%c0_26, %c8] : memref<8x32xf32, #tpu.memory_space<vmem>>, vector<8x8xf32>
    tpu.vector_store %arg15[%c0_26, %c8], %61 {strides = array<i32>} : memref<8x32xf32, #tpu.memory_space<vmem>>, vector<8x8xf32>,
    %63 = vector.extract_strided_slice %17 {offsets = [0, 16], sizes = [8, 8], strides = [1, 1]} : vector<8x32xf32> to vector<8x8xf32>
    %cst_27 = arith.constant 0.353553385 : f32
    %64 = vector.broadcast %cst_27 : f32 to vector<8x8xf32>
    %65 = arith.mulf %63, %64 : vector<8x8xf32>
    %66 = arith.truncf %65 : vector<8x8xf32> to vector<8x8xbf16>
    %67 = vector.extract_strided_slice %18 {offsets = [0, 16], sizes = [8, 8], strides = [1, 1]} : vector<8x32xf32> to vector<8x8xf32>
    %68 = arith.truncf %67 : vector<8x8xf32> to vector<8x8xbf16>
    %69 = vector.extract_strided_slice %16 {offsets = [0, 16], sizes = [8, 8], strides = [1, 1]} : vector<8x32xf32> to vector<8x8xf32>
    %70 = arith.truncf %69 : vector<8x8xf32> to vector<8x8xbf16>
    %cst_28 = arith.constant dense<0.000000e+00> : vector<8x8xf32>
    %71 = tpu.matmul %66, %68, %cst_28 {dimension_numbers = #tpu.dot_dimension_numbers<[1], [1], [0], [0], [0, 0, 1, 0], [], []>} : vector<8x8xbf16>, vector<8x8xbf16>, vector<8x8xf32> -> vector<8x8xf32>
    %cst_29 = arith.constant dense<0xFF800000> : vector<8xf32>
    %72 = vector.multi_reduction <maximumf>, %71, %cst_29 [1] : vector<8x8xf32> to vector<8xf32>
    %73 = vector.shape_cast %72 : vector<8xf32> to vector<8x1xf32>
    %74 = vector.broadcast %73 : vector<8x1xf32> to vector<8x8xf32>
    %75 = arith.subf %71, %74 : vector<8x8xf32>
    %76 = math.exp %75 : vector<8x8xf32>
    %cst_30 = arith.constant dense<0.000000e+00> : vector<8xf32>
    %77 = vector.multi_reduction <add>, %76, %cst_30 [1] : vector<8x8xf32> to vector<8xf32>
    %78 = vector.shape_cast %77 : vector<8xf32> to vector<8x1xf32>
    %79 = tpu.reciprocal %78 {approx = true} : vector<8x1xf32> -> vector<8x1xf32>
    %80 = vector.broadcast %79 : vector<8x1xf32> to vector<8x8xf32>
    %81 = arith.mulf %76, %80 : vector<8x8xf32>
    %82 = arith.truncf %81 : vector<8x8xf32> to vector<8x8xbf16>
    %cst_31 = arith.constant dense<0.000000e+00> : vector<8x8xf32>
    %83 = tpu.matmul %82, %70, %cst_31 {dimension_numbers = #tpu.dot_dimension_numbers<[1], [0], [0], [1], [0, 0, 1, 1], [], []>} : vector<8x8xbf16>, vector<8x8xbf16>, vector<8x8xf32> -> vector<8x8xf32>
    %c0_32 = arith.constant 0 : index
    %c16 = arith.constant 16 : index
    %84 = vector.load %arg15[%c0_32, %c16] : memref<8x32xf32, #tpu.memory_space<vmem>>, vector<8x8xf32>
    tpu.vector_store %arg15[%c0_32, %c16], %83 {strides = array<i32>} : memref<8x32xf32, #tpu.memory_space<vmem>>, vector<8x8xf32>,
    %85 = vector.extract_strided_slice %17 {offsets = [0, 24], sizes = [8, 8], strides = [1, 1]} : vector<8x32xf32> to vector<8x8xf32>
    %cst_33 = arith.constant 0.353553385 : f32
    %86 = vector.broadcast %cst_33 : f32 to vector<8x8xf32>
    %87 = arith.mulf %85, %86 : vector<8x8xf32>
    %88 = arith.truncf %87 : vector<8x8xf32> to vector<8x8xbf16>
    %89 = vector.extract_strided_slice %18 {offsets = [0, 24], sizes = [8, 8], strides = [1, 1]} : vector<8x32xf32> to vector<8x8xf32>
    %90 = arith.truncf %89 : vector<8x8xf32> to vector<8x8xbf16>
    %91 = vector.extract_strided_slice %16 {offsets = [0, 24], sizes = [8, 8], strides = [1, 1]} : vector<8x32xf32> to vector<8x8xf32>
    %92 = arith.truncf %91 : vector<8x8xf32> to vector<8x8xbf16>
    %cst_34 = arith.constant dense<0.000000e+00> : vector<8x8xf32>
    %93 = tpu.matmul %88, %90, %cst_34 {dimension_numbers = #tpu.dot_dimension_numbers<[1], [1], [0], [0], [0, 0, 1, 0], [], []>} : vector<8x8xbf16>, vector<8x8xbf16>, vector<8x8xf32> -> vector<8x8xf32>
    %cst_35 = arith.constant dense<0xFF800000> : vector<8xf32>
    %94 = vector.multi_reduction <maximumf>, %93, %cst_35 [1] : vector<8x8xf32> to vector<8xf32>
    %95 = vector.shape_cast %94 : vector<8xf32> to vector<8x1xf32>
    %96 = vector.broadcast %95 : vector<8x1xf32> to vector<8x8xf32>
    %97 = arith.subf %93, %96 : vector<8x8xf32>
    %98 = math.exp %97 : vector<8x8xf32>
    %cst_36 = arith.constant dense<0.000000e+00> : vector<8xf32>
    %99 = vector.multi_reduction <add>, %98, %cst_36 [1] : vector<8x8xf32> to vector<8xf32>
    %100 = vector.shape_cast %99 : vector<8xf32> to vector<8x1xf32>
    %101 = tpu.reciprocal %100 {approx = true} : vector<8x1xf32> -> vector<8x1xf32>
    %102 = vector.broadcast %101 : vector<8x1xf32> to vector<8x8xf32>
    %103 = arith.mulf %98, %102 : vector<8x8xf32>
    %104 = arith.truncf %103 : vector<8x8xf32> to vector<8x8xbf16>
    %cst_37 = arith.constant dense<0.000000e+00> : vector<8x8xf32>
    %105 = tpu.matmul %104, %92, %cst_37 {dimension_numbers = #tpu.dot_dimension_numbers<[1], [0], [0], [1], [0, 0, 1, 1], [], []>} : vector<8x8xbf16>, vector<8x8xbf16>, vector<8x8xf32> -> vector<8x8xf32>
    %c0_38 = arith.constant 0 : index
    %c24 = arith.constant 24 : index
    %106 = vector.load %arg15[%c0_38, %c24] : memref<8x32xf32, #tpu.memory_space<vmem>>, vector<8x8xf32>
    tpu.vector_store %arg15[%c0_38, %c24], %105 {strides = array<i32>} : memref<8x32xf32, #tpu.memory_space<vmem>>, vector<8x8xf32>,
    %c0_39 = arith.constant 0 : index
    %c0_40 = arith.constant 0 : index
    %107 = vector.load %arg15[%c0_39, %c0_40] : memref<8x32xf32, #tpu.memory_space<vmem>>, vector<8x32xf32>
    %108 = arith.truncf %107 : vector<8x32xf32> to vector<8x32xbf16>
    %c0_41 = arith.constant 0 : index
    %c0_42 = arith.constant 0 : index
    %109 = vector.load %arg7[%c0_41, %c0_42] : memref<32x32xbf16, #tpu.memory_space<vmem>>, vector<32x32xbf16>
    %cst_43 = arith.constant dense<0.000000e+00> : vector<8x32xf32>
    %110 = tpu.matmul %108, %109, %cst_43 {dimension_numbers = #tpu.dot_dimension_numbers<[1], [0], [0], [1], [0, 0, 1, 1], [], []>} : vector<8x32xbf16>, vector<32x32xbf16>, vector<8x32xf32> -> vector<8x32xf32>
    %c0_44 = arith.constant 0 : index
    %c0_45 = arith.constant 0 : index
    %111 = vector.load %arg8[%c0_44, %c0_45] : memref<1x32xf32, #tpu.memory_space<vmem>>, vector<1x32xf32>
    %112 = vector.broadcast %111 : vector<1x32xf32> to vector<8x32xf32>
    %113 = arith.addf %110, %112 : vector<8x32xf32>
    %114 = arith.addf %1, %113 : vector<8x32xf32>
    %cst_46 = arith.constant dense<0.000000e+00> : vector<8xf32>
    %115 = vector.multi_reduction <add>, %114, %cst_46 [1] : vector<8x32xf32> to vector<8xf32>
    %116 = vector.shape_cast %115 : vector<8xf32> to vector<8x1xf32>
    %cst_47 = arith.constant 3.200000e+01 : f32
    %117 = vector.broadcast %cst_47 : f32 to vector<8x1xf32>
    %118 = arith.divf %116, %117 : vector<8x1xf32>
    %119 = vector.broadcast %118 : vector<8x1xf32> to vector<8x32xf32>
    %120 = arith.subf %114, %119 : vector<8x32xf32>
    %121 = arith.mulf %120, %120 : vector<8x32xf32>
    %cst_48 = arith.constant dense<0.000000e+00> : vector<8xf32>
    %122 = vector.multi_reduction <add>, %121, %cst_48 [1] : vector<8x32xf32> to vector<8xf32>
    %123 = vector.shape_cast %122 : vector<8xf32> to vector<8x1xf32>
    %cst_49 = arith.constant 3.200000e+01 : f32
    %124 = vector.broadcast %cst_49 : f32 to vector<8x1xf32>
    %125 = arith.divf %123, %124 : vector<8x1xf32>
    %126 = vector.broadcast %118 : vector<8x1xf32> to vector<8x32xf32>
    %127 = arith.subf %114, %126 : vector<8x32xf32>
    %cst_50 = arith.constant 9.99999974E-6 : f32
    %128 = vector.broadcast %cst_50 : f32 to vector<8x1xf32>
    %129 = arith.addf %125, %128 : vector<8x1xf32>
    %130 = math.rsqrt %129 : vector<8x1xf32>
    %131 = vector.broadcast %130 : vector<8x1xf32> to vector<8x32xf32>
    %132 = arith.mulf %127, %131 : vector<8x32xf32>
    %c0_51 = arith.constant 0 : index
    %c0_52 = arith.constant 0 : index
    %133 = vector.load %arg9[%c0_51, %c0_52] : memref<1x32xf32, #tpu.memory_space<vmem>>, vector<1x32xf32>
    %134 = vector.broadcast %133 : vector<1x32xf32> to vector<8x32xf32>
    %135 = arith.mulf %132, %134 : vector<8x32xf32>
    %c0_53 = arith.constant 0 : index
    %c0_54 = arith.constant 0 : index
    %136 = vector.load %arg10[%c0_53, %c0_54] : memref<1x32xf32, #tpu.memory_space<vmem>>, vector<1x32xf32>
    %137 = vector.broadcast %136 : vector<1x32xf32> to vector<8x32xf32>
    %138 = arith.addf %135, %137 : vector<8x32xf32>
    %c0_55 = arith.constant 0 : index
    %c0_56 = arith.constant 0 : index
    %c0_57 = arith.constant 0 : index
    %139 = vector.load %arg13[%c0_55, %c0_56, %c0_57] : memref<1x8x32xf32, #tpu.memory_space<vmem>>, vector<1x8x32xf32>
    %140 = vector.shape_cast %139 : vector<1x8x32xf32> to vector<8x32xf32>
    %141 = vector.shape_cast %138 : vector<8x32xf32> to vector<1x8x32xf32>
    tpu.vector_store %arg13[%c0_55, %c0_56, %c0_57], %141 {strides = array<i32>} : memref<1x8x32xf32, #tpu.memory_space<vmem>>, vector<1x8x32xf32>,
    %142 = arith.addf %138, %3 : vector<8x32xf32>
    %143 = arith.truncf %142 : vector<8x32xf32> to vector<8x32xbf16>
    %c0_58 = arith.constant 0 : index
    %c0_59 = arith.constant 0 : index
    %144 = vector.load %arg11[%c0_58, %c0_59] : memref<32x48xbf16, #tpu.memory_space<vmem>>, vector<32x48xbf16>
    %cst_60 = arith.constant dense<0.000000e+00> : vector<8x48xf32>
    %145 = tpu.matmul %143, %144, %cst_60 {dimension_numbers = #tpu.dot_dimension_numbers<[1], [0], [0], [1], [0, 0, 1, 1], [], []>} : vector<8x32xbf16>, vector<32x48xbf16>, vector<8x48xf32> -> vector<8x48xf32>
    %c0_61 = arith.constant 0 : index
    %c0_62 = arith.constant 0 : index
    %146 = vector.load %arg12[%c0_61, %c0_62] : memref<1x48xf32, #tpu.memory_space<vmem>>, vector<1x48xf32>
    %147 = vector.broadcast %146 : vector<1x48xf32> to vector<8x48xf32>
    %148 = arith.addf %145, %147 : vector<8x48xf32>
    %c0_63 = arith.constant 0 : index
    %c0_64 = arith.constant 0 : index
    %c0_65 = arith.constant 0 : index
    %149 = vector.load %arg14[%c0_63, %c0_64, %c0_65] : memref<1x8x48xf32, #tpu.memory_space<vmem>>, vector<1x8x48xf32>
    %150 = vector.shape_cast %149 : vector<1x8x48xf32> to vector<8x48xf32>
    %151 = vector.shape_cast %148 : vector<8x48xf32> to vector<1x8x48xf32>
    tpu.vector_store %arg14[%c0_63, %c0_64, %c0_65], %151 {strides = array<i32>} : memref<1x8x48xf32, #tpu.memory_space<vmem>>, vector<1x8x48xf32>,
    return
  }
  func.func @transform_0(%arg0: i32) -> (i32, i32, i32) {
    %c0_i32 = arith.constant 0 : i32
    %c0_i32_0 = arith.constant 0 : i32
    %c0_i32_1 = arith.constant 0 : i32
    return %arg0, %c0_i32, %c0_i32_0 : i32, i32, i32
  }
  func.func @transform_1(%arg0: i32) -> (i32, i32, i32) {
    %c0_i32 = arith.constant 0 : i32
    %c0_i32_0 = arith.constant 0 : i32
    %c0_i32_1 = arith.constant 0 : i32
    return %arg0, %c0_i32, %c0_i32_0 : i32, i32, i32
  }
  func.func @transform_2(%arg0: i32) -> (i32, i32) {
    %c0_i32 = arith.constant 0 : i32
    %c0_i32_0 = arith.constant 0 : i32
    %c0_i32_1 = arith.constant 0 : i32
    return %c0_i32, %c0_i32_0 : i32, i32
  }
  func.func @transform_3(%arg0: i32) -> (i32, i32) {
    %c0_i32 = arith.constant 0 : i32
    %c0_i32_0 = arith.constant 0 : i32
    %c0_i32_1 = arith.constant 0 : i32
    return %c0_i32, %c0_i32_0 : i32, i32
  }
  func.func @transform_4(%arg0: i32) -> (i32, i32) {
    %c0_i32 = arith.constant 0 : i32
    %c0_i32_0 = arith.constant 0 : i32
    %c0_i32_1 = arith.constant 0 : i32
    return %c0_i32, %c0_i32_0 : i32, i32
  }
  func.func @transform_5(%arg0: i32) -> (i32, i32) {
    %c0_i32 = arith.constant 0 : i32
    %c0_i32_0 = arith.constant 0 : i32
    %c0_i32_1 = arith.constant 0 : i32
    return %c0_i32, %c0_i32_0 : i32, i32
  }
  func.func @transform_6(%arg0: i32) -> (i32, i32) {
    %c0_i32 = arith.constant 0 : i32
    %c0_i32_0 = arith.constant 0 : i32
    %c0_i32_1 = arith.constant 0 : i32
    return %c0_i32, %c0_i32_0 : i32, i32
  }
  func.func @transform_7(%arg0: i32) -> (i32, i32) {
    %c0_i32 = arith.constant 0 : i32
    %c0_i32_0 = arith.constant 0 : i32
    %c0_i32_1 = arith.constant 0 : i32
    return %c0_i32, %c0_i32_0 : i32, i32
  }
  func.func @transform_8(%arg0: i32) -> (i32, i32) {
    %c0_i32 = arith.constant 0 : i32
    %c0_i32_0 = arith.constant 0 : i32
    %c0_i32_1 = arith.constant 0 : i32
    return %c0_i32, %c0_i32_0 : i32, i32
  }
  func.func @transform_9(%arg0: i32) -> (i32, i32) {
    %c0_i32 = arith.constant 0 : i32
    %c0_i32_0 = arith.constant 0 : i32
    %c0_i32_1 = arith.constant 0 : i32
    return %c0_i32, %c0_i32_0 : i32, i32
  }
  func.func @transform_10(%arg0: i32) -> (i32, i32) {
    %c0_i32 = arith.constant 0 : i32
    %c0_i32_0 = arith.constant 0 : i32
    %c0_i32_1 = arith.constant 0 : i32
    return %c0_i32, %c0_i32_0 : i32, i32
  }
  func.func @transform_11(%arg0: i32) -> (i32, i32) {
    %c0_i32 = arith.constant 0 : i32
    %c0_i32_0 = arith.constant 0 : i32
    %c0_i32_1 = arith.constant 0 : i32
    return %c0_i32, %c0_i32_0 : i32, i32
  }
  func.func @transform_12(%arg0: i32) -> (i32, i32, i32) {
    %c0_i32 = arith.constant 0 : i32
    %c0_i32_0 = arith.constant 0 : i32
    %c0_i32_1 = arith.constant 0 : i32
    return %arg0, %c0_i32, %c0_i32_0 : i32, i32, i32
  }
  func.func @transform_13(%arg0: i32) -> (i32, i32, i32) {
    %c0_i32 = arith.constant 0 : i32
    %c0_i32_0 = arith.constant 0 : i32
    %c0_i32_1 = arith.constant 0 : i32
    return %arg0, %c0_i32, %c0_i32_0 : i32, i32, i32
  }
}

module attributes {stable_mosaic.version = 11 : i64} {
  func.func @_value_proj_kernel(%arg0: i32, %arg1: memref<192x32xf32, #tpu.memory_space<vmem>>, %arg2: memref<32x32xbf16, #tpu.memory_space<vmem>>, %arg3: memref<1x32xf32, #tpu.memory_space<vmem>>, %arg4: memref<192x1xf32, #tpu.memory_space<vmem>>, %arg5: memref<192x32xbf16, #tpu.memory_space<vmem>>) attributes {dimension_semantics = [#tpu.dimension_semantics<parallel>], iteration_bounds = array<i64: 1>, scalar_prefetch = 0 : i64, scratch_operands = 0 : i64, tpu.core_type = #tpu.core_type<tc>, window_params = [{transform_indices = @transform_0, window_bounds = array<i64: 192, 32>}, {pipeline_mode = #tpu.pipeline_mode<synchronous>, transform_indices = @transform_1, window_bounds = array<i64: 32, 32>}, {pipeline_mode = #tpu.pipeline_mode<synchronous>, transform_indices = @transform_2, window_bounds = array<i64: 1, 32>}, {transform_indices = @transform_3, window_bounds = array<i64: 192, 1>}, {transform_indices = @transform_4, window_bounds = array<i64: 192, 32>}]} {
    %c0 = arith.constant 0 : index
    %c0_0 = arith.constant 0 : index
    %0 = vector.load %arg1[%c0, %c0_0] : memref<192x32xf32, #tpu.memory_space<vmem>>, vector<192x32xf32>
    %1 = arith.truncf %0 : vector<192x32xf32> to vector<192x32xbf16>
    %c0_1 = arith.constant 0 : index
    %c0_2 = arith.constant 0 : index
    %2 = vector.load %arg2[%c0_1, %c0_2] : memref<32x32xbf16, #tpu.memory_space<vmem>>, vector<32x32xbf16>
    %cst = arith.constant dense<0.000000e+00> : vector<192x32xf32>
    %3 = tpu.matmul %1, %2, %cst {dimension_numbers = #tpu.dot_dimension_numbers<[1], [0], [0], [1], [0, 0, 1, 1], [], []>} : vector<192x32xbf16>, vector<32x32xbf16>, vector<192x32xf32> -> vector<192x32xf32>
    %c0_3 = arith.constant 0 : index
    %c0_4 = arith.constant 0 : index
    %4 = vector.load %arg3[%c0_3, %c0_4] : memref<1x32xf32, #tpu.memory_space<vmem>>, vector<1x32xf32>
    %5 = vector.broadcast %4 : vector<1x32xf32> to vector<192x32xf32>
    %6 = arith.addf %3, %5 : vector<192x32xf32>
    %c0_5 = arith.constant 0 : index
    %c0_6 = arith.constant 0 : index
    %7 = vector.load %arg4[%c0_5, %c0_6] : memref<192x1xf32, #tpu.memory_space<vmem>>, vector<192x1xf32>
    %8 = vector.broadcast %7 : vector<192x1xf32> to vector<192x32xf32>
    %9 = arith.mulf %6, %8 : vector<192x32xf32>
    %10 = arith.truncf %9 : vector<192x32xf32> to vector<192x32xbf16>
    %c0_7 = arith.constant 0 : index
    %c0_8 = arith.constant 0 : index
    %11 = vector.load %arg5[%c0_7, %c0_8] : memref<192x32xbf16, #tpu.memory_space<vmem>>, vector<192x32xbf16>
    tpu.vector_store %arg5[%c0_7, %c0_8], %10 {strides = array<i32>} : memref<192x32xbf16, #tpu.memory_space<vmem>>, vector<192x32xbf16>,
    return
  }
  func.func @transform_0(%arg0: i32) -> (i32, i32) {
    %c0_i32 = arith.constant 0 : i32
    %c0_i32_0 = arith.constant 0 : i32
    return %arg0, %c0_i32 : i32, i32
  }
  func.func @transform_1(%arg0: i32) -> (i32, i32) {
    %c0_i32 = arith.constant 0 : i32
    %c0_i32_0 = arith.constant 0 : i32
    %c0_i32_1 = arith.constant 0 : i32
    return %c0_i32, %c0_i32_0 : i32, i32
  }
  func.func @transform_2(%arg0: i32) -> (i32, i32) {
    %c0_i32 = arith.constant 0 : i32
    %c0_i32_0 = arith.constant 0 : i32
    %c0_i32_1 = arith.constant 0 : i32
    return %c0_i32, %c0_i32_0 : i32, i32
  }
  func.func @transform_3(%arg0: i32) -> (i32, i32) {
    %c0_i32 = arith.constant 0 : i32
    %c0_i32_0 = arith.constant 0 : i32
    return %arg0, %c0_i32 : i32, i32
  }
  func.func @transform_4(%arg0: i32) -> (i32, i32) {
    %c0_i32 = arith.constant 0 : i32
    %c0_i32_0 = arith.constant 0 : i32
    return %arg0, %c0_i32 : i32, i32
  }
}

module attributes {stable_mosaic.version = 11 : i64} {
  func.func @_msda_kernel(%arg0: i32, %arg1: i32, %arg2: memref<1x4x8x16xi32, #tpu.memory_space<vmem>>, %arg3: memref<1x4x8x16xf32, #tpu.memory_space<vmem>>, %arg4: memref<1x48x32xbf16, #tpu.memory_space<vmem>>, %arg5: memref<1x8x32xf32, #tpu.memory_space<vmem>>, %arg6: memref<32x32xbf16, #tpu.memory_space<vmem>>, %arg7: memref<1x32xf32, #tpu.memory_space<vmem>>, %arg8: memref<1x32xf32, #tpu.memory_space<vmem>>, %arg9: memref<1x32xf32, #tpu.memory_space<vmem>>, %arg10: memref<1x8x32xf32, #tpu.memory_space<vmem>>, %arg11: memref<8x32xf32, #tpu.memory_space<vmem>>) attributes {dimension_semantics = [#tpu.dimension_semantics<parallel>, #tpu.dimension_semantics<arbitrary>], iteration_bounds = array<i64: 2, 2>, scalar_prefetch = 0 : i64, scratch_operands = 1 : i64, tpu.core_type = #tpu.core_type<tc>, window_params = [{transform_indices = @transform_0, window_bounds = array<i64: 1, 4, 8, 16>}, {transform_indices = @transform_1, window_bounds = array<i64: 1, 4, 8, 16>}, {transform_indices = @transform_2, window_bounds = array<i64: 1, 48, 32>}, {transform_indices = @transform_3, window_bounds = array<i64: 1, 8, 32>}, {pipeline_mode = #tpu.pipeline_mode<synchronous>, transform_indices = @transform_4, window_bounds = array<i64: 32, 32>}, {pipeline_mode = #tpu.pipeline_mode<synchronous>, transform_indices = @transform_5, window_bounds = array<i64: 1, 32>}, {pipeline_mode = #tpu.pipeline_mode<synchronous>, transform_indices = @transform_6, window_bounds = array<i64: 1, 32>}, {pipeline_mode = #tpu.pipeline_mode<synchronous>, transform_indices = @transform_7, window_bounds = array<i64: 1, 32>}, {transform_indices = @transform_8, window_bounds = array<i64: 1, 8, 32>}]} {
    %c0_i32 = arith.constant 0 : i32
    %0 = arith.cmpi eq, %arg1, %c0_i32 : i32
    %1 = arith.extui %0 : i1 to i32
    %c0_i32_0 = arith.constant 0 : i32
    %2 = arith.cmpi ne, %1, %c0_i32_0 : i32
    scf.if %2 {
      %cst_113 = arith.constant 0.000000e+00 : f32
      %630 = vector.broadcast %cst_113 : f32 to vector<8x32xf32>
      %c0_114 = arith.constant 0 : index
      %c0_115 = arith.constant 0 : index
      %631 = vector.load %arg11[%c0_114, %c0_115] : memref<8x32xf32, #tpu.memory_space<vmem>>, vector<8x32xf32>
      tpu.vector_store %arg11[%c0_114, %c0_115], %630 {strides = array<i32>} : memref<8x32xf32, #tpu.memory_space<vmem>>, vector<8x32xf32>,
    } else {
    }
    %c48_i32 = arith.constant 48 : i32
    %3 = arith.muli %arg1, %c48_i32 : i32
    %4 = tpu.iota {dimensions = array<i32: 1>} : vector<8x48xi32>
    %c0 = arith.constant 0 : index
    %c0_1 = arith.constant 0 : index
    %c0_2 = arith.constant 0 : index
    %5 = vector.load %arg4[%c0, %c0_1, %c0_2] : memref<1x48x32xbf16, #tpu.memory_space<vmem>>, vector<1x48x32xbf16>
    %6 = vector.shape_cast %5 : vector<1x48x32xbf16> to vector<48x32xbf16>
    %c0_3 = arith.constant 0 : index
    %c0_4 = arith.constant 0 : index
    %c0_5 = arith.constant 0 : index
    %c0_6 = arith.constant 0 : index
    %7 = vector.load %arg2[%c0_3, %c0_4, %c0_5, %c0_6] : memref<1x4x8x16xi32, #tpu.memory_space<vmem>>, vector<1x1x8x16xi32>
    %8 = vector.shape_cast %7 : vector<1x1x8x16xi32> to vector<8x16xi32>
    %9 = vector.broadcast %3 : i32 to vector<8x16xi32>
    %10 = arith.subi %8, %9 : vector<8x16xi32>
    %c0_7 = arith.constant 0 : index
    %c0_8 = arith.constant 0 : index
    %c0_9 = arith.constant 0 : index
    %c0_10 = arith.constant 0 : index
    %11 = vector.load %arg3[%c0_7, %c0_8, %c0_9, %c0_10] : memref<1x4x8x16xf32, #tpu.memory_space<vmem>>, vector<1x1x8x16xf32>
    %12 = vector.shape_cast %11 : vector<1x1x8x16xf32> to vector<8x16xf32>
    %13 = vector.extract_strided_slice %10 {offsets = [0, 0], sizes = [8, 1], strides = [1, 1]} : vector<8x16xi32> to vector<8x1xi32>
    %14 = vector.broadcast %13 : vector<8x1xi32> to vector<8x48xi32>
    %15 = arith.cmpi eq, %14, %4 : vector<8x48xi32>
    %16 = vector.extract_strided_slice %12 {offsets = [0, 0], sizes = [8, 1], strides = [1, 1]} : vector<8x16xf32> to vector<8x1xf32>
    %cst = arith.constant 0.000000e+00 : f32
    %17 = vector.shape_cast %16 : vector<8x1xf32> to vector<8x1xf32>
    %18 = vector.broadcast %17 : vector<8x1xf32> to vector<8x48xf32>
    %19 = vector.broadcast %cst : f32 to vector<8x48xf32>
    %20 = arith.select %15, %18, %19 : vector<8x48xi1>, vector<8x48xf32>
    %21 = vector.extract_strided_slice %10 {offsets = [0, 1], sizes = [8, 1], strides = [1, 1]} : vector<8x16xi32> to vector<8x1xi32>
    %22 = vector.broadcast %21 : vector<8x1xi32> to vector<8x48xi32>
    %23 = arith.cmpi eq, %22, %4 : vector<8x48xi32>
    %24 = vector.extract_strided_slice %12 {offsets = [0, 1], sizes = [8, 1], strides = [1, 1]} : vector<8x16xf32> to vector<8x1xf32>
    %cst_11 = arith.constant 0.000000e+00 : f32
    %25 = vector.shape_cast %24 : vector<8x1xf32> to vector<8x1xf32>
    %26 = vector.broadcast %25 : vector<8x1xf32> to vector<8x48xf32>
    %27 = vector.broadcast %cst_11 : f32 to vector<8x48xf32>
    %28 = arith.select %23, %26, %27 : vector<8x48xi1>, vector<8x48xf32>
    %29 = vector.extract_strided_slice %10 {offsets = [0, 2], sizes = [8, 1], strides = [1, 1]} : vector<8x16xi32> to vector<8x1xi32>
    %30 = vector.broadcast %29 : vector<8x1xi32> to vector<8x48xi32>
    %31 = arith.cmpi eq, %30, %4 : vector<8x48xi32>
    %32 = vector.extract_strided_slice %12 {offsets = [0, 2], sizes = [8, 1], strides = [1, 1]} : vector<8x16xf32> to vector<8x1xf32>
    %cst_12 = arith.constant 0.000000e+00 : f32
    %33 = vector.shape_cast %32 : vector<8x1xf32> to vector<8x1xf32>
    %34 = vector.broadcast %33 : vector<8x1xf32> to vector<8x48xf32>
    %35 = vector.broadcast %cst_12 : f32 to vector<8x48xf32>
    %36 = arith.select %31, %34, %35 : vector<8x48xi1>, vector<8x48xf32>
    %37 = vector.extract_strided_slice %10 {offsets = [0, 3], sizes = [8, 1], strides = [1, 1]} : vector<8x16xi32> to vector<8x1xi32>
    %38 = vector.broadcast %37 : vector<8x1xi32> to vector<8x48xi32>
    %39 = arith.cmpi eq, %38, %4 : vector<8x48xi32>
    %40 = vector.extract_strided_slice %12 {offsets = [0, 3], sizes = [8, 1], strides = [1, 1]} : vector<8x16xf32> to vector<8x1xf32>
    %cst_13 = arith.constant 0.000000e+00 : f32
    %41 = vector.shape_cast %40 : vector<8x1xf32> to vector<8x1xf32>
    %42 = vector.broadcast %41 : vector<8x1xf32> to vector<8x48xf32>
    %43 = vector.broadcast %cst_13 : f32 to vector<8x48xf32>
    %44 = arith.select %39, %42, %43 : vector<8x48xi1>, vector<8x48xf32>
    %45 = vector.extract_strided_slice %10 {offsets = [0, 4], sizes = [8, 1], strides = [1, 1]} : vector<8x16xi32> to vector<8x1xi32>
    %46 = vector.broadcast %45 : vector<8x1xi32> to vector<8x48xi32>
    %47 = arith.cmpi eq, %46, %4 : vector<8x48xi32>
    %48 = vector.extract_strided_slice %12 {offsets = [0, 4], sizes = [8, 1], strides = [1, 1]} : vector<8x16xf32> to vector<8x1xf32>
    %cst_14 = arith.constant 0.000000e+00 : f32
    %49 = vector.shape_cast %48 : vector<8x1xf32> to vector<8x1xf32>
    %50 = vector.broadcast %49 : vector<8x1xf32> to vector<8x48xf32>
    %51 = vector.broadcast %cst_14 : f32 to vector<8x48xf32>
    %52 = arith.select %47, %50, %51 : vector<8x48xi1>, vector<8x48xf32>
    %53 = vector.extract_strided_slice %10 {offsets = [0, 5], sizes = [8, 1], strides = [1, 1]} : vector<8x16xi32> to vector<8x1xi32>
    %54 = vector.broadcast %53 : vector<8x1xi32> to vector<8x48xi32>
    %55 = arith.cmpi eq, %54, %4 : vector<8x48xi32>
    %56 = vector.extract_strided_slice %12 {offsets = [0, 5], sizes = [8, 1], strides = [1, 1]} : vector<8x16xf32> to vector<8x1xf32>
    %cst_15 = arith.constant 0.000000e+00 : f32
    %57 = vector.shape_cast %56 : vector<8x1xf32> to vector<8x1xf32>
    %58 = vector.broadcast %57 : vector<8x1xf32> to vector<8x48xf32>
    %59 = vector.broadcast %cst_15 : f32 to vector<8x48xf32>
    %60 = arith.select %55, %58, %59 : vector<8x48xi1>, vector<8x48xf32>
    %61 = vector.extract_strided_slice %10 {offsets = [0, 6], sizes = [8, 1], strides = [1, 1]} : vector<8x16xi32> to vector<8x1xi32>
    %62 = vector.broadcast %61 : vector<8x1xi32> to vector<8x48xi32>
    %63 = arith.cmpi eq, %62, %4 : vector<8x48xi32>
    %64 = vector.extract_strided_slice %12 {offsets = [0, 6], sizes = [8, 1], strides = [1, 1]} : vector<8x16xf32> to vector<8x1xf32>
    %cst_16 = arith.constant 0.000000e+00 : f32
    %65 = vector.shape_cast %64 : vector<8x1xf32> to vector<8x1xf32>
    %66 = vector.broadcast %65 : vector<8x1xf32> to vector<8x48xf32>
    %67 = vector.broadcast %cst_16 : f32 to vector<8x48xf32>
    %68 = arith.select %63, %66, %67 : vector<8x48xi1>, vector<8x48xf32>
    %69 = vector.extract_strided_slice %10 {offsets = [0, 7], sizes = [8, 1], strides = [1, 1]} : vector<8x16xi32> to vector<8x1xi32>
    %70 = vector.broadcast %69 : vector<8x1xi32> to vector<8x48xi32>
    %71 = arith.cmpi eq, %70, %4 : vector<8x48xi32>
    %72 = vector.extract_strided_slice %12 {offsets = [0, 7], sizes = [8, 1], strides = [1, 1]} : vector<8x16xf32> to vector<8x1xf32>
    %cst_17 = arith.constant 0.000000e+00 : f32
    %73 = vector.shape_cast %72 : vector<8x1xf32> to vector<8x1xf32>
    %74 = vector.broadcast %73 : vector<8x1xf32> to vector<8x48xf32>
    %75 = vector.broadcast %cst_17 : f32 to vector<8x48xf32>
    %76 = arith.select %71, %74, %75 : vector<8x48xi1>, vector<8x48xf32>
    %77 = vector.extract_strided_slice %10 {offsets = [0, 8], sizes = [8, 1], strides = [1, 1]} : vector<8x16xi32> to vector<8x1xi32>
    %78 = vector.broadcast %77 : vector<8x1xi32> to vector<8x48xi32>
    %79 = arith.cmpi eq, %78, %4 : vector<8x48xi32>
    %80 = vector.extract_strided_slice %12 {offsets = [0, 8], sizes = [8, 1], strides = [1, 1]} : vector<8x16xf32> to vector<8x1xf32>
    %cst_18 = arith.constant 0.000000e+00 : f32
    %81 = vector.shape_cast %80 : vector<8x1xf32> to vector<8x1xf32>
    %82 = vector.broadcast %81 : vector<8x1xf32> to vector<8x48xf32>
    %83 = vector.broadcast %cst_18 : f32 to vector<8x48xf32>
    %84 = arith.select %79, %82, %83 : vector<8x48xi1>, vector<8x48xf32>
    %85 = vector.extract_strided_slice %10 {offsets = [0, 9], sizes = [8, 1], strides = [1, 1]} : vector<8x16xi32> to vector<8x1xi32>
    %86 = vector.broadcast %85 : vector<8x1xi32> to vector<8x48xi32>
    %87 = arith.cmpi eq, %86, %4 : vector<8x48xi32>
    %88 = vector.extract_strided_slice %12 {offsets = [0, 9], sizes = [8, 1], strides = [1, 1]} : vector<8x16xf32> to vector<8x1xf32>
    %cst_19 = arith.constant 0.000000e+00 : f32
    %89 = vector.shape_cast %88 : vector<8x1xf32> to vector<8x1xf32>
    %90 = vector.broadcast %89 : vector<8x1xf32> to vector<8x48xf32>
    %91 = vector.broadcast %cst_19 : f32 to vector<8x48xf32>
    %92 = arith.select %87, %90, %91 : vector<8x48xi1>, vector<8x48xf32>
    %93 = vector.extract_strided_slice %10 {offsets = [0, 10], sizes = [8, 1], strides = [1, 1]} : vector<8x16xi32> to vector<8x1xi32>
    %94 = vector.broadcast %93 : vector<8x1xi32> to vector<8x48xi32>
    %95 = arith.cmpi eq, %94, %4 : vector<8x48xi32>
    %96 = vector.extract_strided_slice %12 {offsets = [0, 10], sizes = [8, 1], strides = [1, 1]} : vector<8x16xf32> to vector<8x1xf32>
    %cst_20 = arith.constant 0.000000e+00 : f32
    %97 = vector.shape_cast %96 : vector<8x1xf32> to vector<8x1xf32>
    %98 = vector.broadcast %97 : vector<8x1xf32> to vector<8x48xf32>
    %99 = vector.broadcast %cst_20 : f32 to vector<8x48xf32>
    %100 = arith.select %95, %98, %99 : vector<8x48xi1>, vector<8x48xf32>
    %101 = vector.extract_strided_slice %10 {offsets = [0, 11], sizes = [8, 1], strides = [1, 1]} : vector<8x16xi32> to vector<8x1xi32>
    %102 = vector.broadcast %101 : vector<8x1xi32> to vector<8x48xi32>
    %103 = arith.cmpi eq, %102, %4 : vector<8x48xi32>
    %104 = vector.extract_strided_slice %12 {offsets = [0, 11], sizes = [8, 1], strides = [1, 1]} : vector<8x16xf32> to vector<8x1xf32>
    %cst_21 = arith.constant 0.000000e+00 : f32
    %105 = vector.shape_cast %104 : vector<8x1xf32> to vector<8x1xf32>
    %106 = vector.broadcast %105 : vector<8x1xf32> to vector<8x48xf32>
    %107 = vector.broadcast %cst_21 : f32 to vector<8x48xf32>
    %108 = arith.select %103, %106, %107 : vector<8x48xi1>, vector<8x48xf32>
    %109 = vector.extract_strided_slice %10 {offsets = [0, 12], sizes = [8, 1], strides = [1, 1]} : vector<8x16xi32> to vector<8x1xi32>
    %110 = vector.broadcast %109 : vector<8x1xi32> to vector<8x48xi32>
    %111 = arith.cmpi eq, %110, %4 : vector<8x48xi32>
    %112 = vector.extract_strided_slice %12 {offsets = [0, 12], sizes = [8, 1], strides = [1, 1]} : vector<8x16xf32> to vector<8x1xf32>
    %cst_22 = arith.constant 0.000000e+00 : f32
    %113 = vector.shape_cast %112 : vector<8x1xf32> to vector<8x1xf32>
    %114 = vector.broadcast %113 : vector<8x1xf32> to vector<8x48xf32>
    %115 = vector.broadcast %cst_22 : f32 to vector<8x48xf32>
    %116 = arith.select %111, %114, %115 : vector<8x48xi1>, vector<8x48xf32>
    %117 = vector.extract_strided_slice %10 {offsets = [0, 13], sizes = [8, 1], strides = [1, 1]} : vector<8x16xi32> to vector<8x1xi32>
    %118 = vector.broadcast %117 : vector<8x1xi32> to vector<8x48xi32>
    %119 = arith.cmpi eq, %118, %4 : vector<8x48xi32>
    %120 = vector.extract_strided_slice %12 {offsets = [0, 13], sizes = [8, 1], strides = [1, 1]} : vector<8x16xf32> to vector<8x1xf32>
    %cst_23 = arith.constant 0.000000e+00 : f32
    %121 = vector.shape_cast %120 : vector<8x1xf32> to vector<8x1xf32>
    %122 = vector.broadcast %121 : vector<8x1xf32> to vector<8x48xf32>
    %123 = vector.broadcast %cst_23 : f32 to vector<8x48xf32>
    %124 = arith.select %119, %122, %123 : vector<8x48xi1>, vector<8x48xf32>
    %125 = vector.extract_strided_slice %10 {offsets = [0, 14], sizes = [8, 1], strides = [1, 1]} : vector<8x16xi32> to vector<8x1xi32>
    %126 = vector.broadcast %125 : vector<8x1xi32> to vector<8x48xi32>
    %127 = arith.cmpi eq, %126, %4 : vector<8x48xi32>
    %128 = vector.extract_strided_slice %12 {offsets = [0, 14], sizes = [8, 1], strides = [1, 1]} : vector<8x16xf32> to vector<8x1xf32>
    %cst_24 = arith.constant 0.000000e+00 : f32
    %129 = vector.shape_cast %128 : vector<8x1xf32> to vector<8x1xf32>
    %130 = vector.broadcast %129 : vector<8x1xf32> to vector<8x48xf32>
    %131 = vector.broadcast %cst_24 : f32 to vector<8x48xf32>
    %132 = arith.select %127, %130, %131 : vector<8x48xi1>, vector<8x48xf32>
    %133 = vector.extract_strided_slice %10 {offsets = [0, 15], sizes = [8, 1], strides = [1, 1]} : vector<8x16xi32> to vector<8x1xi32>
    %134 = vector.broadcast %133 : vector<8x1xi32> to vector<8x48xi32>
    %135 = arith.cmpi eq, %134, %4 : vector<8x48xi32>
    %136 = vector.extract_strided_slice %12 {offsets = [0, 15], sizes = [8, 1], strides = [1, 1]} : vector<8x16xf32> to vector<8x1xf32>
    %cst_25 = arith.constant 0.000000e+00 : f32
    %137 = vector.shape_cast %136 : vector<8x1xf32> to vector<8x1xf32>
    %138 = vector.broadcast %137 : vector<8x1xf32> to vector<8x48xf32>
    %139 = vector.broadcast %cst_25 : f32 to vector<8x48xf32>
    %140 = arith.select %135, %138, %139 : vector<8x48xi1>, vector<8x48xf32>
    %141 = arith.addf %20, %28 : vector<8x48xf32>
    %142 = arith.addf %36, %44 : vector<8x48xf32>
    %143 = arith.addf %52, %60 : vector<8x48xf32>
    %144 = arith.addf %68, %76 : vector<8x48xf32>
    %145 = arith.addf %84, %92 : vector<8x48xf32>
    %146 = arith.addf %100, %108 : vector<8x48xf32>
    %147 = arith.addf %116, %124 : vector<8x48xf32>
    %148 = arith.addf %132, %140 : vector<8x48xf32>
    %149 = arith.addf %141, %142 : vector<8x48xf32>
    %150 = arith.addf %143, %144 : vector<8x48xf32>
    %151 = arith.addf %145, %146 : vector<8x48xf32>
    %152 = arith.addf %147, %148 : vector<8x48xf32>
    %153 = arith.addf %149, %150 : vector<8x48xf32>
    %154 = arith.addf %151, %152 : vector<8x48xf32>
    %155 = arith.addf %153, %154 : vector<8x48xf32>
    %156 = vector.extract_strided_slice %6 {offsets = [0, 0], sizes = [48, 8], strides = [1, 1]} : vector<48x32xbf16> to vector<48x8xbf16>
    %c0_26 = arith.constant 0 : index
    %c0_27 = arith.constant 0 : index
    %157 = vector.load %arg11[%c0_26, %c0_27] : memref<8x32xf32, #tpu.memory_space<vmem>>, vector<8x8xf32>
    %158 = arith.truncf %155 : vector<8x48xf32> to vector<8x48xbf16>
    %cst_28 = arith.constant dense<0.000000e+00> : vector<8x8xf32>
    %159 = tpu.matmul %158, %156, %cst_28 {dimension_numbers = #tpu.dot_dimension_numbers<[1], [0], [0], [1], [0, 0, 1, 1], [], []>} : vector<8x48xbf16>, vector<48x8xbf16>, vector<8x8xf32> -> vector<8x8xf32>
    %160 = arith.addf %157, %159 : vector<8x8xf32>
    %c0_29 = arith.constant 0 : index
    %c0_30 = arith.constant 0 : index
    %161 = vector.load %arg11[%c0_29, %c0_30] : memref<8x32xf32, #tpu.memory_space<vmem>>, vector<8x8xf32>
    tpu.vector_store %arg11[%c0_29, %c0_30], %160 {strides = array<i32>} : memref<8x32xf32, #tpu.memory_space<vmem>>, vector<8x8xf32>,
    %c0_31 = arith.constant 0 : index
    %c1 = arith.constant 1 : index
    %c0_32 = arith.constant 0 : index
    %c0_33 = arith.constant 0 : index
    %162 = vector.load %arg2[%c0_31, %c1, %c0_32, %c0_33] : memref<1x4x8x16xi32, #tpu.memory_space<vmem>>, vector<1x1x8x16xi32>
    %163 = vector.shape_cast %162 : vector<1x1x8x16xi32> to vector<8x16xi32>
    %164 = vector.broadcast %3 : i32 to vector<8x16xi32>
    %165 = arith.subi %163, %164 : vector<8x16xi32>
    %c0_34 = arith.constant 0 : index
    %c1_35 = arith.constant 1 : index
    %c0_36 = arith.constant 0 : index
    %c0_37 = arith.constant 0 : index
    %166 = vector.load %arg3[%c0_34, %c1_35, %c0_36, %c0_37] : memref<1x4x8x16xf32, #tpu.memory_space<vmem>>, vector<1x1x8x16xf32>
    %167 = vector.shape_cast %166 : vector<1x1x8x16xf32> to vector<8x16xf32>
    %168 = vector.extract_strided_slice %165 {offsets = [0, 0], sizes = [8, 1], strides = [1, 1]} : vector<8x16xi32> to vector<8x1xi32>
    %169 = vector.broadcast %168 : vector<8x1xi32> to vector<8x48xi32>
    %170 = arith.cmpi eq, %169, %4 : vector<8x48xi32>
    %171 = vector.extract_strided_slice %167 {offsets = [0, 0], sizes = [8, 1], strides = [1, 1]} : vector<8x16xf32> to vector<8x1xf32>
    %cst_38 = arith.constant 0.000000e+00 : f32
    %172 = vector.shape_cast %171 : vector<8x1xf32> to vector<8x1xf32>
    %173 = vector.broadcast %172 : vector<8x1xf32> to vector<8x48xf32>
    %174 = vector.broadcast %cst_38 : f32 to vector<8x48xf32>
    %175 = arith.select %170, %173, %174 : vector<8x48xi1>, vector<8x48xf32>
    %176 = vector.extract_strided_slice %165 {offsets = [0, 1], sizes = [8, 1], strides = [1, 1]} : vector<8x16xi32> to vector<8x1xi32>
    %177 = vector.broadcast %176 : vector<8x1xi32> to vector<8x48xi32>
    %178 = arith.cmpi eq, %177, %4 : vector<8x48xi32>
    %179 = vector.extract_strided_slice %167 {offsets = [0, 1], sizes = [8, 1], strides = [1, 1]} : vector<8x16xf32> to vector<8x1xf32>
    %cst_39 = arith.constant 0.000000e+00 : f32
    %180 = vector.shape_cast %179 : vector<8x1xf32> to vector<8x1xf32>
    %181 = vector.broadcast %180 : vector<8x1xf32> to vector<8x48xf32>
    %182 = vector.broadcast %cst_39 : f32 to vector<8x48xf32>
    %183 = arith.select %178, %181, %182 : vector<8x48xi1>, vector<8x48xf32>
    %184 = vector.extract_strided_slice %165 {offsets = [0, 2], sizes = [8, 1], strides = [1, 1]} : vector<8x16xi32> to vector<8x1xi32>
    %185 = vector.broadcast %184 : vector<8x1xi32> to vector<8x48xi32>
    %186 = arith.cmpi eq, %185, %4 : vector<8x48xi32>
    %187 = vector.extract_strided_slice %167 {offsets = [0, 2], sizes = [8, 1], strides = [1, 1]} : vector<8x16xf32> to vector<8x1xf32>
    %cst_40 = arith.constant 0.000000e+00 : f32
    %188 = vector.shape_cast %187 : vector<8x1xf32> to vector<8x1xf32>
    %189 = vector.broadcast %188 : vector<8x1xf32> to vector<8x48xf32>
    %190 = vector.broadcast %cst_40 : f32 to vector<8x48xf32>
    %191 = arith.select %186, %189, %190 : vector<8x48xi1>, vector<8x48xf32>
    %192 = vector.extract_strided_slice %165 {offsets = [0, 3], sizes = [8, 1], strides = [1, 1]} : vector<8x16xi32> to vector<8x1xi32>
    %193 = vector.broadcast %192 : vector<8x1xi32> to vector<8x48xi32>
    %194 = arith.cmpi eq, %193, %4 : vector<8x48xi32>
    %195 = vector.extract_strided_slice %167 {offsets = [0, 3], sizes = [8, 1], strides = [1, 1]} : vector<8x16xf32> to vector<8x1xf32>
    %cst_41 = arith.constant 0.000000e+00 : f32
    %196 = vector.shape_cast %195 : vector<8x1xf32> to vector<8x1xf32>
    %197 = vector.broadcast %196 : vector<8x1xf32> to vector<8x48xf32>
    %198 = vector.broadcast %cst_41 : f32 to vector<8x48xf32>
    %199 = arith.select %194, %197, %198 : vector<8x48xi1>, vector<8x48xf32>
    %200 = vector.extract_strided_slice %165 {offsets = [0, 4], sizes = [8, 1], strides = [1, 1]} : vector<8x16xi32> to vector<8x1xi32>
    %201 = vector.broadcast %200 : vector<8x1xi32> to vector<8x48xi32>
    %202 = arith.cmpi eq, %201, %4 : vector<8x48xi32>
    %203 = vector.extract_strided_slice %167 {offsets = [0, 4], sizes = [8, 1], strides = [1, 1]} : vector<8x16xf32> to vector<8x1xf32>
    %cst_42 = arith.constant 0.000000e+00 : f32
    %204 = vector.shape_cast %203 : vector<8x1xf32> to vector<8x1xf32>
    %205 = vector.broadcast %204 : vector<8x1xf32> to vector<8x48xf32>
    %206 = vector.broadcast %cst_42 : f32 to vector<8x48xf32>
    %207 = arith.select %202, %205, %206 : vector<8x48xi1>, vector<8x48xf32>
    %208 = vector.extract_strided_slice %165 {offsets = [0, 5], sizes = [8, 1], strides = [1, 1]} : vector<8x16xi32> to vector<8x1xi32>
    %209 = vector.broadcast %208 : vector<8x1xi32> to vector<8x48xi32>
    %210 = arith.cmpi eq, %209, %4 : vector<8x48xi32>
    %211 = vector.extract_strided_slice %167 {offsets = [0, 5], sizes = [8, 1], strides = [1, 1]} : vector<8x16xf32> to vector<8x1xf32>
    %cst_43 = arith.constant 0.000000e+00 : f32
    %212 = vector.shape_cast %211 : vector<8x1xf32> to vector<8x1xf32>
    %213 = vector.broadcast %212 : vector<8x1xf32> to vector<8x48xf32>
    %214 = vector.broadcast %cst_43 : f32 to vector<8x48xf32>
    %215 = arith.select %210, %213, %214 : vector<8x48xi1>, vector<8x48xf32>
    %216 = vector.extract_strided_slice %165 {offsets = [0, 6], sizes = [8, 1], strides = [1, 1]} : vector<8x16xi32> to vector<8x1xi32>
    %217 = vector.broadcast %216 : vector<8x1xi32> to vector<8x48xi32>
    %218 = arith.cmpi eq, %217, %4 : vector<8x48xi32>
    %219 = vector.extract_strided_slice %167 {offsets = [0, 6], sizes = [8, 1], strides = [1, 1]} : vector<8x16xf32> to vector<8x1xf32>
    %cst_44 = arith.constant 0.000000e+00 : f32
    %220 = vector.shape_cast %219 : vector<8x1xf32> to vector<8x1xf32>
    %221 = vector.broadcast %220 : vector<8x1xf32> to vector<8x48xf32>
    %222 = vector.broadcast %cst_44 : f32 to vector<8x48xf32>
    %223 = arith.select %218, %221, %222 : vector<8x48xi1>, vector<8x48xf32>
    %224 = vector.extract_strided_slice %165 {offsets = [0, 7], sizes = [8, 1], strides = [1, 1]} : vector<8x16xi32> to vector<8x1xi32>
    %225 = vector.broadcast %224 : vector<8x1xi32> to vector<8x48xi32>
    %226 = arith.cmpi eq, %225, %4 : vector<8x48xi32>
    %227 = vector.extract_strided_slice %167 {offsets = [0, 7], sizes = [8, 1], strides = [1, 1]} : vector<8x16xf32> to vector<8x1xf32>
    %cst_45 = arith.constant 0.000000e+00 : f32
    %228 = vector.shape_cast %227 : vector<8x1xf32> to vector<8x1xf32>
    %229 = vector.broadcast %228 : vector<8x1xf32> to vector<8x48xf32>
    %230 = vector.broadcast %cst_45 : f32 to vector<8x48xf32>
    %231 = arith.select %226, %229, %230 : vector<8x48xi1>, vector<8x48xf32>
    %232 = vector.extract_strided_slice %165 {offsets = [0, 8], sizes = [8, 1], strides = [1, 1]} : vector<8x16xi32> to vector<8x1xi32>
    %233 = vector.broadcast %232 : vector<8x1xi32> to vector<8x48xi32>
    %234 = arith.cmpi eq, %233, %4 : vector<8x48xi32>
    %235 = vector.extract_strided_slice %167 {offsets = [0, 8], sizes = [8, 1], strides = [1, 1]} : vector<8x16xf32> to vector<8x1xf32>
    %cst_46 = arith.constant 0.000000e+00 : f32
    %236 = vector.shape_cast %235 : vector<8x1xf32> to vector<8x1xf32>
    %237 = vector.broadcast %236 : vector<8x1xf32> to vector<8x48xf32>
    %238 = vector.broadcast %cst_46 : f32 to vector<8x48xf32>
    %239 = arith.select %234, %237, %238 : vector<8x48xi1>, vector<8x48xf32>
    %240 = vector.extract_strided_slice %165 {offsets = [0, 9], sizes = [8, 1], strides = [1, 1]} : vector<8x16xi32> to vector<8x1xi32>
    %241 = vector.broadcast %240 : vector<8x1xi32> to vector<8x48xi32>
    %242 = arith.cmpi eq, %241, %4 : vector<8x48xi32>
    %243 = vector.extract_strided_slice %167 {offsets = [0, 9], sizes = [8, 1], strides = [1, 1]} : vector<8x16xf32> to vector<8x1xf32>
    %cst_47 = arith.constant 0.000000e+00 : f32
    %244 = vector.shape_cast %243 : vector<8x1xf32> to vector<8x1xf32>
    %245 = vector.broadcast %244 : vector<8x1xf32> to vector<8x48xf32>
    %246 = vector.broadcast %cst_47 : f32 to vector<8x48xf32>
    %247 = arith.select %242, %245, %246 : vector<8x48xi1>, vector<8x48xf32>
    %248 = vector.extract_strided_slice %165 {offsets = [0, 10], sizes = [8, 1], strides = [1, 1]} : vector<8x16xi32> to vector<8x1xi32>
    %249 = vector.broadcast %248 : vector<8x1xi32> to vector<8x48xi32>
    %250 = arith.cmpi eq, %249, %4 : vector<8x48xi32>
    %251 = vector.extract_strided_slice %167 {offsets = [0, 10], sizes = [8, 1], strides = [1, 1]} : vector<8x16xf32> to vector<8x1xf32>
    %cst_48 = arith.constant 0.000000e+00 : f32
    %252 = vector.shape_cast %251 : vector<8x1xf32> to vector<8x1xf32>
    %253 = vector.broadcast %252 : vector<8x1xf32> to vector<8x48xf32>
    %254 = vector.broadcast %cst_48 : f32 to vector<8x48xf32>
    %255 = arith.select %250, %253, %254 : vector<8x48xi1>, vector<8x48xf32>
    %256 = vector.extract_strided_slice %165 {offsets = [0, 11], sizes = [8, 1], strides = [1, 1]} : vector<8x16xi32> to vector<8x1xi32>
    %257 = vector.broadcast %256 : vector<8x1xi32> to vector<8x48xi32>
    %258 = arith.cmpi eq, %257, %4 : vector<8x48xi32>
    %259 = vector.extract_strided_slice %167 {offsets = [0, 11], sizes = [8, 1], strides = [1, 1]} : vector<8x16xf32> to vector<8x1xf32>
    %cst_49 = arith.constant 0.000000e+00 : f32
    %260 = vector.shape_cast %259 : vector<8x1xf32> to vector<8x1xf32>
    %261 = vector.broadcast %260 : vector<8x1xf32> to vector<8x48xf32>
    %262 = vector.broadcast %cst_49 : f32 to vector<8x48xf32>
    %263 = arith.select %258, %261, %262 : vector<8x48xi1>, vector<8x48xf32>
    %264 = vector.extract_strided_slice %165 {offsets = [0, 12], sizes = [8, 1], strides = [1, 1]} : vector<8x16xi32> to vector<8x1xi32>
    %265 = vector.broadcast %264 : vector<8x1xi32> to vector<8x48xi32>
    %266 = arith.cmpi eq, %265, %4 : vector<8x48xi32>
    %267 = vector.extract_strided_slice %167 {offsets = [0, 12], sizes = [8, 1], strides = [1, 1]} : vector<8x16xf32> to vector<8x1xf32>
    %cst_50 = arith.constant 0.000000e+00 : f32
    %268 = vector.shape_cast %267 : vector<8x1xf32> to vector<8x1xf32>
    %269 = vector.broadcast %268 : vector<8x1xf32> to vector<8x48xf32>
    %270 = vector.broadcast %cst_50 : f32 to vector<8x48xf32>
    %271 = arith.select %266, %269, %270 : vector<8x48xi1>, vector<8x48xf32>
    %272 = vector.extract_strided_slice %165 {offsets = [0, 13], sizes = [8, 1], strides = [1, 1]} : vector<8x16xi32> to vector<8x1xi32>
    %273 = vector.broadcast %272 : vector<8x1xi32> to vector<8x48xi32>
    %274 = arith.cmpi eq, %273, %4 : vector<8x48xi32>
    %275 = vector.extract_strided_slice %167 {offsets = [0, 13], sizes = [8, 1], strides = [1, 1]} : vector<8x16xf32> to vector<8x1xf32>
    %cst_51 = arith.constant 0.000000e+00 : f32
    %276 = vector.shape_cast %275 : vector<8x1xf32> to vector<8x1xf32>
    %277 = vector.broadcast %276 : vector<8x1xf32> to vector<8x48xf32>
    %278 = vector.broadcast %cst_51 : f32 to vector<8x48xf32>
    %279 = arith.select %274, %277, %278 : vector<8x48xi1>, vector<8x48xf32>
    %280 = vector.extract_strided_slice %165 {offsets = [0, 14], sizes = [8, 1], strides = [1, 1]} : vector<8x16xi32> to vector<8x1xi32>
    %281 = vector.broadcast %280 : vector<8x1xi32> to vector<8x48xi32>
    %282 = arith.cmpi eq, %281, %4 : vector<8x48xi32>
    %283 = vector.extract_strided_slice %167 {offsets = [0, 14], sizes = [8, 1], strides = [1, 1]} : vector<8x16xf32> to vector<8x1xf32>
    %cst_52 = arith.constant 0.000000e+00 : f32
    %284 = vector.shape_cast %283 : vector<8x1xf32> to vector<8x1xf32>
    %285 = vector.broadcast %284 : vector<8x1xf32> to vector<8x48xf32>
    %286 = vector.broadcast %cst_52 : f32 to vector<8x48xf32>
    %287 = arith.select %282, %285, %286 : vector<8x48xi1>, vector<8x48xf32>
    %288 = vector.extract_strided_slice %165 {offsets = [0, 15], sizes = [8, 1], strides = [1, 1]} : vector<8x16xi32> to vector<8x1xi32>
    %289 = vector.broadcast %288 : vector<8x1xi32> to vector<8x48xi32>
    %290 = arith.cmpi eq, %289, %4 : vector<8x48xi32>
    %291 = vector.extract_strided_slice %167 {offsets = [0, 15], sizes = [8, 1], strides = [1, 1]} : vector<8x16xf32> to vector<8x1xf32>
    %cst_53 = arith.constant 0.000000e+00 : f32
    %292 = vector.shape_cast %291 : vector<8x1xf32> to vector<8x1xf32>
    %293 = vector.broadcast %292 : vector<8x1xf32> to vector<8x48xf32>
    %294 = vector.broadcast %cst_53 : f32 to vector<8x48xf32>
    %295 = arith.select %290, %293, %294 : vector<8x48xi1>, vector<8x48xf32>
    %296 = arith.addf %175, %183 : vector<8x48xf32>
    %297 = arith.addf %191, %199 : vector<8x48xf32>
    %298 = arith.addf %207, %215 : vector<8x48xf32>
    %299 = arith.addf %223, %231 : vector<8x48xf32>
    %300 = arith.addf %239, %247 : vector<8x48xf32>
    %301 = arith.addf %255, %263 : vector<8x48xf32>
    %302 = arith.addf %271, %279 : vector<8x48xf32>
    %303 = arith.addf %287, %295 : vector<8x48xf32>
    %304 = arith.addf %296, %297 : vector<8x48xf32>
    %305 = arith.addf %298, %299 : vector<8x48xf32>
    %306 = arith.addf %300, %301 : vector<8x48xf32>
    %307 = arith.addf %302, %303 : vector<8x48xf32>
    %308 = arith.addf %304, %305 : vector<8x48xf32>
    %309 = arith.addf %306, %307 : vector<8x48xf32>
    %310 = arith.addf %308, %309 : vector<8x48xf32>
    %311 = vector.extract_strided_slice %6 {offsets = [0, 8], sizes = [48, 8], strides = [1, 1]} : vector<48x32xbf16> to vector<48x8xbf16>
    %c0_54 = arith.constant 0 : index
    %c8 = arith.constant 8 : index
    %312 = vector.load %arg11[%c0_54, %c8] : memref<8x32xf32, #tpu.memory_space<vmem>>, vector<8x8xf32>
    %313 = arith.truncf %310 : vector<8x48xf32> to vector<8x48xbf16>
    %cst_55 = arith.constant dense<0.000000e+00> : vector<8x8xf32>
    %314 = tpu.matmul %313, %311, %cst_55 {dimension_numbers = #tpu.dot_dimension_numbers<[1], [0], [0], [1], [0, 0, 1, 1], [], []>} : vector<8x48xbf16>, vector<48x8xbf16>, vector<8x8xf32> -> vector<8x8xf32>
    %315 = arith.addf %312, %314 : vector<8x8xf32>
    %c0_56 = arith.constant 0 : index
    %c8_57 = arith.constant 8 : index
    %316 = vector.load %arg11[%c0_56, %c8_57] : memref<8x32xf32, #tpu.memory_space<vmem>>, vector<8x8xf32>
    tpu.vector_store %arg11[%c0_56, %c8_57], %315 {strides = array<i32>} : memref<8x32xf32, #tpu.memory_space<vmem>>, vector<8x8xf32>,
    %c0_58 = arith.constant 0 : index
    %c2 = arith.constant 2 : index
    %c0_59 = arith.constant 0 : index
    %c0_60 = arith.constant 0 : index
    %317 = vector.load %arg2[%c0_58, %c2, %c0_59, %c0_60] : memref<1x4x8x16xi32, #tpu.memory_space<vmem>>, vector<1x1x8x16xi32>
    %318 = vector.shape_cast %317 : vector<1x1x8x16xi32> to vector<8x16xi32>
    %319 = vector.broadcast %3 : i32 to vector<8x16xi32>
    %320 = arith.subi %318, %319 : vector<8x16xi32>
    %c0_61 = arith.constant 0 : index
    %c2_62 = arith.constant 2 : index
    %c0_63 = arith.constant 0 : index
    %c0_64 = arith.constant 0 : index
    %321 = vector.load %arg3[%c0_61, %c2_62, %c0_63, %c0_64] : memref<1x4x8x16xf32, #tpu.memory_space<vmem>>, vector<1x1x8x16xf32>
    %322 = vector.shape_cast %321 : vector<1x1x8x16xf32> to vector<8x16xf32>
    %323 = vector.extract_strided_slice %320 {offsets = [0, 0], sizes = [8, 1], strides = [1, 1]} : vector<8x16xi32> to vector<8x1xi32>
    %324 = vector.broadcast %323 : vector<8x1xi32> to vector<8x48xi32>
    %325 = arith.cmpi eq, %324, %4 : vector<8x48xi32>
    %326 = vector.extract_strided_slice %322 {offsets = [0, 0], sizes = [8, 1], strides = [1, 1]} : vector<8x16xf32> to vector<8x1xf32>
    %cst_65 = arith.constant 0.000000e+00 : f32
    %327 = vector.shape_cast %326 : vector<8x1xf32> to vector<8x1xf32>
    %328 = vector.broadcast %327 : vector<8x1xf32> to vector<8x48xf32>
    %329 = vector.broadcast %cst_65 : f32 to vector<8x48xf32>
    %330 = arith.select %325, %328, %329 : vector<8x48xi1>, vector<8x48xf32>
    %331 = vector.extract_strided_slice %320 {offsets = [0, 1], sizes = [8, 1], strides = [1, 1]} : vector<8x16xi32> to vector<8x1xi32>
    %332 = vector.broadcast %331 : vector<8x1xi32> to vector<8x48xi32>
    %333 = arith.cmpi eq, %332, %4 : vector<8x48xi32>
    %334 = vector.extract_strided_slice %322 {offsets = [0, 1], sizes = [8, 1], strides = [1, 1]} : vector<8x16xf32> to vector<8x1xf32>
    %cst_66 = arith.constant 0.000000e+00 : f32
    %335 = vector.shape_cast %334 : vector<8x1xf32> to vector<8x1xf32>
    %336 = vector.broadcast %335 : vector<8x1xf32> to vector<8x48xf32>
    %337 = vector.broadcast %cst_66 : f32 to vector<8x48xf32>
    %338 = arith.select %333, %336, %337 : vector<8x48xi1>, vector<8x48xf32>
    %339 = vector.extract_strided_slice %320 {offsets = [0, 2], sizes = [8, 1], strides = [1, 1]} : vector<8x16xi32> to vector<8x1xi32>
    %340 = vector.broadcast %339 : vector<8x1xi32> to vector<8x48xi32>
    %341 = arith.cmpi eq, %340, %4 : vector<8x48xi32>
    %342 = vector.extract_strided_slice %322 {offsets = [0, 2], sizes = [8, 1], strides = [1, 1]} : vector<8x16xf32> to vector<8x1xf32>
    %cst_67 = arith.constant 0.000000e+00 : f32
    %343 = vector.shape_cast %342 : vector<8x1xf32> to vector<8x1xf32>
    %344 = vector.broadcast %343 : vector<8x1xf32> to vector<8x48xf32>
    %345 = vector.broadcast %cst_67 : f32 to vector<8x48xf32>
    %346 = arith.select %341, %344, %345 : vector<8x48xi1>, vector<8x48xf32>
    %347 = vector.extract_strided_slice %320 {offsets = [0, 3], sizes = [8, 1], strides = [1, 1]} : vector<8x16xi32> to vector<8x1xi32>
    %348 = vector.broadcast %347 : vector<8x1xi32> to vector<8x48xi32>
    %349 = arith.cmpi eq, %348, %4 : vector<8x48xi32>
    %350 = vector.extract_strided_slice %322 {offsets = [0, 3], sizes = [8, 1], strides = [1, 1]} : vector<8x16xf32> to vector<8x1xf32>
    %cst_68 = arith.constant 0.000000e+00 : f32
    %351 = vector.shape_cast %350 : vector<8x1xf32> to vector<8x1xf32>
    %352 = vector.broadcast %351 : vector<8x1xf32> to vector<8x48xf32>
    %353 = vector.broadcast %cst_68 : f32 to vector<8x48xf32>
    %354 = arith.select %349, %352, %353 : vector<8x48xi1>, vector<8x48xf32>
    %355 = vector.extract_strided_slice %320 {offsets = [0, 4], sizes = [8, 1], strides = [1, 1]} : vector<8x16xi32> to vector<8x1xi32>
    %356 = vector.broadcast %355 : vector<8x1xi32> to vector<8x48xi32>
    %357 = arith.cmpi eq, %356, %4 : vector<8x48xi32>
    %358 = vector.extract_strided_slice %322 {offsets = [0, 4], sizes = [8, 1], strides = [1, 1]} : vector<8x16xf32> to vector<8x1xf32>
    %cst_69 = arith.constant 0.000000e+00 : f32
    %359 = vector.shape_cast %358 : vector<8x1xf32> to vector<8x1xf32>
    %360 = vector.broadcast %359 : vector<8x1xf32> to vector<8x48xf32>
    %361 = vector.broadcast %cst_69 : f32 to vector<8x48xf32>
    %362 = arith.select %357, %360, %361 : vector<8x48xi1>, vector<8x48xf32>
    %363 = vector.extract_strided_slice %320 {offsets = [0, 5], sizes = [8, 1], strides = [1, 1]} : vector<8x16xi32> to vector<8x1xi32>
    %364 = vector.broadcast %363 : vector<8x1xi32> to vector<8x48xi32>
    %365 = arith.cmpi eq, %364, %4 : vector<8x48xi32>
    %366 = vector.extract_strided_slice %322 {offsets = [0, 5], sizes = [8, 1], strides = [1, 1]} : vector<8x16xf32> to vector<8x1xf32>
    %cst_70 = arith.constant 0.000000e+00 : f32
    %367 = vector.shape_cast %366 : vector<8x1xf32> to vector<8x1xf32>
    %368 = vector.broadcast %367 : vector<8x1xf32> to vector<8x48xf32>
    %369 = vector.broadcast %cst_70 : f32 to vector<8x48xf32>
    %370 = arith.select %365, %368, %369 : vector<8x48xi1>, vector<8x48xf32>
    %371 = vector.extract_strided_slice %320 {offsets = [0, 6], sizes = [8, 1], strides = [1, 1]} : vector<8x16xi32> to vector<8x1xi32>
    %372 = vector.broadcast %371 : vector<8x1xi32> to vector<8x48xi32>
    %373 = arith.cmpi eq, %372, %4 : vector<8x48xi32>
    %374 = vector.extract_strided_slice %322 {offsets = [0, 6], sizes = [8, 1], strides = [1, 1]} : vector<8x16xf32> to vector<8x1xf32>
    %cst_71 = arith.constant 0.000000e+00 : f32
    %375 = vector.shape_cast %374 : vector<8x1xf32> to vector<8x1xf32>
    %376 = vector.broadcast %375 : vector<8x1xf32> to vector<8x48xf32>
    %377 = vector.broadcast %cst_71 : f32 to vector<8x48xf32>
    %378 = arith.select %373, %376, %377 : vector<8x48xi1>, vector<8x48xf32>
    %379 = vector.extract_strided_slice %320 {offsets = [0, 7], sizes = [8, 1], strides = [1, 1]} : vector<8x16xi32> to vector<8x1xi32>
    %380 = vector.broadcast %379 : vector<8x1xi32> to vector<8x48xi32>
    %381 = arith.cmpi eq, %380, %4 : vector<8x48xi32>
    %382 = vector.extract_strided_slice %322 {offsets = [0, 7], sizes = [8, 1], strides = [1, 1]} : vector<8x16xf32> to vector<8x1xf32>
    %cst_72 = arith.constant 0.000000e+00 : f32
    %383 = vector.shape_cast %382 : vector<8x1xf32> to vector<8x1xf32>
    %384 = vector.broadcast %383 : vector<8x1xf32> to vector<8x48xf32>
    %385 = vector.broadcast %cst_72 : f32 to vector<8x48xf32>
    %386 = arith.select %381, %384, %385 : vector<8x48xi1>, vector<8x48xf32>
    %387 = vector.extract_strided_slice %320 {offsets = [0, 8], sizes = [8, 1], strides = [1, 1]} : vector<8x16xi32> to vector<8x1xi32>
    %388 = vector.broadcast %387 : vector<8x1xi32> to vector<8x48xi32>
    %389 = arith.cmpi eq, %388, %4 : vector<8x48xi32>
    %390 = vector.extract_strided_slice %322 {offsets = [0, 8], sizes = [8, 1], strides = [1, 1]} : vector<8x16xf32> to vector<8x1xf32>
    %cst_73 = arith.constant 0.000000e+00 : f32
    %391 = vector.shape_cast %390 : vector<8x1xf32> to vector<8x1xf32>
    %392 = vector.broadcast %391 : vector<8x1xf32> to vector<8x48xf32>
    %393 = vector.broadcast %cst_73 : f32 to vector<8x48xf32>
    %394 = arith.select %389, %392, %393 : vector<8x48xi1>, vector<8x48xf32>
    %395 = vector.extract_strided_slice %320 {offsets = [0, 9], sizes = [8, 1], strides = [1, 1]} : vector<8x16xi32> to vector<8x1xi32>
    %396 = vector.broadcast %395 : vector<8x1xi32> to vector<8x48xi32>
    %397 = arith.cmpi eq, %396, %4 : vector<8x48xi32>
    %398 = vector.extract_strided_slice %322 {offsets = [0, 9], sizes = [8, 1], strides = [1, 1]} : vector<8x16xf32> to vector<8x1xf32>
    %cst_74 = arith.constant 0.000000e+00 : f32
    %399 = vector.shape_cast %398 : vector<8x1xf32> to vector<8x1xf32>
    %400 = vector.broadcast %399 : vector<8x1xf32> to vector<8x48xf32>
    %401 = vector.broadcast %cst_74 : f32 to vector<8x48xf32>
    %402 = arith.select %397, %400, %401 : vector<8x48xi1>, vector<8x48xf32>
    %403 = vector.extract_strided_slice %320 {offsets = [0, 10], sizes = [8, 1], strides = [1, 1]} : vector<8x16xi32> to vector<8x1xi32>
    %404 = vector.broadcast %403 : vector<8x1xi32> to vector<8x48xi32>
    %405 = arith.cmpi eq, %404, %4 : vector<8x48xi32>
    %406 = vector.extract_strided_slice %322 {offsets = [0, 10], sizes = [8, 1], strides = [1, 1]} : vector<8x16xf32> to vector<8x1xf32>
    %cst_75 = arith.constant 0.000000e+00 : f32
    %407 = vector.shape_cast %406 : vector<8x1xf32> to vector<8x1xf32>
    %408 = vector.broadcast %407 : vector<8x1xf32> to vector<8x48xf32>
    %409 = vector.broadcast %cst_75 : f32 to vector<8x48xf32>
    %410 = arith.select %405, %408, %409 : vector<8x48xi1>, vector<8x48xf32>
    %411 = vector.extract_strided_slice %320 {offsets = [0, 11], sizes = [8, 1], strides = [1, 1]} : vector<8x16xi32> to vector<8x1xi32>
    %412 = vector.broadcast %411 : vector<8x1xi32> to vector<8x48xi32>
    %413 = arith.cmpi eq, %412, %4 : vector<8x48xi32>
    %414 = vector.extract_strided_slice %322 {offsets = [0, 11], sizes = [8, 1], strides = [1, 1]} : vector<8x16xf32> to vector<8x1xf32>
    %cst_76 = arith.constant 0.000000e+00 : f32
    %415 = vector.shape_cast %414 : vector<8x1xf32> to vector<8x1xf32>
    %416 = vector.broadcast %415 : vector<8x1xf32> to vector<8x48xf32>
    %417 = vector.broadcast %cst_76 : f32 to vector<8x48xf32>
    %418 = arith.select %413, %416, %417 : vector<8x48xi1>, vector<8x48xf32>
    %419 = vector.extract_strided_slice %320 {offsets = [0, 12], sizes = [8, 1], strides = [1, 1]} : vector<8x16xi32> to vector<8x1xi32>
    %420 = vector.broadcast %419 : vector<8x1xi32> to vector<8x48xi32>
    %421 = arith.cmpi eq, %420, %4 : vector<8x48xi32>
    %422 = vector.extract_strided_slice %322 {offsets = [0, 12], sizes = [8, 1], strides = [1, 1]} : vector<8x16xf32> to vector<8x1xf32>
    %cst_77 = arith.constant 0.000000e+00 : f32
    %423 = vector.shape_cast %422 : vector<8x1xf32> to vector<8x1xf32>
    %424 = vector.broadcast %423 : vector<8x1xf32> to vector<8x48xf32>
    %425 = vector.broadcast %cst_77 : f32 to vector<8x48xf32>
    %426 = arith.select %421, %424, %425 : vector<8x48xi1>, vector<8x48xf32>
    %427 = vector.extract_strided_slice %320 {offsets = [0, 13], sizes = [8, 1], strides = [1, 1]} : vector<8x16xi32> to vector<8x1xi32>
    %428 = vector.broadcast %427 : vector<8x1xi32> to vector<8x48xi32>
    %429 = arith.cmpi eq, %428, %4 : vector<8x48xi32>
    %430 = vector.extract_strided_slice %322 {offsets = [0, 13], sizes = [8, 1], strides = [1, 1]} : vector<8x16xf32> to vector<8x1xf32>
    %cst_78 = arith.constant 0.000000e+00 : f32
    %431 = vector.shape_cast %430 : vector<8x1xf32> to vector<8x1xf32>
    %432 = vector.broadcast %431 : vector<8x1xf32> to vector<8x48xf32>
    %433 = vector.broadcast %cst_78 : f32 to vector<8x48xf32>
    %434 = arith.select %429, %432, %433 : vector<8x48xi1>, vector<8x48xf32>
    %435 = vector.extract_strided_slice %320 {offsets = [0, 14], sizes = [8, 1], strides = [1, 1]} : vector<8x16xi32> to vector<8x1xi32>
    %436 = vector.broadcast %435 : vector<8x1xi32> to vector<8x48xi32>
    %437 = arith.cmpi eq, %436, %4 : vector<8x48xi32>
    %438 = vector.extract_strided_slice %322 {offsets = [0, 14], sizes = [8, 1], strides = [1, 1]} : vector<8x16xf32> to vector<8x1xf32>
    %cst_79 = arith.constant 0.000000e+00 : f32
    %439 = vector.shape_cast %438 : vector<8x1xf32> to vector<8x1xf32>
    %440 = vector.broadcast %439 : vector<8x1xf32> to vector<8x48xf32>
    %441 = vector.broadcast %cst_79 : f32 to vector<8x48xf32>
    %442 = arith.select %437, %440, %441 : vector<8x48xi1>, vector<8x48xf32>
    %443 = vector.extract_strided_slice %320 {offsets = [0, 15], sizes = [8, 1], strides = [1, 1]} : vector<8x16xi32> to vector<8x1xi32>
    %444 = vector.broadcast %443 : vector<8x1xi32> to vector<8x48xi32>
    %445 = arith.cmpi eq, %444, %4 : vector<8x48xi32>
    %446 = vector.extract_strided_slice %322 {offsets = [0, 15], sizes = [8, 1], strides = [1, 1]} : vector<8x16xf32> to vector<8x1xf32>
    %cst_80 = arith.constant 0.000000e+00 : f32
    %447 = vector.shape_cast %446 : vector<8x1xf32> to vector<8x1xf32>
    %448 = vector.broadcast %447 : vector<8x1xf32> to vector<8x48xf32>
    %449 = vector.broadcast %cst_80 : f32 to vector<8x48xf32>
    %450 = arith.select %445, %448, %449 : vector<8x48xi1>, vector<8x48xf32>
    %451 = arith.addf %330, %338 : vector<8x48xf32>
    %452 = arith.addf %346, %354 : vector<8x48xf32>
    %453 = arith.addf %362, %370 : vector<8x48xf32>
    %454 = arith.addf %378, %386 : vector<8x48xf32>
    %455 = arith.addf %394, %402 : vector<8x48xf32>
    %456 = arith.addf %410, %418 : vector<8x48xf32>
    %457 = arith.addf %426, %434 : vector<8x48xf32>
    %458 = arith.addf %442, %450 : vector<8x48xf32>
    %459 = arith.addf %451, %452 : vector<8x48xf32>
    %460 = arith.addf %453, %454 : vector<8x48xf32>
    %461 = arith.addf %455, %456 : vector<8x48xf32>
    %462 = arith.addf %457, %458 : vector<8x48xf32>
    %463 = arith.addf %459, %460 : vector<8x48xf32>
    %464 = arith.addf %461, %462 : vector<8x48xf32>
    %465 = arith.addf %463, %464 : vector<8x48xf32>
    %466 = vector.extract_strided_slice %6 {offsets = [0, 16], sizes = [48, 8], strides = [1, 1]} : vector<48x32xbf16> to vector<48x8xbf16>
    %c0_81 = arith.constant 0 : index
    %c16 = arith.constant 16 : index
    %467 = vector.load %arg11[%c0_81, %c16] : memref<8x32xf32, #tpu.memory_space<vmem>>, vector<8x8xf32>
    %468 = arith.truncf %465 : vector<8x48xf32> to vector<8x48xbf16>
    %cst_82 = arith.constant dense<0.000000e+00> : vector<8x8xf32>
    %469 = tpu.matmul %468, %466, %cst_82 {dimension_numbers = #tpu.dot_dimension_numbers<[1], [0], [0], [1], [0, 0, 1, 1], [], []>} : vector<8x48xbf16>, vector<48x8xbf16>, vector<8x8xf32> -> vector<8x8xf32>
    %470 = arith.addf %467, %469 : vector<8x8xf32>
    %c0_83 = arith.constant 0 : index
    %c16_84 = arith.constant 16 : index
    %471 = vector.load %arg11[%c0_83, %c16_84] : memref<8x32xf32, #tpu.memory_space<vmem>>, vector<8x8xf32>
    tpu.vector_store %arg11[%c0_83, %c16_84], %470 {strides = array<i32>} : memref<8x32xf32, #tpu.memory_space<vmem>>, vector<8x8xf32>,
    %c0_85 = arith.constant 0 : index
    %c3 = arith.constant 3 : index
    %c0_86 = arith.constant 0 : index
    %c0_87 = arith.constant 0 : index
    %472 = vector.load %arg2[%c0_85, %c3, %c0_86, %c0_87] : memref<1x4x8x16xi32, #tpu.memory_space<vmem>>, vector<1x1x8x16xi32>
    %473 = vector.shape_cast %472 : vector<1x1x8x16xi32> to vector<8x16xi32>
    %474 = vector.broadcast %3 : i32 to vector<8x16xi32>
    %475 = arith.subi %473, %474 : vector<8x16xi32>
    %c0_88 = arith.constant 0 : index
    %c3_89 = arith.constant 3 : index
    %c0_90 = arith.constant 0 : index
    %c0_91 = arith.constant 0 : index
    %476 = vector.load %arg3[%c0_88, %c3_89, %c0_90, %c0_91] : memref<1x4x8x16xf32, #tpu.memory_space<vmem>>, vector<1x1x8x16xf32>
    %477 = vector.shape_cast %476 : vector<1x1x8x16xf32> to vector<8x16xf32>
    %478 = vector.extract_strided_slice %475 {offsets = [0, 0], sizes = [8, 1], strides = [1, 1]} : vector<8x16xi32> to vector<8x1xi32>
    %479 = vector.broadcast %478 : vector<8x1xi32> to vector<8x48xi32>
    %480 = arith.cmpi eq, %479, %4 : vector<8x48xi32>
    %481 = vector.extract_strided_slice %477 {offsets = [0, 0], sizes = [8, 1], strides = [1, 1]} : vector<8x16xf32> to vector<8x1xf32>
    %cst_92 = arith.constant 0.000000e+00 : f32
    %482 = vector.shape_cast %481 : vector<8x1xf32> to vector<8x1xf32>
    %483 = vector.broadcast %482 : vector<8x1xf32> to vector<8x48xf32>
    %484 = vector.broadcast %cst_92 : f32 to vector<8x48xf32>
    %485 = arith.select %480, %483, %484 : vector<8x48xi1>, vector<8x48xf32>
    %486 = vector.extract_strided_slice %475 {offsets = [0, 1], sizes = [8, 1], strides = [1, 1]} : vector<8x16xi32> to vector<8x1xi32>
    %487 = vector.broadcast %486 : vector<8x1xi32> to vector<8x48xi32>
    %488 = arith.cmpi eq, %487, %4 : vector<8x48xi32>
    %489 = vector.extract_strided_slice %477 {offsets = [0, 1], sizes = [8, 1], strides = [1, 1]} : vector<8x16xf32> to vector<8x1xf32>
    %cst_93 = arith.constant 0.000000e+00 : f32
    %490 = vector.shape_cast %489 : vector<8x1xf32> to vector<8x1xf32>
    %491 = vector.broadcast %490 : vector<8x1xf32> to vector<8x48xf32>
    %492 = vector.broadcast %cst_93 : f32 to vector<8x48xf32>
    %493 = arith.select %488, %491, %492 : vector<8x48xi1>, vector<8x48xf32>
    %494 = vector.extract_strided_slice %475 {offsets = [0, 2], sizes = [8, 1], strides = [1, 1]} : vector<8x16xi32> to vector<8x1xi32>
    %495 = vector.broadcast %494 : vector<8x1xi32> to vector<8x48xi32>
    %496 = arith.cmpi eq, %495, %4 : vector<8x48xi32>
    %497 = vector.extract_strided_slice %477 {offsets = [0, 2], sizes = [8, 1], strides = [1, 1]} : vector<8x16xf32> to vector<8x1xf32>
    %cst_94 = arith.constant 0.000000e+00 : f32
    %498 = vector.shape_cast %497 : vector<8x1xf32> to vector<8x1xf32>
    %499 = vector.broadcast %498 : vector<8x1xf32> to vector<8x48xf32>
    %500 = vector.broadcast %cst_94 : f32 to vector<8x48xf32>
    %501 = arith.select %496, %499, %500 : vector<8x48xi1>, vector<8x48xf32>
    %502 = vector.extract_strided_slice %475 {offsets = [0, 3], sizes = [8, 1], strides = [1, 1]} : vector<8x16xi32> to vector<8x1xi32>
    %503 = vector.broadcast %502 : vector<8x1xi32> to vector<8x48xi32>
    %504 = arith.cmpi eq, %503, %4 : vector<8x48xi32>
    %505 = vector.extract_strided_slice %477 {offsets = [0, 3], sizes = [8, 1], strides = [1, 1]} : vector<8x16xf32> to vector<8x1xf32>
    %cst_95 = arith.constant 0.000000e+00 : f32
    %506 = vector.shape_cast %505 : vector<8x1xf32> to vector<8x1xf32>
    %507 = vector.broadcast %506 : vector<8x1xf32> to vector<8x48xf32>
    %508 = vector.broadcast %cst_95 : f32 to vector<8x48xf32>
    %509 = arith.select %504, %507, %508 : vector<8x48xi1>, vector<8x48xf32>
    %510 = vector.extract_strided_slice %475 {offsets = [0, 4], sizes = [8, 1], strides = [1, 1]} : vector<8x16xi32> to vector<8x1xi32>
    %511 = vector.broadcast %510 : vector<8x1xi32> to vector<8x48xi32>
    %512 = arith.cmpi eq, %511, %4 : vector<8x48xi32>
    %513 = vector.extract_strided_slice %477 {offsets = [0, 4], sizes = [8, 1], strides = [1, 1]} : vector<8x16xf32> to vector<8x1xf32>
    %cst_96 = arith.constant 0.000000e+00 : f32
    %514 = vector.shape_cast %513 : vector<8x1xf32> to vector<8x1xf32>
    %515 = vector.broadcast %514 : vector<8x1xf32> to vector<8x48xf32>
    %516 = vector.broadcast %cst_96 : f32 to vector<8x48xf32>
    %517 = arith.select %512, %515, %516 : vector<8x48xi1>, vector<8x48xf32>
    %518 = vector.extract_strided_slice %475 {offsets = [0, 5], sizes = [8, 1], strides = [1, 1]} : vector<8x16xi32> to vector<8x1xi32>
    %519 = vector.broadcast %518 : vector<8x1xi32> to vector<8x48xi32>
    %520 = arith.cmpi eq, %519, %4 : vector<8x48xi32>
    %521 = vector.extract_strided_slice %477 {offsets = [0, 5], sizes = [8, 1], strides = [1, 1]} : vector<8x16xf32> to vector<8x1xf32>
    %cst_97 = arith.constant 0.000000e+00 : f32
    %522 = vector.shape_cast %521 : vector<8x1xf32> to vector<8x1xf32>
    %523 = vector.broadcast %522 : vector<8x1xf32> to vector<8x48xf32>
    %524 = vector.broadcast %cst_97 : f32 to vector<8x48xf32>
    %525 = arith.select %520, %523, %524 : vector<8x48xi1>, vector<8x48xf32>
    %526 = vector.extract_strided_slice %475 {offsets = [0, 6], sizes = [8, 1], strides = [1, 1]} : vector<8x16xi32> to vector<8x1xi32>
    %527 = vector.broadcast %526 : vector<8x1xi32> to vector<8x48xi32>
    %528 = arith.cmpi eq, %527, %4 : vector<8x48xi32>
    %529 = vector.extract_strided_slice %477 {offsets = [0, 6], sizes = [8, 1], strides = [1, 1]} : vector<8x16xf32> to vector<8x1xf32>
    %cst_98 = arith.constant 0.000000e+00 : f32
    %530 = vector.shape_cast %529 : vector<8x1xf32> to vector<8x1xf32>
    %531 = vector.broadcast %530 : vector<8x1xf32> to vector<8x48xf32>
    %532 = vector.broadcast %cst_98 : f32 to vector<8x48xf32>
    %533 = arith.select %528, %531, %532 : vector<8x48xi1>, vector<8x48xf32>
    %534 = vector.extract_strided_slice %475 {offsets = [0, 7], sizes = [8, 1], strides = [1, 1]} : vector<8x16xi32> to vector<8x1xi32>
    %535 = vector.broadcast %534 : vector<8x1xi32> to vector<8x48xi32>
    %536 = arith.cmpi eq, %535, %4 : vector<8x48xi32>
    %537 = vector.extract_strided_slice %477 {offsets = [0, 7], sizes = [8, 1], strides = [1, 1]} : vector<8x16xf32> to vector<8x1xf32>
    %cst_99 = arith.constant 0.000000e+00 : f32
    %538 = vector.shape_cast %537 : vector<8x1xf32> to vector<8x1xf32>
    %539 = vector.broadcast %538 : vector<8x1xf32> to vector<8x48xf32>
    %540 = vector.broadcast %cst_99 : f32 to vector<8x48xf32>
    %541 = arith.select %536, %539, %540 : vector<8x48xi1>, vector<8x48xf32>
    %542 = vector.extract_strided_slice %475 {offsets = [0, 8], sizes = [8, 1], strides = [1, 1]} : vector<8x16xi32> to vector<8x1xi32>
    %543 = vector.broadcast %542 : vector<8x1xi32> to vector<8x48xi32>
    %544 = arith.cmpi eq, %543, %4 : vector<8x48xi32>
    %545 = vector.extract_strided_slice %477 {offsets = [0, 8], sizes = [8, 1], strides = [1, 1]} : vector<8x16xf32> to vector<8x1xf32>
    %cst_100 = arith.constant 0.000000e+00 : f32
    %546 = vector.shape_cast %545 : vector<8x1xf32> to vector<8x1xf32>
    %547 = vector.broadcast %546 : vector<8x1xf32> to vector<8x48xf32>
    %548 = vector.broadcast %cst_100 : f32 to vector<8x48xf32>
    %549 = arith.select %544, %547, %548 : vector<8x48xi1>, vector<8x48xf32>
    %550 = vector.extract_strided_slice %475 {offsets = [0, 9], sizes = [8, 1], strides = [1, 1]} : vector<8x16xi32> to vector<8x1xi32>
    %551 = vector.broadcast %550 : vector<8x1xi32> to vector<8x48xi32>
    %552 = arith.cmpi eq, %551, %4 : vector<8x48xi32>
    %553 = vector.extract_strided_slice %477 {offsets = [0, 9], sizes = [8, 1], strides = [1, 1]} : vector<8x16xf32> to vector<8x1xf32>
    %cst_101 = arith.constant 0.000000e+00 : f32
    %554 = vector.shape_cast %553 : vector<8x1xf32> to vector<8x1xf32>
    %555 = vector.broadcast %554 : vector<8x1xf32> to vector<8x48xf32>
    %556 = vector.broadcast %cst_101 : f32 to vector<8x48xf32>
    %557 = arith.select %552, %555, %556 : vector<8x48xi1>, vector<8x48xf32>
    %558 = vector.extract_strided_slice %475 {offsets = [0, 10], sizes = [8, 1], strides = [1, 1]} : vector<8x16xi32> to vector<8x1xi32>
    %559 = vector.broadcast %558 : vector<8x1xi32> to vector<8x48xi32>
    %560 = arith.cmpi eq, %559, %4 : vector<8x48xi32>
    %561 = vector.extract_strided_slice %477 {offsets = [0, 10], sizes = [8, 1], strides = [1, 1]} : vector<8x16xf32> to vector<8x1xf32>
    %cst_102 = arith.constant 0.000000e+00 : f32
    %562 = vector.shape_cast %561 : vector<8x1xf32> to vector<8x1xf32>
    %563 = vector.broadcast %562 : vector<8x1xf32> to vector<8x48xf32>
    %564 = vector.broadcast %cst_102 : f32 to vector<8x48xf32>
    %565 = arith.select %560, %563, %564 : vector<8x48xi1>, vector<8x48xf32>
    %566 = vector.extract_strided_slice %475 {offsets = [0, 11], sizes = [8, 1], strides = [1, 1]} : vector<8x16xi32> to vector<8x1xi32>
    %567 = vector.broadcast %566 : vector<8x1xi32> to vector<8x48xi32>
    %568 = arith.cmpi eq, %567, %4 : vector<8x48xi32>
    %569 = vector.extract_strided_slice %477 {offsets = [0, 11], sizes = [8, 1], strides = [1, 1]} : vector<8x16xf32> to vector<8x1xf32>
    %cst_103 = arith.constant 0.000000e+00 : f32
    %570 = vector.shape_cast %569 : vector<8x1xf32> to vector<8x1xf32>
    %571 = vector.broadcast %570 : vector<8x1xf32> to vector<8x48xf32>
    %572 = vector.broadcast %cst_103 : f32 to vector<8x48xf32>
    %573 = arith.select %568, %571, %572 : vector<8x48xi1>, vector<8x48xf32>
    %574 = vector.extract_strided_slice %475 {offsets = [0, 12], sizes = [8, 1], strides = [1, 1]} : vector<8x16xi32> to vector<8x1xi32>
    %575 = vector.broadcast %574 : vector<8x1xi32> to vector<8x48xi32>
    %576 = arith.cmpi eq, %575, %4 : vector<8x48xi32>
    %577 = vector.extract_strided_slice %477 {offsets = [0, 12], sizes = [8, 1], strides = [1, 1]} : vector<8x16xf32> to vector<8x1xf32>
    %cst_104 = arith.constant 0.000000e+00 : f32
    %578 = vector.shape_cast %577 : vector<8x1xf32> to vector<8x1xf32>
    %579 = vector.broadcast %578 : vector<8x1xf32> to vector<8x48xf32>
    %580 = vector.broadcast %cst_104 : f32 to vector<8x48xf32>
    %581 = arith.select %576, %579, %580 : vector<8x48xi1>, vector<8x48xf32>
    %582 = vector.extract_strided_slice %475 {offsets = [0, 13], sizes = [8, 1], strides = [1, 1]} : vector<8x16xi32> to vector<8x1xi32>
    %583 = vector.broadcast %582 : vector<8x1xi32> to vector<8x48xi32>
    %584 = arith.cmpi eq, %583, %4 : vector<8x48xi32>
    %585 = vector.extract_strided_slice %477 {offsets = [0, 13], sizes = [8, 1], strides = [1, 1]} : vector<8x16xf32> to vector<8x1xf32>
    %cst_105 = arith.constant 0.000000e+00 : f32
    %586 = vector.shape_cast %585 : vector<8x1xf32> to vector<8x1xf32>
    %587 = vector.broadcast %586 : vector<8x1xf32> to vector<8x48xf32>
    %588 = vector.broadcast %cst_105 : f32 to vector<8x48xf32>
    %589 = arith.select %584, %587, %588 : vector<8x48xi1>, vector<8x48xf32>
    %590 = vector.extract_strided_slice %475 {offsets = [0, 14], sizes = [8, 1], strides = [1, 1]} : vector<8x16xi32> to vector<8x1xi32>
    %591 = vector.broadcast %590 : vector<8x1xi32> to vector<8x48xi32>
    %592 = arith.cmpi eq, %591, %4 : vector<8x48xi32>
    %593 = vector.extract_strided_slice %477 {offsets = [0, 14], sizes = [8, 1], strides = [1, 1]} : vector<8x16xf32> to vector<8x1xf32>
    %cst_106 = arith.constant 0.000000e+00 : f32
    %594 = vector.shape_cast %593 : vector<8x1xf32> to vector<8x1xf32>
    %595 = vector.broadcast %594 : vector<8x1xf32> to vector<8x48xf32>
    %596 = vector.broadcast %cst_106 : f32 to vector<8x48xf32>
    %597 = arith.select %592, %595, %596 : vector<8x48xi1>, vector<8x48xf32>
    %598 = vector.extract_strided_slice %475 {offsets = [0, 15], sizes = [8, 1], strides = [1, 1]} : vector<8x16xi32> to vector<8x1xi32>
    %599 = vector.broadcast %598 : vector<8x1xi32> to vector<8x48xi32>
    %600 = arith.cmpi eq, %599, %4 : vector<8x48xi32>
    %601 = vector.extract_strided_slice %477 {offsets = [0, 15], sizes = [8, 1], strides = [1, 1]} : vector<8x16xf32> to vector<8x1xf32>
    %cst_107 = arith.constant 0.000000e+00 : f32
    %602 = vector.shape_cast %601 : vector<8x1xf32> to vector<8x1xf32>
    %603 = vector.broadcast %602 : vector<8x1xf32> to vector<8x48xf32>
    %604 = vector.broadcast %cst_107 : f32 to vector<8x48xf32>
    %605 = arith.select %600, %603, %604 : vector<8x48xi1>, vector<8x48xf32>
    %606 = arith.addf %485, %493 : vector<8x48xf32>
    %607 = arith.addf %501, %509 : vector<8x48xf32>
    %608 = arith.addf %517, %525 : vector<8x48xf32>
    %609 = arith.addf %533, %541 : vector<8x48xf32>
    %610 = arith.addf %549, %557 : vector<8x48xf32>
    %611 = arith.addf %565, %573 : vector<8x48xf32>
    %612 = arith.addf %581, %589 : vector<8x48xf32>
    %613 = arith.addf %597, %605 : vector<8x48xf32>
    %614 = arith.addf %606, %607 : vector<8x48xf32>
    %615 = arith.addf %608, %609 : vector<8x48xf32>
    %616 = arith.addf %610, %611 : vector<8x48xf32>
    %617 = arith.addf %612, %613 : vector<8x48xf32>
    %618 = arith.addf %614, %615 : vector<8x48xf32>
    %619 = arith.addf %616, %617 : vector<8x48xf32>
    %620 = arith.addf %618, %619 : vector<8x48xf32>
    %621 = vector.extract_strided_slice %6 {offsets = [0, 24], sizes = [48, 8], strides = [1, 1]} : vector<48x32xbf16> to vector<48x8xbf16>
    %c0_108 = arith.constant 0 : index
    %c24 = arith.constant 24 : index
    %622 = vector.load %arg11[%c0_108, %c24] : memref<8x32xf32, #tpu.memory_space<vmem>>, vector<8x8xf32>
    %623 = arith.truncf %620 : vector<8x48xf32> to vector<8x48xbf16>
    %cst_109 = arith.constant dense<0.000000e+00> : vector<8x8xf32>
    %624 = tpu.matmul %623, %621, %cst_109 {dimension_numbers = #tpu.dot_dimension_numbers<[1], [0], [0], [1], [0, 0, 1, 1], [], []>} : vector<8x48xbf16>, vector<48x8xbf16>, vector<8x8xf32> -> vector<8x8xf32>
    %625 = arith.addf %622, %624 : vector<8x8xf32>
    %c0_110 = arith.constant 0 : index
    %c24_111 = arith.constant 24 : index
    %626 = vector.load %arg11[%c0_110, %c24_111] : memref<8x32xf32, #tpu.memory_space<vmem>>, vector<8x8xf32>
    tpu.vector_store %arg11[%c0_110, %c24_111], %625 {strides = array<i32>} : memref<8x32xf32, #tpu.memory_space<vmem>>, vector<8x8xf32>,
    %c1_i32 = arith.constant 1 : i32
    %627 = arith.cmpi eq, %arg1, %c1_i32 : i32
    %628 = arith.extui %627 : i1 to i32
    %c0_i32_112 = arith.constant 0 : i32
    %629 = arith.cmpi ne, %628, %c0_i32_112 : i32
    scf.if %629 {
      %c0_113 = arith.constant 0 : index
      %c0_114 = arith.constant 0 : index
      %630 = vector.load %arg11[%c0_113, %c0_114] : memref<8x32xf32, #tpu.memory_space<vmem>>, vector<8x32xf32>
      %631 = arith.truncf %630 : vector<8x32xf32> to vector<8x32xbf16>
      %c0_115 = arith.constant 0 : index
      %c0_116 = arith.constant 0 : index
      %632 = vector.load %arg6[%c0_115, %c0_116] : memref<32x32xbf16, #tpu.memory_space<vmem>>, vector<32x32xbf16>
      %cst_117 = arith.constant dense<0.000000e+00> : vector<8x32xf32>
      %633 = tpu.matmul %631, %632, %cst_117 {dimension_numbers = #tpu.dot_dimension_numbers<[1], [0], [0], [1], [0, 0, 1, 1], [], []>} : vector<8x32xbf16>, vector<32x32xbf16>, vector<8x32xf32> -> vector<8x32xf32>
      %c0_118 = arith.constant 0 : index
      %c0_119 = arith.constant 0 : index
      %634 = vector.load %arg7[%c0_118, %c0_119] : memref<1x32xf32, #tpu.memory_space<vmem>>, vector<1x32xf32>
      %635 = vector.broadcast %634 : vector<1x32xf32> to vector<8x32xf32>
      %636 = arith.addf %633, %635 : vector<8x32xf32>
      %c0_120 = arith.constant 0 : index
      %c0_121 = arith.constant 0 : index
      %c0_122 = arith.constant 0 : index
      %637 = vector.load %arg5[%c0_120, %c0_121, %c0_122] : memref<1x8x32xf32, #tpu.memory_space<vmem>>, vector<1x8x32xf32>
      %638 = vector.shape_cast %637 : vector<1x8x32xf32> to vector<8x32xf32>
      %639 = arith.addf %638, %636 : vector<8x32xf32>
      %cst_123 = arith.constant dense<0.000000e+00> : vector<8xf32>
      %640 = vector.multi_reduction <add>, %639, %cst_123 [1] : vector<8x32xf32> to vector<8xf32>
      %641 = vector.shape_cast %640 : vector<8xf32> to vector<8x1xf32>
      %cst_124 = arith.constant 3.200000e+01 : f32
      %642 = vector.broadcast %cst_124 : f32 to vector<8x1xf32>
      %643 = arith.divf %641, %642 : vector<8x1xf32>
      %644 = vector.broadcast %643 : vector<8x1xf32> to vector<8x32xf32>
      %645 = arith.subf %639, %644 : vector<8x32xf32>
      %646 = arith.mulf %645, %645 : vector<8x32xf32>
      %cst_125 = arith.constant dense<0.000000e+00> : vector<8xf32>
      %647 = vector.multi_reduction <add>, %646, %cst_125 [1] : vector<8x32xf32> to vector<8xf32>
      %648 = vector.shape_cast %647 : vector<8xf32> to vector<8x1xf32>
      %cst_126 = arith.constant 3.200000e+01 : f32
      %649 = vector.broadcast %cst_126 : f32 to vector<8x1xf32>
      %650 = arith.divf %648, %649 : vector<8x1xf32>
      %651 = vector.broadcast %643 : vector<8x1xf32> to vector<8x32xf32>
      %652 = arith.subf %639, %651 : vector<8x32xf32>
      %cst_127 = arith.constant 9.99999974E-6 : f32
      %653 = vector.broadcast %cst_127 : f32 to vector<8x1xf32>
      %654 = arith.addf %650, %653 : vector<8x1xf32>
      %655 = math.rsqrt %654 : vector<8x1xf32>
      %656 = vector.broadcast %655 : vector<8x1xf32> to vector<8x32xf32>
      %657 = arith.mulf %652, %656 : vector<8x32xf32>
      %c0_128 = arith.constant 0 : index
      %c0_129 = arith.constant 0 : index
      %658 = vector.load %arg8[%c0_128, %c0_129] : memref<1x32xf32, #tpu.memory_space<vmem>>, vector<1x32xf32>
      %659 = vector.broadcast %658 : vector<1x32xf32> to vector<8x32xf32>
      %660 = arith.mulf %657, %659 : vector<8x32xf32>
      %c0_130 = arith.constant 0 : index
      %c0_131 = arith.constant 0 : index
      %661 = vector.load %arg9[%c0_130, %c0_131] : memref<1x32xf32, #tpu.memory_space<vmem>>, vector<1x32xf32>
      %662 = vector.broadcast %661 : vector<1x32xf32> to vector<8x32xf32>
      %663 = arith.addf %660, %662 : vector<8x32xf32>
      %c0_132 = arith.constant 0 : index
      %c0_133 = arith.constant 0 : index
      %c0_134 = arith.constant 0 : index
      %664 = vector.load %arg10[%c0_132, %c0_133, %c0_134] : memref<1x8x32xf32, #tpu.memory_space<vmem>>, vector<1x8x32xf32>
      %665 = vector.shape_cast %664 : vector<1x8x32xf32> to vector<8x32xf32>
      %666 = vector.shape_cast %663 : vector<8x32xf32> to vector<1x8x32xf32>
      tpu.vector_store %arg10[%c0_132, %c0_133, %c0_134], %666 {strides = array<i32>} : memref<1x8x32xf32, #tpu.memory_space<vmem>>, vector<1x8x32xf32>,
    } else {
    }
    return
  }
  func.func @transform_0(%arg0: i32, %arg1: i32) -> (i32, i32, i32, i32) {
    %c0_i32 = arith.constant 0 : i32
    %c0_i32_0 = arith.constant 0 : i32
    %c0_i32_1 = arith.constant 0 : i32
    %c0_i32_2 = arith.constant 0 : i32
    return %arg0, %c0_i32, %c0_i32_0, %c0_i32_1 : i32, i32, i32, i32
  }
  func.func @transform_1(%arg0: i32, %arg1: i32) -> (i32, i32, i32, i32) {
    %c0_i32 = arith.constant 0 : i32
    %c0_i32_0 = arith.constant 0 : i32
    %c0_i32_1 = arith.constant 0 : i32
    %c0_i32_2 = arith.constant 0 : i32
    return %arg0, %c0_i32, %c0_i32_0, %c0_i32_1 : i32, i32, i32, i32
  }
  func.func @transform_2(%arg0: i32, %arg1: i32) -> (i32, i32, i32) {
    %c0_i32 = arith.constant 0 : i32
    %c0_i32_0 = arith.constant 0 : i32
    return %arg0, %arg1, %c0_i32 : i32, i32, i32
  }
  func.func @transform_3(%arg0: i32, %arg1: i32) -> (i32, i32, i32) {
    %c0_i32 = arith.constant 0 : i32
    %c0_i32_0 = arith.constant 0 : i32
    %c0_i32_1 = arith.constant 0 : i32
    return %arg0, %c0_i32, %c0_i32_0 : i32, i32, i32
  }
  func.func @transform_4(%arg0: i32, %arg1: i32) -> (i32, i32) {
    %c0_i32 = arith.constant 0 : i32
    %c0_i32_0 = arith.constant 0 : i32
    %c0_i32_1 = arith.constant 0 : i32
    return %c0_i32, %c0_i32_0 : i32, i32
  }
  func.func @transform_5(%arg0: i32, %arg1: i32) -> (i32, i32) {
    %c0_i32 = arith.constant 0 : i32
    %c0_i32_0 = arith.constant 0 : i32
    %c0_i32_1 = arith.constant 0 : i32
    return %c0_i32, %c0_i32_0 : i32, i32
  }
  func.func @transform_6(%arg0: i32, %arg1: i32) -> (i32, i32) {
    %c0_i32 = arith.constant 0 : i32
    %c0_i32_0 = arith.constant 0 : i32
    %c0_i32_1 = arith.constant 0 : i32
    return %c0_i32, %c0_i32_0 : i32, i32
  }
  func.func @transform_7(%arg0: i32, %arg1: i32) -> (i32, i32) {
    %c0_i32 = arith.constant 0 : i32
    %c0_i32_0 = arith.constant 0 : i32
    %c0_i32_1 = arith.constant 0 : i32
    return %c0_i32, %c0_i32_0 : i32, i32
  }
  func.func @transform_8(%arg0: i32, %arg1: i32) -> (i32, i32, i32) {
    %c0_i32 = arith.constant 0 : i32
    %c0_i32_0 = arith.constant 0 : i32
    %c0_i32_1 = arith.constant 0 : i32
    return %arg0, %c0_i32, %c0_i32_0 : i32, i32, i32
  }
}

module attributes {stable_mosaic.version = 11 : i64} {
  func.func @_ffn_ln_kernel(%arg0: i32, %arg1: memref<16x32xf32, #tpu.memory_space<vmem>>, %arg2: memref<32x64xbf16, #tpu.memory_space<vmem>>, %arg3: memref<1x64xf32, #tpu.memory_space<vmem>>, %arg4: memref<64x32xbf16, #tpu.memory_space<vmem>>, %arg5: memref<1x32xf32, #tpu.memory_space<vmem>>, %arg6: memref<1x32xf32, #tpu.memory_space<vmem>>, %arg7: memref<1x32xf32, #tpu.memory_space<vmem>>, %arg8: memref<16x32xf32, #tpu.memory_space<vmem>>) attributes {dimension_semantics = [#tpu.dimension_semantics<parallel>], iteration_bounds = array<i64: 1>, scalar_prefetch = 0 : i64, scratch_operands = 0 : i64, tpu.core_type = #tpu.core_type<tc>, window_params = [{transform_indices = @transform_0, window_bounds = array<i64: 16, 32>}, {pipeline_mode = #tpu.pipeline_mode<synchronous>, transform_indices = @transform_1, window_bounds = array<i64: 32, 64>}, {pipeline_mode = #tpu.pipeline_mode<synchronous>, transform_indices = @transform_2, window_bounds = array<i64: 1, 64>}, {pipeline_mode = #tpu.pipeline_mode<synchronous>, transform_indices = @transform_3, window_bounds = array<i64: 64, 32>}, {pipeline_mode = #tpu.pipeline_mode<synchronous>, transform_indices = @transform_4, window_bounds = array<i64: 1, 32>}, {pipeline_mode = #tpu.pipeline_mode<synchronous>, transform_indices = @transform_5, window_bounds = array<i64: 1, 32>}, {pipeline_mode = #tpu.pipeline_mode<synchronous>, transform_indices = @transform_6, window_bounds = array<i64: 1, 32>}, {transform_indices = @transform_7, window_bounds = array<i64: 16, 32>}]} {
    %c0 = arith.constant 0 : index
    %c0_0 = arith.constant 0 : index
    %0 = vector.load %arg1[%c0, %c0_0] : memref<16x32xf32, #tpu.memory_space<vmem>>, vector<16x32xf32>
    %1 = arith.truncf %0 : vector<16x32xf32> to vector<16x32xbf16>
    %c0_1 = arith.constant 0 : index
    %c0_2 = arith.constant 0 : index
    %2 = vector.load %arg2[%c0_1, %c0_2] : memref<32x64xbf16, #tpu.memory_space<vmem>>, vector<32x64xbf16>
    %cst = arith.constant dense<0.000000e+00> : vector<16x64xf32>
    %3 = tpu.matmul %1, %2, %cst {dimension_numbers = #tpu.dot_dimension_numbers<[1], [0], [0], [1], [0, 0, 1, 1], [], []>} : vector<16x32xbf16>, vector<32x64xbf16>, vector<16x64xf32> -> vector<16x64xf32>
    %c0_3 = arith.constant 0 : index
    %c0_4 = arith.constant 0 : index
    %4 = vector.load %arg3[%c0_3, %c0_4] : memref<1x64xf32, #tpu.memory_space<vmem>>, vector<1x64xf32>
    %5 = vector.broadcast %4 : vector<1x64xf32> to vector<16x64xf32>
    %6 = arith.addf %3, %5 : vector<16x64xf32>
    %cst_5 = arith.constant 0.000000e+00 : f32
    %7 = vector.broadcast %cst_5 : f32 to vector<16x64xf32>
    %8 = arith.maximumf %6, %7 : vector<16x64xf32>
    %9 = arith.truncf %8 : vector<16x64xf32> to vector<16x64xbf16>
    %c0_6 = arith.constant 0 : index
    %c0_7 = arith.constant 0 : index
    %10 = vector.load %arg4[%c0_6, %c0_7] : memref<64x32xbf16, #tpu.memory_space<vmem>>, vector<64x32xbf16>
    %cst_8 = arith.constant dense<0.000000e+00> : vector<16x32xf32>
    %11 = tpu.matmul %9, %10, %cst_8 {dimension_numbers = #tpu.dot_dimension_numbers<[1], [0], [0], [1], [0, 0, 1, 1], [], []>} : vector<16x64xbf16>, vector<64x32xbf16>, vector<16x32xf32> -> vector<16x32xf32>
    %c0_9 = arith.constant 0 : index
    %c0_10 = arith.constant 0 : index
    %12 = vector.load %arg5[%c0_9, %c0_10] : memref<1x32xf32, #tpu.memory_space<vmem>>, vector<1x32xf32>
    %13 = vector.broadcast %12 : vector<1x32xf32> to vector<16x32xf32>
    %14 = arith.addf %11, %13 : vector<16x32xf32>
    %15 = arith.addf %0, %14 : vector<16x32xf32>
    %cst_11 = arith.constant dense<0.000000e+00> : vector<16xf32>
    %16 = vector.multi_reduction <add>, %15, %cst_11 [1] : vector<16x32xf32> to vector<16xf32>
    %17 = vector.shape_cast %16 : vector<16xf32> to vector<16x1xf32>
    %cst_12 = arith.constant 3.200000e+01 : f32
    %18 = vector.broadcast %cst_12 : f32 to vector<16x1xf32>
    %19 = arith.divf %17, %18 : vector<16x1xf32>
    %20 = vector.broadcast %19 : vector<16x1xf32> to vector<16x32xf32>
    %21 = arith.subf %15, %20 : vector<16x32xf32>
    %22 = arith.mulf %21, %21 : vector<16x32xf32>
    %cst_13 = arith.constant dense<0.000000e+00> : vector<16xf32>
    %23 = vector.multi_reduction <add>, %22, %cst_13 [1] : vector<16x32xf32> to vector<16xf32>
    %24 = vector.shape_cast %23 : vector<16xf32> to vector<16x1xf32>
    %cst_14 = arith.constant 3.200000e+01 : f32
    %25 = vector.broadcast %cst_14 : f32 to vector<16x1xf32>
    %26 = arith.divf %24, %25 : vector<16x1xf32>
    %27 = vector.broadcast %19 : vector<16x1xf32> to vector<16x32xf32>
    %28 = arith.subf %15, %27 : vector<16x32xf32>
    %cst_15 = arith.constant 9.99999974E-6 : f32
    %29 = vector.broadcast %cst_15 : f32 to vector<16x1xf32>
    %30 = arith.addf %26, %29 : vector<16x1xf32>
    %31 = math.rsqrt %30 : vector<16x1xf32>
    %32 = vector.broadcast %31 : vector<16x1xf32> to vector<16x32xf32>
    %33 = arith.mulf %28, %32 : vector<16x32xf32>
    %c0_16 = arith.constant 0 : index
    %c0_17 = arith.constant 0 : index
    %34 = vector.load %arg6[%c0_16, %c0_17] : memref<1x32xf32, #tpu.memory_space<vmem>>, vector<1x32xf32>
    %35 = vector.broadcast %34 : vector<1x32xf32> to vector<16x32xf32>
    %36 = arith.mulf %33, %35 : vector<16x32xf32>
    %c0_18 = arith.constant 0 : index
    %c0_19 = arith.constant 0 : index
    %37 = vector.load %arg7[%c0_18, %c0_19] : memref<1x32xf32, #tpu.memory_space<vmem>>, vector<1x32xf32>
    %38 = vector.broadcast %37 : vector<1x32xf32> to vector<16x32xf32>
    %39 = arith.addf %36, %38 : vector<16x32xf32>
    %c0_20 = arith.constant 0 : index
    %c0_21 = arith.constant 0 : index
    %40 = vector.load %arg8[%c0_20, %c0_21] : memref<16x32xf32, #tpu.memory_space<vmem>>, vector<16x32xf32>
    tpu.vector_store %arg8[%c0_20, %c0_21], %39 {strides = array<i32>} : memref<16x32xf32, #tpu.memory_space<vmem>>, vector<16x32xf32>,
    return
  }
  func.func @transform_0(%arg0: i32) -> (i32, i32) {
    %c0_i32 = arith.constant 0 : i32
    %c0_i32_0 = arith.constant 0 : i32
    return %arg0, %c0_i32 : i32, i32
  }
  func.func @transform_1(%arg0: i32) -> (i32, i32) {
    %c0_i32 = arith.constant 0 : i32
    %c0_i32_0 = arith.constant 0 : i32
    %c0_i32_1 = arith.constant 0 : i32
    return %c0_i32, %c0_i32_0 : i32, i32
  }
  func.func @transform_2(%arg0: i32) -> (i32, i32) {
    %c0_i32 = arith.constant 0 : i32
    %c0_i32_0 = arith.constant 0 : i32
    %c0_i32_1 = arith.constant 0 : i32
    return %c0_i32, %c0_i32_0 : i32, i32
  }
  func.func @transform_3(%arg0: i32) -> (i32, i32) {
    %c0_i32 = arith.constant 0 : i32
    %c0_i32_0 = arith.constant 0 : i32
    %c0_i32_1 = arith.constant 0 : i32
    return %c0_i32, %c0_i32_0 : i32, i32
  }
  func.func @transform_4(%arg0: i32) -> (i32, i32) {
    %c0_i32 = arith.constant 0 : i32
    %c0_i32_0 = arith.constant 0 : i32
    %c0_i32_1 = arith.constant 0 : i32
    return %c0_i32, %c0_i32_0 : i32, i32
  }
  func.func @transform_5(%arg0: i32) -> (i32, i32) {
    %c0_i32 = arith.constant 0 : i32
    %c0_i32_0 = arith.constant 0 : i32
    %c0_i32_1 = arith.constant 0 : i32
    return %c0_i32, %c0_i32_0 : i32, i32
  }
  func.func @transform_6(%arg0: i32) -> (i32, i32) {
    %c0_i32 = arith.constant 0 : i32
    %c0_i32_0 = arith.constant 0 : i32
    %c0_i32_1 = arith.constant 0 : i32
    return %c0_i32, %c0_i32_0 : i32, i32
  }
  func.func @transform_7(%arg0: i32) -> (i32, i32) {
    %c0_i32 = arith.constant 0 : i32
    %c0_i32_0 = arith.constant 0 : i32
    return %arg0, %c0_i32 : i32, i32
  }
}

</mosaic_0001>

<bundles_post_ra>
// kernel: deformable_decoder_layer_forward.5
= control target key start
LH: loop header
LB: loop body
LE: loop exit
PB: predicated region body
PF: predicated region fallthrough
CT: control target
= control target key end

     0   :  { %s1614_s25 = smov 0   ;;  %s1773_s0 = inlined_call_operand.vmem [shape: f32[2,8,32], index: 0, kind: input, shape index: {}]   ;;  %s1774_s1 = inlined_call_operand.vmem [shape: f32[2,8,32], index: 1, kind: input, shape index: {}]   ;;  %s1775_s2 = inlined_call_operand.vmem [shape: bf16[32,64], index: 2, kind: input, shape index: {}]   ;;  %s1776_s3 = inlined_call_operand.vmem [shape: f32[1,64], index: 3, kind: input, shape index: {}]   ;;  %s1777_s4 = inlined_call_operand.vmem [shape: bf16[32,32], index: 4, kind: input, shape index: {}]   ;;  %s1778_s5 = inlined_call_operand.vmem [shape: f32[1,32], index: 5, kind: input, shape index: {}]   ;;  %s1779_s6 = inlined_call_operand.vmem [shape: bf16[32,32], index: 6, kind: input, shape index: {}]   ;;  %s1780_s7 = inlined_call_operand.vmem [shape: f32[1,32], index: 7, kind: input, shape index: {}]   ;;  %s1781_s8 = inlined_call_operand.vmem [shape: f32[1,32], index: 8, kind: input, shape index: {}]   ;;  %s1782_s9 = inlined_call_operand.vmem [shape: f32[1,32], index: 9, kind: input, shape index: {}]   ;;  %s1783_s10 = inlined_call_operand.vmem [shape: bf16[32,48], index: 10, kind: input, shape index: {}]   ;;  %s1784_s11 = inlined_call_operand.vmem [shape: f32[1,48], index: 11, kind: input, shape index: {}]   ;;  %s1785_s12 = inlined_call_operand.vmem [shape: f32[2,8,32], index: 12, kind: output, shape index: {0}]   ;;  %s1786_s13 = inlined_call_operand.vmem [shape: f32[2,8,48], index: 13, kind: output, shape index: {1}]  }
   0x1 LB: > { %s1333_s26 = sadd.s32 4294967295, %s1530_s25   ;;  %p1337_p0 = scmp.ge.s32.totalorder %s1530_s25, 1  ;;  %s1530_s25 = sphi %s1614_s25, %s24_s25  }
   0x2   : > { %p398_p1 = scmp.lt.s32.totalorder %s1530_s25, 3 }
   0x4   : > { %p399_p2 = pnand %p1337_p0, %p398_p1 }
   0x5   : > { %v1498_v0 = vld [vmem:[%s1775_s2] sm:$0xff] (!%p399_p2)   ;;  %v1532_v1 = vmov (!%p399_p2), 0.0   ;;  %v1499_v2 = vld [vmem:[%s1775_s2 + $0x8] sm:$0xff] (!%p399_p2)   ;;  %vm1533_vm0 = vmmov (!%p399_p2), 0   ;;  %p448_p3 = scmp.lt.s32.totalorder (!%p399_p2), %s1333_s26, 1  ;;  %vm492_vm1 = vcmask (!%p399_p2), 261120  }
   0x6   : > { %402 = sbr.rel (%p399_p2) target bundleno = 2035 (0x7f3), region = 68  ;;  %1398 = vmatprep.subr.bf16.mxu0 (!%p399_p2), %v1532_v1  ;;  %1406 = vmatprep.subr.bf16.mxu1 (!%p399_p2), %v1532_v1  ;;  %v1342_v7 = vld [vmem:[%s1776_s3] ss:$0 sm:$0xff] (!%p399_p2)  ;;  %s1534_s23 = smov (!%p399_p2), 96   ;;  %v1501_v17 = vld [vmem:[%s1777_s4 + $0x8] sm:$0xff] (!%p399_p2)   ;;  %vm610_vm2 = vcmask (!%p399_p2), 64512  }
   0x7   : > { %1399 = vmatpush3.bf16.msra.mxu0 (!%p399_p2), %v1498_v0  ;;  %1402 = vmatprep.mubr.msk.bf16.mxu0 (!%p399_p2), %vm1533_vm0, %v1532_v1  ;;  %s1535_s24 = smov (!%p399_p2), 120   ;;  %s1537_s27 = smov (!%p399_p2), 80   ;;  %v1500_v16 = vld [vmem:[%s1777_s4] sm:$0xff] (!%p399_p2)   ;;  %vm672_vm3 = vcmask (!%p399_p2), 1043456   ;;  %vm833_vm4 = vcmask (!%p399_p2), 130112   ;;  %vm949_vm5 = vcmask (!%p399_p2), 195712  }
   0x8   : > { %1400 = vmatprep.subr.bf16.mxu0 (!%p399_p2), %v1532_v1  ;;  %1410 = vmatprep.mubr.msk.bf16.mxu1 (!%p399_p2), %vm1533_vm0, %v1532_v1  ;;  %s1538_s28 = smov (!%p399_p2), 112   ;;  %s1539_s29 = smov (!%p399_p2), 72   ;;  %v1346_v50 = vld [vmem:[%s1778_s5] ss:$0 sm:$0xff] (!%p399_p2)  ;;  %vm1065_vm6 = vcmask (!%p399_p2), 261312   ;;  %vm1235_vm7 = vcmask (!%p399_p2), 392192  }
   0x9   : > { %s1540_s30 = smov (!%p399_p2), 104   ;;  %1407 = vmatpush3.bf16.msra.mxu1 (!%p399_p2), %v1500_v16  ;;  %s1541_s21 = smov (!%p399_p2), 8  }
   0xa   : > { %1408 = vmatprep.subr.bf16.mxu1 (!%p399_p2), %v1532_v1  ;;  %s1542_s22 = smov (!%p399_p2), 16  }
   0xb   : > { %1401 = vmatpush3.bf16.msra.mxu0 (!%p399_p2), %v1499_v2 }
   0xc   : > { %1414 = vmatprep.subr.bf16.mxu0 (!%p399_p2), %v1532_v1 }
   0xd   : > { %s1788_s26 = smov (!%p448_p3, %s1333_s26), 1  ;;  %1409 = vmatpush3.bf16.msra.mxu1 %v1501_v17 }
   0xe   : > { %s1635_s14 = sshll.u32 %s1788_s26, 3  ;;  %s1536_s26 = smov 88   ;;  %1420 = vmatprep.subr.bf16.mxu1 %v1532_v1 }
   0xf   : > { %s451_s17 = scalar_lea.vmem %s1773_s0, %s1635_s14  ;;  %s455_s20 = scalar_lea.vmem %s1774_s1, %s1635_s14 }
  0x10   : > { %v1646_v3 = vld [vmem:[%s451_s17] sm:$0xff]  ;;  %s463_s15 = scalar_lea.vmem %s1786_s13, %s1635_s14 }
  0x11   : > { %v1648_v4 = vld [vmem:[%s455_s20] sm:$0xff]  ;;  %v536_v18 = vpack.c.bf16 %v1646_v3, %v1646_v3 }
  0x12   : > { %v467_v5 = vadd.f32 %v1648_v4, %v1646_v3 }
  0x13   : > { %1411 = vmatmul.mubr.msk.bf16.vlgmr.msra.gmra.mrb[0].mxu1 %vm492_vm1, %v536_v18 }
  0x14   : > { %v468_v6 = vpack.c.bf16 %v467_v5, %v467_v5  ;;  %1422 = vmatprep.mubr.msk.bf16.mxu1 %vm1533_vm0, %v1532_v1 }
  0x16   : > { %1403 = vmatmul.mubr.msk.bf16.vlgmr.msra.gmra.mrb[0].mxu0 %vm492_vm1, %v468_v6 }
  0x17   : > { %1416 = vmatprep.mubr.msk.bf16.mxu0 %vm1533_vm0, %v1532_v1 }
  0xe6   : > { %v597_v51 = vpop.f32.mrb[0].mxu1 }
  0xe7   : > { %v598_v52 = vadd.f32 %v1346_v50, %v597_v51  ;;  %v1412_v53 = vpop.f32.mrb[1].mxu1  ;;  %v1502_v51 = vld [vmem:[%s1779_s6] sm:$0xff]  }
  0xe8   : > { %v600_v54 = vpop.f32.mrb[2].mxu1 }
  0xe9   : > { %v530_v8 = vpop.f32.mrb[0].mxu0  ;;  %v1413_v55 = vpop.f32.mrb[3].mxu1  ;;  %v606_v56 = vpack.c.bf16 %v598_v52, %v598_v52  ;;  %v1503_v52 = vld [vmem:[%s1779_s6 + $0x8] sm:$0xff]  }
  0xea   : > { %v531_v9 = vadd.f32 %v1342_v7, %v530_v8  ;;  %v1404_v10 = vpop.f32.mrb[1].mxu0 }
  0xeb   : > { %v533_v11 = vpop.f32.mrb[2].mxu0  ;;  %v674_v57 = vsel %vm672_vm3, %v606_v56, 0 }
  0xec   : > { %v603_v12 = vmul.f32 0.35355338, %v531_v9  ;;  %v605_v13 = vpack.c.bf16 %v531_v9, %v531_v9  ;;  %v1405_v14 = vpop.f32.mrb[3].mxu0  ;;  %1421 = vmatpush3.bf16.msra.mxu1 %v674_v57 }
  0xed   : > { %1432 = vmatprep.subr.bf16.mxu1 %v1532_v1 }
  0xee   : > { %v604_v15 = vpack.c.bf16 %v603_v12, %v603_v12  ;;  %608 = vrot.lane.b32.xlu0 %v605_v13, %s1534_s23 }
  0xf0   : > { %718 = vrot.lane.b32.xlu1 %v604_v15, %s1535_s24 }
  0xf2   : > { %720 = vrot.lane.b32.xlu0 %v605_v13, %s1536_s26  ;;  %s459_s26 = scalar_lea.vmem %s1785_s12, %s1635_s14 }
  0xf4   : > { %837 = vrot.lane.b32.xlu1 %v605_v13, %s1537_s27 }
  0xf6   : > { %835 = vrot.lane.b32.xlu0 %v604_v15, %s1538_s28 }
  0xf8   : > { %953 = vrot.lane.b32.xlu1 %v605_v13, %s1539_s29 }
  0xfa   : > { %951 = vrot.lane.b32.xlu0 %v604_v15, %s1540_s30 }
 0x160   : > { %v609_v19 = vpop.permute.xlu0 %608 }
 0x161   : > { %v615_v20 = vsel %vm610_vm2, %v609_v19, 0 }
 0x162   : > { %1415 = vmatpush3.bf16.xpose.msra.mxu0 %v615_v20  ;;  %v719_v22 = vpop.permute.xlu1 %718 }
 0x163   : > { %1426 = vmatprep.subr.bf16.mxu0 %v1532_v1 }
 0x164   : > { %v721_v21 = vpop.permute.xlu0 %720 }
 0x165   : > { %v726_v23 = vsel %vm610_vm2, %v721_v21, 0 }
 0x166   : > { %v838_v24 = vpop.permute.xlu1 %837 }
 0x167   : > { %v843_v25 = vsel %vm610_vm2, %v838_v24, 0 }
 0x168   : > { %v836_v27 = vpop.permute.xlu0 %835 }
 0x169   : > { %1417 = vmatmul.mubr.msk.bf16.vlgmr.msra.gmra.mrb[4].mxu0 %vm610_vm2, %v604_v15 }
 0x16a   : > { %1427 = vmatpush3.bf16.xpose.msra.mxu0 %v726_v23  ;;  %1428 = vmatprep.mubr.msk.bf16.mxu0 %vm1533_vm0, %v1532_v1  ;;  %v954_v26 = vpop.permute.xlu1 %953 }
 0x16b   : > { %1438 = vmatprep.subr.bf16.mxu0 %v1532_v1  ;;  %v959_v28 = vsel %vm610_vm2, %v954_v26, 0 }
 0x16c   : > { %v952_v29 = vpop.permute.xlu0 %951 }
 0x171   : > { %1429 = vmatmul.mubr.msk.bf16.vlgmr.msra.gmra.mrb[8].mxu0 %vm610_vm2, %v719_v22 }
 0x172   : > { %1439 = vmatpush3.bf16.xpose.msra.mxu0 %v843_v25  ;;  %1440 = vmatprep.mubr.msk.bf16.mxu0 %vm1533_vm0, %v1532_v1 }
 0x173   : > { %1450 = vmatprep.subr.bf16.mxu0 %v1532_v1 }
 0x179   : > { %1441 = vmatmul.mubr.msk.bf16.vlgmr.msra.gmra.mrb[12].mxu0 %vm610_vm2, %v836_v27 }
 0x17a   : > { %1451 = vmatpush3.bf16.xpose.msra.mxu0 %v959_v28  ;;  %1452 = vmatprep.mubr.msk.bf16.mxu0 %vm1533_vm0, %v1532_v1 }
 0x17b   : > { %1462 = vmatprep.subr.bf16.mxu0 %v1532_v1 }
 0x181   : > { %1453 = vmatmul.mubr.msk.bf16.vlgmr.msra.gmra.mrb[16].mxu0 %vm610_vm2, %v952_v29 }
 0x182   : > { %1466 = vmatprep.mubr.msk.bf16.mxu0 %vm1533_vm0, %v1532_v1  ;;  %1463 = vmatpush3.bf16.msra.mxu0 %v1502_v51 }
 0x183   : > { %1464 = vmatprep.subr.bf16.mxu0 %v1532_v1 }
 0x186   : > { %1465 = vmatpush3.bf16.msra.mxu0 %v1503_v52 }
 0x23c   : > { %v651_v30 = vpop.f32.mrb[4].mxu0 }
 0x23d   : > { %v1418_v31 = vpop.f32.mrb[5].mxu0  ;;  %v657_v32 = vsel %vm610_vm2, %v651_v30, -inf }
 0x23e   : > { %658 = vmax.xlane.f32.xlu1 %v657_v32  ;;  %v654_v33 = vpop.f32.mrb[6].mxu0 }
 0x23f   : > { %v1419_v34 = vpop.f32.mrb[7].mxu0 }
 0x244   : > { %v762_v35 = vpop.f32.mrb[8].mxu0 }
 0x245   : > { %v1430_v36 = vpop.f32.mrb[9].mxu0  ;;  %v768_v37 = vsel %vm610_vm2, %v762_v35, -inf }
 0x246   : > { %769 = vmax.xlane.f32.xlu0 %v768_v37  ;;  %v765_v38 = vpop.f32.mrb[10].mxu0 }
 0x247   : > { %v1431_v39 = vpop.f32.mrb[11].mxu0 }
 0x24c   : > { %v879_v40 = vpop.f32.mrb[12].mxu0 }
 0x24d   : > { %v1442_v41 = vpop.f32.mrb[13].mxu0  ;;  %v885_v42 = vsel %vm610_vm2, %v879_v40, -inf }
 0x24e   : > { %886 = vmax.xlane.f32.xlu0 %v885_v42  ;;  %v882_v43 = vpop.f32.mrb[14].mxu0 }
 0x24f   : > { %v1443_v44 = vpop.f32.mrb[15].mxu0 }
 0x254   : > { %v995_v45 = vpop.f32.mrb[16].mxu0 }
 0x255   : > { %v1454_v46 = vpop.f32.mrb[17].mxu0  ;;  %v1001_v47 = vsel %vm610_vm2, %v995_v45, -inf }
 0x256   : > { %1002 = vmax.xlane.f32.xlu1 %v1001_v47  ;;  %v998_v48 = vpop.f32.mrb[18].mxu0 }
 0x257   : > { %v1455_v49 = vpop.f32.mrb[19].mxu0 }
 0x2cb   : > { %v659_v58 = vpop.xlane.xlu1 %658 }
 0x2cc   : > { %v660_v59 = vsub.f32 %v651_v30, %v659_v58 }
 0x2ce   : > { %v661_v60 = vmul.f32 1.442695, %v660_v59 }
 0x2d0   : > { %1506 = vpow2.f32 %v661_v60 }
 0x2d3   : > { %v770_v61 = vpop.xlane.xlu0 %769 }
 0x2d4   : > { %v771_v62 = vsub.f32 %v762_v35, %v770_v61 }
 0x2d6   : > { %v772_v63 = vmul.f32 1.442695, %v771_v62  ;;  %v1358_v62 = vld [vmem:[%s1780_s7] ss:$0 sm:$0xff] }
 0x2d8   : > { %1508 = vpow2.f32 %v772_v63 }
 0x2da   : > { %v1507_v0 = vpop.eup %1506 }
 0x2db   : > { %v887_v2 = vpop.xlane.xlu0 %886  ;;  %v663_v5 = vsel %vm610_vm2, %v1507_v0, 0.0 }
 0x2dc   : > { %v888_v6 = vsub.f32 %v879_v40, %v887_v2  ;;  %664 = vadd.xlane.f32.xlu0 %v663_v5 }
 0x2de   : > { %v889_v7 = vmul.f32 1.442695, %v888_v6 }
 0x2e0   : > { %1510 = vpow2.f32 %v889_v7 }
 0x2e2   : > { %v1509_v8 = vpop.eup %1508 }
 0x2e3   : > { %v774_v9 = vsel %vm610_vm2, %v1509_v8, 0.0  ;;  %v1003_v12 = vpop.xlane.xlu1 %1002 }
 0x2e4   : > { %775 = vadd.xlane.f32.xlu1 %v774_v9  ;;  %v1004_v13 = vsub.f32 %v995_v45, %v1003_v12 }
 0x2e6   : > { %v1005_v14 = vmul.f32 1.442695, %v1004_v13 }
 0x2e8   : > { %1512 = vpow2.f32 %v1005_v14  ;;  %v1504_v14 = vld [vmem:[%s1783_s10] sm:$0xff]  }
 0x2ea   : > { %v1511_v10 = vpop.eup %1510 }
 0x2eb   : > { %v891_v11 = vsel %vm610_vm2, %v1511_v10, 0.0 }
 0x2ec   : > { %892 = vadd.xlane.f32.xlu0 %v891_v11 }
 0x2f2   : > { %v1513_v15 = vpop.eup %1512 }
 0x2f3   : > { %v1007_v16 = vsel %vm610_vm2, %v1513_v15, 0.0 }
 0x2f5   : > { %897 = vrot.lane.b32.xlu1 %v606_v56, %s1538_s28  ;;  %s1543_s28 = smov 24  }
 0x302   : > { %781 = vrot.lane.b32.xlu0 %v606_v56, %s1535_s24 }
 0x319   : > { %1008 = vadd.xlane.f32.xlu1 %v1007_v16 }
 0x32a   : > { %1013 = vrot.lane.b32.xlu1 %v606_v56, %s1540_s30 }
 0x369   : > { %v665_v17 = vpop.xlane.xlu0 %664 }
 0x36a   : > { %1514 = vrcp.f32 %v665_v17 }
 0x371   : > { %v776_v18 = vpop.xlane.xlu1 %775 }
 0x372   : > { %1516 = vrcp.f32 %v776_v18 }
 0x374   : > { %v1515_v19 = vpop.eup %1514 }
 0x375   : > { %v667_v20 = vmul.f32 %v1515_v19, %v1507_v0  ;;  %v898_v27 = vpop.permute.xlu1 %897  ;;  %v1362_v19 = vld [vmem:[%s1781_s8] ss:$0 sm:$0xff] }
 0x376   : > { %v903_v29 = vsel %vm672_vm3, %v898_v27, 0 }
 0x377   : > { %v668_v21 = vpack.c.bf16 %v667_v20, %v667_v20 }
 0x379   : > { %1423 = vmatmul.mubr.msk.bf16.vlgmr.msra.gmra.mrb[4].mxu1 %vm610_vm2, %v668_v21  ;;  %v893_v22 = vpop.xlane.xlu0 %892  ;;  %v1363_v21 = vld [vmem:[%s1782_s9] ss:$0 sm:$0xff] }
 0x37a   : > { %1518 = vrcp.f32 %v893_v22  ;;  %1434 = vmatprep.mubr.msk.bf16.mxu1 %vm1533_vm0, %v1532_v1 }
 0x37c   : > { %v1517_v23 = vpop.eup %1516 }
 0x37d   : > { %v778_v24 = vmul.f32 %v1517_v23, %v1509_v8  ;;  %v782_v25 = vpop.permute.xlu0 %781 }
 0x37e   : > { %v787_v26 = vsel %vm672_vm3, %v782_v25, 0  ;;  %v1364_v25 = vld [vmem:[%s1784_s11] ss:$0 sm:$0xff] }
 0x37f   : > { %1433 = vmatpush3.bf16.msra.mxu1 %v787_v26  ;;  %v779_v28 = vpack.c.bf16 %v778_v24, %v778_v24 }
 0x380   : > { %1444 = vmatprep.subr.bf16.mxu1 %v1532_v1 }
 0x382   : > { %1435 = vmatmul.mubr.msk.bf16.vlgmr.msra.gmra.mrb[8].mxu1 %vm610_vm2, %v779_v28 }
 0x383   : > { %1445 = vmatpush3.bf16.msra.mxu1 %v903_v29  ;;  %1446 = vmatprep.mubr.msk.bf16.mxu1 %vm1533_vm0, %v1532_v1 }
 0x384   : > { %v1519_v30 = vpop.eup %1518  ;;  %1456 = vmatprep.subr.bf16.mxu1 %v1532_v1 }
 0x385   : > { %v895_v31 = vmul.f32 %v1519_v30, %v1511_v10 }
 0x387   : > { %v896_v32 = vpack.c.bf16 %v895_v31, %v895_v31 }
 0x38a   : > { %1447 = vmatmul.mubr.msk.bf16.vlgmr.msra.gmra.mrb[12].mxu1 %vm610_vm2, %v896_v32 }
 0x38b   : > { %1458 = vmatprep.mubr.msk.bf16.mxu1 %vm1533_vm0, %v1532_v1 }
 0x3a6   : > { %v1009_v33 = vpop.xlane.xlu1 %1008 }
 0x3a7   : > { %1520 = vrcp.f32 %v1009_v33 }
 0x3aa   : > { %v1014_v34 = vpop.permute.xlu1 %1013 }
 0x3ab   : > { %v1019_v35 = vsel %vm672_vm3, %v1014_v34, 0 }
 0x3ac   : > { %1457 = vmatpush3.bf16.msra.mxu1 %v1019_v35 }
 0x3ad   : > { %1470 = vmatprep.subr.bf16.mxu1 %v1532_v1 }
 0x3b1   : > { %v1521_v36 = vpop.eup %1520 }
 0x3b2   : > { %v1011_v37 = vmul.f32 %v1521_v36, %v1513_v15 }
 0x3b4   : > { %v1012_v38 = vpack.c.bf16 %v1011_v37, %v1011_v37 }
 0x3b6   : > { %1459 = vmatmul.mubr.msk.bf16.vlgmr.msra.gmra.mrb[16].mxu1 %vm610_vm2, %v1012_v38 }
 0x3b7   : > { %1474 = vmatprep.mubr.msk.bf16.mxu1 %vm1533_vm0, %v1532_v1  ;;  %1471 = vmatpush3.bf16.msra.mxu1 %v1504_v14 }
 0x3b8   : > { %1472 = vmatprep.subr.bf16.mxu1 %v1532_v1 }
 0x44c   : > { %v710_v39 = vpop.f32.mrb[4].mxu1 }
 0x44d   : > { %716 = vst.msk [vmem:[#allocation2] sm:$0xff] %vm610_vm2, %v710_v39  ;;  %v1424_v40 = vpop.f32.mrb[5].mxu1 }
 0x44e   : > { %v713_v41 = vpop.f32.mrb[6].mxu1 }
 0x44f   : > { %v1425_v42 = vpop.f32.mrb[7].mxu1 }
 0x455   : > { %v823_v43 = vpop.f32.mrb[8].mxu1 }
 0x456   : > { %830 = vrot.lane.b32.xlu0 %v823_v43, %s1541_s21  ;;  %v1436_v44 = vpop.f32.mrb[9].mxu1 }
 0x457   : > { %v826_v45 = vpop.f32.mrb[10].mxu1 }
 0x458   : > { %v1437_v46 = vpop.f32.mrb[11].mxu1 }
 0x45d   : > { %v939_v47 = vpop.f32.mrb[12].mxu1 }
 0x45e   : > { %946 = vrot.lane.b32.xlu1 %v939_v47, %s1542_s22  ;;  %v1448_v48 = vpop.f32.mrb[13].mxu1 }
 0x45f   : > { %v942_v49 = vpop.f32.mrb[14].mxu1 }
 0x460   : > { %v1449_v50 = vpop.f32.mrb[15].mxu1 }
 0x489   : > { %v1055_v53 = vpop.f32.mrb[16].mxu1 }
 0x48a   : > { %1062 = vrot.lane.b32.xlu0 %v1055_v53, %s1543_s28  ;;  %v1460_v54 = vpop.f32.mrb[17].mxu1 }
 0x48b   : > { %v1058_v55 = vpop.f32.mrb[18].mxu1 }
 0x48c   : > { %v1461_v56 = vpop.f32.mrb[19].mxu1 }
 0x4c8   : > { %v831_v57 = vpop.permute.xlu0 %830 }
 0x4c9   : > { %834 = vst.msk [vmem:[#allocation2] sm:$0xff] %vm833_vm4, %v831_v57 }
 0x4d0   : > { %v947_v58 = vpop.permute.xlu1 %946 }
 0x4d1   : > { %950 = vst.msk [vmem:[#allocation2] sm:$0xff] %vm949_vm5, %v947_v58 }
 0x4fc   : > { %v1063_v59 = vpop.permute.xlu0 %1062 }
 0x4fd   : > { %1066 = vst.msk [vmem:[#allocation2] sm:$0xff] %vm1065_vm6, %v1063_v59 }
 0x504   : > { %v1067_v60 = vld [vmem:[#allocation2] sm:$0xff] }
 0x505   : > { %v1068_v61 = vpack.c.bf16 %v1067_v60, %v1067_v60 }
 0x507   : > { %1467 = vmatmul.mubr.msk.bf16.vlgmr.msra.gmra.mrb[20].mxu0 %vm492_vm1, %v1068_v61 }
 0x5da   : > { %v1129_v63 = vpop.f32.mrb[20].mxu0 }
 0x5db   : > { %v1130_v0 = vadd.f32 %v1358_v62, %v1129_v63  ;;  %v1468_v2 = vpop.f32.mrb[21].mxu0 }
 0x5dc   : > { %v1132_v5 = vpop.f32.mrb[22].mxu0 }
 0x5dd   : > { %v1469_v6 = vpop.f32.mrb[23].mxu0  ;;  %v1135_v7 = vadd.f32 %v1130_v0, %v1646_v3  ;;  %v1505_v3 = vld [vmem:[%s1783_s10 + $0x8] sm:$0xff]  }
 0x5de   : > { %1473 = vmatpush3.bf16.msra.mxu1 %v1505_v3 }
 0x5df   : > { %v1136_v8 = vsel %vm492_vm1, %v1135_v7, 0.0 }
 0x5e0   : > { %1137 = vadd.xlane.f32.xlu1 %v1136_v8 }
 0x66d   : > { %v1138_v9 = vpop.xlane.xlu1 %1137 }
 0x66e   : > { %v1140_v10 = vmul.f32 0.03125, %v1138_v9 }
 0x670   : > { %v1141_v11 = vsub.f32 %v1135_v7, %v1140_v10 }
 0x672   : > { %v1142_v12 = vmul.f32 %v1141_v11, %v1141_v11 }
 0x674   : > { %v1143_v13 = vsel %vm492_vm1, %v1142_v12, 0.0 }
 0x675   : > { %1144 = vadd.xlane.f32.xlu0 %v1143_v13 }
 0x702   : > { %v1145_v15 = vpop.xlane.xlu0 %1144 }
 0x703   : > { %v1146_v16 = vmul.f32 0.03125, %v1145_v15 }
 0x705   : > { %v1147_v17 = vadd.f32 1e-05, %v1146_v16 }
 0x707   : > { %1522 = vrsqrt.f32 %v1147_v17 }
 0x711   : > { %v1523_v18 = vpop.eup %1522 }
 0x712   : > { %v1149_v20 = vmul.f32 %v1523_v18, %v1141_v11 }
 0x714   : > { %v1157_v22 = vmul.f32 %v1362_v19, %v1149_v20 }
 0x716   : > { %v1165_v1 = vadd.f32 %v1363_v21, %v1157_v22 }
 0x718   : > { %1166 = vst.msk [vmem:[%s459_s26] sm:$0xff] %vm492_vm1, %v1165_v1  ;;  %v1167_v23 = vadd.f32 %v1165_v1, %v1648_v4 }
 0x71a   : > { %v1168_v24 = vpack.c.bf16 %v1167_v23, %v1167_v23 }
 0x71c   : > { %1475 = vmatmul.mubr.msk.bf16.vlgmr.msra.gmra.mrb[20].mxu1 %vm492_vm1, %v1168_v24 }
 0x7ef   : > { %v1229_v26 = vpop.f32.mrb[20].mxu1 }
 0x7f0   : > { %v1230_v27 = vadd.f32 %v1364_v25, %v1229_v26  ;;  %v1476_v28 = vpop.f32.mrb[21].mxu1 }
 0x7f1   : > { %v1232_v29 = vpop.f32.mrb[22].mxu1 }
 0x7f2   : > { %1236 = vst.msk [vmem:[%s463_s15] sm:$0xff] %vm1235_vm7, %v1230_v27  ;;  %v1477_v30 = vpop.f32.mrb[23].mxu1 }
 0x7f3 PF: > { %s24_s25 = sadd.s32 1, %s1530_s25  }
 0x7f4   : > { %p21_p4 = scmp.ge.s32.totalorder %s24_s25, 4  }
 0x7f6   :  { %23 = sbr.rel (!%p21_p4) target bundleno = 1 (0x1), region = 113 }

// kernel: deformable_decoder_layer_forward.4
= control target key start
LH: loop header
LB: loop body
LE: loop exit
PB: predicated region body
PF: predicated region fallthrough
CT: control target
= control target key end

     0   :  { %v650_v1 = vmov 0   ;;  %vm77_vm0 = vcmask 261120   ;;  %vm507_vm1 = vcmask 257024   ;;  %s996_s1 = inlined_call_operand.vmem [shape: bf16[32,32], index: 1, kind: input, shape index: {}]   ;;  %s997_s0 = inlined_call_operand.vmem [shape: f32[192,32], index: 0, kind: input, shape index: {}]   ;;  %s998_s3 = inlined_call_operand.vmem [shape: f32[192,1], index: 3, kind: input, shape index: {}]   ;;  %s999_s2 = inlined_call_operand.vmem [shape: f32[1,32], index: 2, kind: input, shape index: {}]   ;;  %s1000_s4 = inlined_call_operand.vmem [shape: bf16[192,32], index: 4, kind: output, shape index: {}]  }
   0x1   :  { %v648_v0 = vld [vmem:[%s996_s1] sm:$0xff]   ;;  %647 = vset.pattern.permute.xlu1 %v650_v1  ;;  %646 = vset.pattern.permute.xlu0 %v650_v1  ;;  %v649_v2 = vld [vmem:[%s996_s1 + $0x8] sm:$0xff]   ;;  %v20_v8 = vld [vmem:[%s997_s0 + $0x10] sm:$0xff] }
   0x2   :  { %613 = vmatprep.subr.bf16.mxu0 %v648_v0  ;;  %641 = vmatprep.subr.bf16.mxu1 %v648_v0  ;;  %v18_v3 = vld [vmem:[%s997_s0] sm:$0xff]  ;;  %v19_v4 = vld [vmem:[%s997_s0 + $0x8] sm:$0xff]  ;;  %v21_v9 = vld [vmem:[%s997_s0 + $0x18] sm:$0xff] }
   0x3   :  { %v30_v5 = vld [vmem:[%s997_s0 + $0x60] sm:$0xff]  ;;  %614 = vmatpush3.bf16.msra.mxu0 %v648_v0  ;;  %643 = vmatpush3.bf16.msra.mxu1 %v648_v0  ;;  %v42_v6 = vpack.c.bf16 %v19_v4, %v18_v3  ;;  %v31_v7 = vld [vmem:[%s997_s0 + $0x68] sm:$0xff]  ;;  %v32_v11 = vld [vmem:[%s997_s0 + $0x70] sm:$0xff]  ;;  %v43_v17 = vpack.c.bf16 %v21_v9, %v20_v8 }
   0x4   :  { %615 = vmatprep.subr.bf16.mxu0 %v649_v2  ;;  %642 = vmatprep.subr.bf16.mxu1 %v649_v2  ;;  %v48_v10 = vpack.c.bf16 %v31_v7, %v30_v5  ;;  %v33_v12 = vld [vmem:[%s997_s0 + $0x78] sm:$0xff]  ;;  %v22_v13 = vld [vmem:[%s997_s0 + $0x20] sm:$0xff]  ;;  %v23_v14 = vld [vmem:[%s997_s0 + $0x28] sm:$0xff] }
   0x5   :  { %617 = vmatprep.mubr.msk.bf16.mxu0 %vm77_vm0, %v42_v6  ;;  %v34_v15 = vld [vmem:[%s997_s0 + $0x80] sm:$0xff]  ;;  %v35_v16 = vld [vmem:[%s997_s0 + $0x88] sm:$0xff]  ;;  %v49_v18 = vpack.c.bf16 %v33_v12, %v32_v11  ;;  %v44_v19 = vpack.c.bf16 %v23_v14, %v22_v13  ;;  %v24_v21 = vld [vmem:[%s997_s0 + $0x30] sm:$0xff] }
   0x6   :  { %629 = vmatprep.mubr.msk.bf16.mxu1 %vm77_vm0, %v48_v10  ;;  %v50_v20 = vpack.c.bf16 %v35_v16, %v34_v15  ;;  %v25_v22 = vld [vmem:[%s997_s0 + $0x38] sm:$0xff]  ;;  %v245_v23 = vld [vmem:[%s998_s3 + $0x10] sm:$0xff]  ;;  %v243_v24 = vld [vmem:[%s998_s3] sm:$0xff] }
   0x7   :  { %616 = vmatpush3.bf16.msra.mxu0 %v649_v2  ;;  %644 = vmatpush3.bf16.msra.mxu1 %v649_v2  ;;  %v36_v25 = vld [vmem:[%s997_s0 + $0x90] sm:$0xff]  ;;  %v37_v26 = vld [vmem:[%s997_s0 + $0x98] sm:$0xff]  ;;  %v26_v27 = vld [vmem:[%s997_s0 + $0x40] sm:$0xff]  ;;  %v45_v33 = vpack.c.bf16 %v25_v22, %v24_v21 }
   0x8   :  { %v27_v28 = vld [vmem:[%s997_s0 + $0x48] sm:$0xff]  ;;  %v38_v29 = vld [vmem:[%s997_s0 + $0xa0] sm:$0xff]  ;;  %279 = vperm.xlu1 %647, %v245_v23   ;;  %269 = vperm.xlu0 %646, %v243_v24   ;;  %v246_v31 = vld [vmem:[%s998_s3 + $0x18] sm:$0xff]  ;;  %v51_v34 = vpack.c.bf16 %v37_v26, %v36_v25 }
   0x9   :  { %v39_v30 = vld [vmem:[%s997_s0 + $0xa8] sm:$0xff]  ;;  %v46_v35 = vpack.c.bf16 %v27_v28, %v26_v27  ;;  %v247_v38 = vld [vmem:[%s998_s3 + $0x20] sm:$0xff]  ;;  %v28_v39 = vld [vmem:[%s997_s0 + $0x50] sm:$0xff] }
   0xa   :  { %618 = vmatmul.mubr.msk.bf16.vlgmr.msra.gmra.mrb[0].mxu0 %vm77_vm0, %v43_v17  ;;  %630 = vmatmul.mubr.msk.bf16.vlgmr.msra.gmra.mrb[0].mxu1 %vm77_vm0, %v49_v18  ;;  %v244_v32 = vld [vmem:[%s998_s3 + $0x8] sm:$0xff]  ;;  %v52_v36 = vpack.c.bf16 %v39_v30, %v38_v29  ;;  %v29_v40 = vld [vmem:[%s997_s0 + $0x58] sm:$0xff]  ;;  %v40_v41 = vld [vmem:[%s997_s0 + $0xb0] sm:$0xff] }
   0xb   :  { %621 = vmatprep.mubr.msk.bf16.mxu0 %vm77_vm0, %v44_v19  ;;  %633 = vmatprep.mubr.msk.bf16.mxu1 %vm77_vm0, %v50_v20  ;;  %v248_v37 = vld [vmem:[%s998_s3 + $0x28] sm:$0xff]  ;;  %v41_v42 = vld [vmem:[%s997_s0 + $0xb8] sm:$0xff]  ;;  %v249_v44 = vld [vmem:[%s998_s3 + $0x30] sm:$0xff]  ;;  %v47_v45 = vpack.c.bf16 %v29_v40, %v28_v39 }
   0xc   :  { %284 = vperm.xlu1 %647, %v246_v31   ;;  %274 = vperm.xlu0 %646, %v244_v32   ;;  %v250_v43 = vld [vmem:[%s998_s3 + $0x38] sm:$0xff]  ;;  %v53_v46 = vpack.c.bf16 %v41_v42, %v40_v41  ;;  %v252_v47 = vld [vmem:[%s998_s3 + $0x48] sm:$0xff]  ;;  %v251_v48 = vld [vmem:[%s998_s3 + $0x40] sm:$0xff] }
   0xd   :  { %v254_v49 = vld [vmem:[%s998_s3 + $0x58] sm:$0xff]  ;;  %v253_v50 = vld [vmem:[%s998_s3 + $0x50] sm:$0xff]  ;;  %v256_v51 = vld [vmem:[%s998_s3 + $0x68] sm:$0xff] }
   0xe   :  { %v255_v52 = vld [vmem:[%s998_s3 + $0x60] sm:$0xff]  ;;  %v258_v53 = vld [vmem:[%s998_s3 + $0x78] sm:$0xff]  ;;  %v257_v54 = vld [vmem:[%s998_s3 + $0x70] sm:$0xff] }
   0xf   :  { %v260_v55 = vld [vmem:[%s998_s3 + $0x88] sm:$0xff]  ;;  %v259_v56 = vld [vmem:[%s998_s3 + $0x80] sm:$0xff]  ;;  %v262_v57 = vld [vmem:[%s998_s3 + $0x98] sm:$0xff] }
  0x10   :  { %294 = vperm.xlu1 %647, %v248_v37   ;;  %289 = vperm.xlu0 %646, %v247_v38   ;;  %v261_v58 = vld [vmem:[%s998_s3 + $0x90] sm:$0xff]  ;;  %v264_v59 = vld [vmem:[%s998_s3 + $0xa8] sm:$0xff]  ;;  %v263_v60 = vld [vmem:[%s998_s3 + $0xa0] sm:$0xff] }
  0x11   :  { %v266_v61 = vld [vmem:[%s998_s3 + $0xb8] sm:$0xff]  ;;  %v265_v62 = vld [vmem:[%s998_s3 + $0xb0] sm:$0xff]  ;;  %v859_v16 = vld [vmem:[%s999_s2] ss:$0 sm:$0xff] }
  0x12   :  { %622 = vmatmul.mubr.msk.bf16.gmra.mrb[4].mxu0 %vm77_vm0, %v45_v33  ;;  %634 = vmatmul.mubr.msk.bf16.gmra.mrb[4].mxu1 %vm77_vm0, %v51_v34 }
  0x13   :  { %625 = vmatprep.mubr.msk.bf16.mxu0 %vm77_vm0, %v46_v35  ;;  %637 = vmatprep.mubr.msk.bf16.mxu1 %vm77_vm0, %v52_v36 }
  0x14   :  { %304 = vperm.xlu1 %647, %v250_v43   ;;  %299 = vperm.xlu0 %646, %v249_v44  }
  0x18   :  { %314 = vperm.xlu1 %647, %v252_v47   ;;  %309 = vperm.xlu0 %646, %v251_v48  }
  0x1a   :  { %626 = vmatmul.mubr.msk.bf16.gmra.mrb[8].mxu0 %vm77_vm0, %v47_v45  ;;  %638 = vmatmul.mubr.msk.bf16.gmra.mrb[8].mxu1 %vm77_vm0, %v53_v46 }
  0x1c   :  { %324 = vperm.xlu1 %647, %v254_v49   ;;  %319 = vperm.xlu0 %646, %v253_v50  }
  0x20   :  { %334 = vperm.xlu1 %647, %v256_v51   ;;  %329 = vperm.xlu0 %646, %v255_v52  }
  0x24   :  { %344 = vperm.xlu1 %647, %v258_v53   ;;  %339 = vperm.xlu0 %646, %v257_v54  }
  0x28   :  { %354 = vperm.xlu1 %647, %v260_v55   ;;  %349 = vperm.xlu0 %646, %v259_v56  }
  0x2c   :  { %364 = vperm.xlu1 %647, %v262_v57   ;;  %359 = vperm.xlu0 %646, %v261_v58  }
  0x30   :  { %374 = vperm.xlu1 %647, %v264_v59   ;;  %369 = vperm.xlu0 %646, %v263_v60  }
  0x34   :  { %384 = vperm.xlu1 %647, %v266_v61   ;;  %379 = vperm.xlu0 %646, %v265_v62  }
  0x87   :  { %v270_v63 = vpop.permute.xlu0 %269  ;;  %v280_v0 = vpop.permute.xlu1 %279 }
  0x8b   :  { %v275_v1 = vpop.permute.xlu0 %274  ;;  %v285_v2 = vpop.permute.xlu1 %284 }
  0x8f   :  { %v838_v3 = vpop.permute.xlu0 %289  ;;  %v840_v4 = vpop.permute.xlu1 %294 }
  0x93   :  { %v842_v5 = vpop.permute.xlu0 %299  ;;  %v844_v6 = vpop.permute.xlu1 %304 }
  0x97   :  { %v846_v7 = vpop.permute.xlu0 %309  ;;  %v848_v8 = vpop.permute.xlu1 %314 }
  0x9b   :  { %v850_v9 = vpop.permute.xlu0 %319  ;;  %v852_v10 = vpop.permute.xlu1 %324 }
  0x9f   :  { %v330_v11 = vpop.permute.xlu0 %329  ;;  %v335_v12 = vpop.permute.xlu1 %334 }
  0xa3   :  { %v340_v13 = vpop.permute.xlu0 %339  ;;  %v345_v14 = vpop.permute.xlu1 %344 }
  0xa7   :  { %v854_v15 = vpop.permute.xlu0 %349  ;;  %v861_v17 = vpop.permute.xlu1 %354 }
  0xab   :  { %v360_v18 = vpop.permute.xlu0 %359  ;;  %v365_v47 = vpop.permute.xlu1 %364 }
  0xaf   :  { %v871_v48 = vpop.permute.xlu0 %369 }
  0xdd   :  { %v619_v19 = vpop.f32.mrb[0].mxu0  ;;  %v631_v20 = vpop.f32.mrb[0].mxu1 }
  0xde   :  { %v157_v21 = vadd.f32 %v619_v19, %v859_v16  ;;  %v205_v22 = vadd.f32 %v631_v20, %v859_v16  ;;  %v148_v23 = vpop.f32.mrb[1].mxu0  ;;  %v196_v24 = vpop.f32.mrb[1].mxu1 }
  0xdf   :  { %v149_v25 = vadd.f32 %v859_v16, %v148_v23  ;;  %v197_v26 = vadd.f32 %v859_v16, %v196_v24  ;;  %v620_v27 = vpop.f32.mrb[2].mxu0  ;;  %v632_v28 = vpop.f32.mrb[2].mxu1 }
  0xe0   :  { %v389_v29 = vmul.f32 %v280_v0, %v157_v21  ;;  %v401_v30 = vmul.f32 %v340_v13, %v205_v22  ;;  %v160_v31 = vadd.f32 %v620_v27, %v859_v16  ;;  %v208_v32 = vadd.f32 %v632_v28, %v859_v16  ;;  %v151_v33 = vpop.f32.mrb[3].mxu0  ;;  %v199_v34 = vpop.f32.mrb[3].mxu1 }
  0xe1   :  { %v387_v35 = vmul.f32 %v270_v63, %v149_v25  ;;  %v399_v36 = vmul.f32 %v330_v11, %v197_v26  ;;  %v152_v37 = vadd.f32 %v859_v16, %v151_v33  ;;  %v200_v38 = vadd.f32 %v859_v16, %v199_v34  ;;  %v380_v28 = vpop.permute.xlu0 %379 }
  0xe2   :  { %v577_v39 = vpack.c.bf16 %v389_v29, %v389_v29  ;;  %v589_v40 = vpack.c.bf16 %v401_v30, %v401_v30  ;;  %v390_v41 = vmul.f32 %v285_v2, %v160_v31  ;;  %v402_v42 = vmul.f32 %v345_v14, %v208_v32 }
  0xe3   :  { %v575_v43 = vpack.c.bf16 %v387_v35, %v387_v35  ;;  %v587_v44 = vpack.c.bf16 %v399_v36, %v399_v36  ;;  %v388_v45 = vmul.f32 %v275_v1, %v152_v37  ;;  %v400_v46 = vmul.f32 %v335_v12, %v200_v38 }
  0xe4   :  { %510 = vst.msk [vmem:[%s1000_s4 + $0x8] sm:$0xf] %vm507_vm1, %v577_v39  ;;  %522 = vst.msk [vmem:[%s1000_s4 + $0x38] sm:$0xf] %vm507_vm1, %v589_v40  ;;  %v578_v49 = vpack.c.bf16 %v390_v41, %v390_v41  ;;  %v590_v50 = vpack.c.bf16 %v402_v42, %v402_v42 }
  0xe5   :  { %508 = vst.msk [vmem:[%s1000_s4] sm:$0xf] %vm507_vm1, %v575_v43  ;;  %520 = vst.msk [vmem:[%s1000_s4 + $0x30] sm:$0xf] %vm507_vm1, %v587_v44  ;;  %v576_v51 = vpack.c.bf16 %v388_v45, %v388_v45  ;;  %v588_v52 = vpack.c.bf16 %v400_v46, %v400_v46  ;;  %v623_v53 = vpop.f32.mrb[4].mxu0  ;;  %v635_v54 = vpop.f32.mrb[4].mxu1 }
  0xe6   :  { %511 = vst.msk [vmem:[%s1000_s4 + $0xc] sm:$0xf] %vm507_vm1, %v578_v49  ;;  %523 = vst.msk [vmem:[%s1000_s4 + $0x3c] sm:$0xf] %vm507_vm1, %v590_v50  ;;  %v173_v55 = vadd.f32 %v623_v53, %v859_v16  ;;  %v221_v56 = vadd.f32 %v635_v54, %v859_v16  ;;  %v164_v57 = vpop.f32.mrb[5].mxu0  ;;  %v212_v58 = vpop.f32.mrb[5].mxu1 }
  0xe7   :  { %509 = vst.msk [vmem:[%s1000_s4 + $0x4] sm:$0xf] %vm507_vm1, %v576_v51  ;;  %521 = vst.msk [vmem:[%s1000_s4 + $0x34] sm:$0xf] %vm507_vm1, %v588_v52  ;;  %v165_v59 = vadd.f32 %v859_v16, %v164_v57  ;;  %v213_v60 = vadd.f32 %v859_v16, %v212_v58  ;;  %v624_v61 = vpop.f32.mrb[6].mxu0  ;;  %v636_v62 = vpop.f32.mrb[6].mxu1 }
  0xe8   :  { %v393_v63 = vmul.f32 %v842_v5, %v173_v55  ;;  %v405_v0 = vmul.f32 %v360_v18, %v221_v56  ;;  %v176_v1 = vadd.f32 %v624_v61, %v859_v16  ;;  %v224_v2 = vadd.f32 %v636_v62, %v859_v16  ;;  %v167_v11 = vpop.f32.mrb[7].mxu0  ;;  %v215_v12 = vpop.f32.mrb[7].mxu1 }
  0xe9   :  { %v391_v13 = vmul.f32 %v838_v3, %v165_v59  ;;  %v403_v14 = vmul.f32 %v854_v15, %v213_v60  ;;  %v168_v19 = vadd.f32 %v859_v16, %v167_v11  ;;  %v216_v20 = vadd.f32 %v859_v16, %v215_v12  ;;  %v375_v18 = vpop.permute.xlu1 %374 }
  0xea   :  { %v581_v21 = vpack.c.bf16 %v393_v63, %v393_v63  ;;  %v593_v22 = vpack.c.bf16 %v405_v0, %v405_v0  ;;  %v394_v23 = vmul.f32 %v844_v6, %v176_v1  ;;  %v406_v5 = vmul.f32 %v365_v47, %v224_v2 }
  0xeb   :  { %v579_v24 = vpack.c.bf16 %v391_v13, %v391_v13  ;;  %v591_v25 = vpack.c.bf16 %v403_v14, %v403_v14  ;;  %v392_v26 = vmul.f32 %v840_v4, %v168_v19  ;;  %v404_v27 = vmul.f32 %v861_v17, %v216_v20 }
  0xec   :  { %514 = vst.msk [vmem:[%s1000_s4 + $0x18] sm:$0xf] %vm507_vm1, %v581_v21  ;;  %526 = vst.msk [vmem:[%s1000_s4 + $0x48] sm:$0xf] %vm507_vm1, %v593_v22  ;;  %v582_v3 = vpack.c.bf16 %v394_v23, %v394_v23  ;;  %v594_v6 = vpack.c.bf16 %v406_v5, %v406_v5 }
  0xed   :  { %512 = vst.msk [vmem:[%s1000_s4 + $0x10] sm:$0xf] %vm507_vm1, %v579_v24  ;;  %524 = vst.msk [vmem:[%s1000_s4 + $0x40] sm:$0xf] %vm507_vm1, %v591_v25  ;;  %v580_v4 = vpack.c.bf16 %v392_v26, %v392_v26  ;;  %v592_v15 = vpack.c.bf16 %v404_v27, %v404_v27  ;;  %v627_v17 = vpop.f32.mrb[8].mxu0  ;;  %v639_v29 = vpop.f32.mrb[8].mxu1 }
  0xee   :  { %515 = vst.msk [vmem:[%s1000_s4 + $0x1c] sm:$0xf] %vm507_vm1, %v582_v3  ;;  %527 = vst.msk [vmem:[%s1000_s4 + $0x4c] sm:$0xf] %vm507_vm1, %v594_v6  ;;  %v189_v30 = vadd.f32 %v627_v17, %v859_v16  ;;  %v237_v31 = vadd.f32 %v639_v29, %v859_v16  ;;  %v180_v32 = vpop.f32.mrb[9].mxu0  ;;  %v228_v33 = vpop.f32.mrb[9].mxu1 }
  0xef   :  { %513 = vst.msk [vmem:[%s1000_s4 + $0x14] sm:$0xf] %vm507_vm1, %v580_v4  ;;  %525 = vst.msk [vmem:[%s1000_s4 + $0x44] sm:$0xf] %vm507_vm1, %v592_v15  ;;  %v181_v34 = vadd.f32 %v859_v16, %v180_v32  ;;  %v229_v35 = vadd.f32 %v859_v16, %v228_v33  ;;  %v628_v36 = vpop.f32.mrb[10].mxu0  ;;  %v640_v37 = vpop.f32.mrb[10].mxu1 }
  0xf0   :  { %v397_v38 = vmul.f32 %v850_v9, %v189_v30  ;;  %v409_v39 = vmul.f32 %v380_v28, %v237_v31  ;;  %v192_v40 = vadd.f32 %v628_v36, %v859_v16  ;;  %v240_v41 = vadd.f32 %v640_v37, %v859_v16  ;;  %v183_v42 = vpop.f32.mrb[11].mxu0  ;;  %v231_v43 = vpop.f32.mrb[11].mxu1 }
  0xf1   :  { %v385_v44 = vpop.permute.xlu1 %384  ;;  %v395_v45 = vmul.f32 %v846_v7, %v181_v34  ;;  %v407_v46 = vmul.f32 %v871_v48, %v229_v35  ;;  %v184_v47 = vadd.f32 %v859_v16, %v183_v42  ;;  %v232_v49 = vadd.f32 %v859_v16, %v231_v43 }
  0xf2   :  { %v585_v50 = vpack.c.bf16 %v397_v38, %v397_v38  ;;  %v597_v51 = vpack.c.bf16 %v409_v39, %v409_v39  ;;  %v398_v9 = vmul.f32 %v852_v10, %v192_v40  ;;  %v410_v52 = vmul.f32 %v385_v44, %v240_v41 }
  0xf3   :  { %v583_v53 = vpack.c.bf16 %v395_v45, %v395_v45  ;;  %v595_v54 = vpack.c.bf16 %v407_v46, %v407_v46  ;;  %v396_v55 = vmul.f32 %v848_v8, %v184_v47  ;;  %v408_v56 = vmul.f32 %v375_v18, %v232_v49 }
  0xf4   :  { %518 = vst.msk [vmem:[%s1000_s4 + $0x28] sm:$0xf] %vm507_vm1, %v585_v50  ;;  %530 = vst.msk [vmem:[%s1000_s4 + $0x58] sm:$0xf] %vm507_vm1, %v597_v51  ;;  %v586_v7 = vpack.c.bf16 %v398_v9, %v398_v9  ;;  %v598_v16 = vpack.c.bf16 %v410_v52, %v410_v52 }
  0xf5   :  { %516 = vst.msk [vmem:[%s1000_s4 + $0x20] sm:$0xf] %vm507_vm1, %v583_v53  ;;  %528 = vst.msk [vmem:[%s1000_s4 + $0x50] sm:$0xf] %vm507_vm1, %v595_v54  ;;  %v584_v8 = vpack.c.bf16 %v396_v55, %v396_v55  ;;  %v596_v10 = vpack.c.bf16 %v408_v56, %v408_v56 }
  0xf6   :  { %519 = vst.msk [vmem:[%s1000_s4 + $0x2c] sm:$0xf] %vm507_vm1, %v586_v7  ;;  %531 = vst.msk [vmem:[%s1000_s4 + $0x5c] sm:$0xf] %vm507_vm1, %v598_v16 }
  0xf7   :  { %517 = vst.msk [vmem:[%s1000_s4 + $0x24] sm:$0xf] %vm507_vm1, %v584_v8  ;;  %529 = vst.msk [vmem:[%s1000_s4 + $0x54] sm:$0xf] %vm507_vm1, %v596_v10 }

// kernel: deformable_decoder_layer_forward.7
= control target key start
LH: loop header
LB: loop body
LE: loop exit
PB: predicated region body
PF: predicated region fallthrough
CT: control target
= control target key end

     0   :  { %v330_v1 = vmov 0.0   ;;  %vm331_vm0 = vmmov 0   ;;  %vm54_vm1 = vcmask 261120   ;;  %s430_s0 = inlined_call_operand.vmem [shape: f32[16,32], index: 0, kind: input, shape index: {}]   ;;  %s431_s1 = inlined_call_operand.vmem [shape: bf16[32,64], index: 1, kind: input, shape index: {}]   ;;  %s432_s2 = inlined_call_operand.vmem [shape: f32[1,64], index: 2, kind: input, shape index: {}]   ;;  %s433_s3 = inlined_call_operand.vmem [shape: bf16[64,32], index: 3, kind: input, shape index: {}]   ;;  %s434_s4 = inlined_call_operand.vmem [shape: f32[1,32], index: 4, kind: input, shape index: {}]   ;;  %s435_s5 = inlined_call_operand.vmem [shape: f32[1,32], index: 5, kind: input, shape index: {}]   ;;  %s436_s6 = inlined_call_operand.vmem [shape: f32[1,32], index: 6, kind: input, shape index: {}]   ;;  %s437_s7 = inlined_call_operand.hbm [shape: f32[16,32], index: 7, kind: output, shape index: {}]  }
   0x1   :  { %v296_v0 = vld [vmem:[%s431_s1] sm:$0xff]   ;;  %271 = vmatprep.subr.bf16.mxu0 %v330_v1  ;;  %v297_v2 = vld [vmem:[%s431_s1 + $0x8] sm:$0xff]   ;;  %279 = vmatprep.subr.bf16.mxu1 %v330_v1 }
   0x2   :  { %272 = vmatpush3.bf16.msra.mxu0 %v296_v0  ;;  %275 = vmatprep.mubr.msk.bf16.mxu0 %vm331_vm0, %v330_v1  ;;  %v28_v3 = vld [vmem:[%s430_s0] sm:$0xff]  ;;  %v29_v4 = vld [vmem:[%s430_s0 + $0x8] sm:$0xff] }
   0x3   :  { %273 = vmatprep.subr.bf16.mxu0 %v330_v1  ;;  %v298_v5 = vld [vmem:[%s433_s3] sm:$0xff]   ;;  %287 = vmatprep.mubr.msk.bf16.mxu1 %vm331_vm0, %v330_v1  ;;  %v299_v6 = vld [vmem:[%s433_s3 + $0x8] sm:$0xff]   ;;  %v30_v7 = vpack.c.bf16 %v29_v4, %v28_v3 }
   0x4   :  { %280 = vmatpush3.bf16.msra.mxu1 %v298_v5 }
   0x5   :  { %281 = vmatprep.subr.bf16.mxu1 %v330_v1 }
   0x6   :  { %274 = vmatpush3.bf16.msra.mxu0 %v297_v2 }
   0x7   :  { %12 = vsyncpa [#allocation3], 0  ;;  %v300_v8 = vld [vmem:[%s433_s3 + $0x10] sm:$0xff]   ;;  %v301_v9 = vld [vmem:[%s433_s3 + $0x18] sm:$0xff]   ;;  %vm141_vm2 = vcmask 523264   ;;  %s332_s20 = smov [#allocation2]  }
   0x8   :  { %282 = vmatpush3.bf16.msra.mxu1 %v299_v6  ;;  %v251_v10 = vld [vmem:[%s432_s2] ss:$0 sm:$0xff]  ;;  %s240_s21 = sshll.u32 %s332_s20, 4  ;;  %s241_s21 = int_to_ptr.vmem [resolvable:$true] %s240_s21 }
   0x9   :  { %276 = vmatmul.mubr.msk.bf16.vlgmr.msra.gmra.mrb[0].mxu0 %vm54_vm1, %v30_v7  ;;  %283 = vmatprep.subr.bf16.mxu1 %v330_v1  ;;  %v255_v20 = vld [vmem:[%s434_s4] ss:$0 sm:$0xff]  ;;  %s306_s22 = scalar_lea.vmem %s241_s21, 256  ;;  %p311_p1 = scmp.lt.s32.totalorder %s241_s21, %s241_s21 }
   0xa   :  { %v261_v48 = vld [vmem:[%s435_s5] ss:$0 sm:$0xff]  ;;  %p307_p0 = scmp.ne.s32.totalorder %s241_s21, %s306_s22  ;;  %p312_p2 = scmp.lt.s32.totalorder %s306_s22, %s306_s22 }
   0xb   :  { %v262_v50 = vld [vmem:[%s436_s6] ss:$0 sm:$0xff] }
   0xc   :  { %284 = vmatpush3.bf16.msra.mxu1 %v300_v8  ;;  %p313_p3 = por %p312_p2, %p311_p1 }
   0xd   :  { %285 = vmatprep.subr.bf16.mxu1 %v330_v1 }
   0xe   :  { %p314_p4 = pnand %p313_p3, %p307_p0 }
  0x10   :  { %286 = vmatpush3.bf16.msra.mxu1 %v301_v9 }
  0xdc   :  { %v92_v11 = vpop.f32.mrb[0].mxu0 }
  0xdd   :  { %v93_v12 = vadd.f32 %v251_v10, %v92_v11  ;;  %v277_v13 = vpop.f32.mrb[1].mxu0 }
  0xde   :  { %v95_v14 = vpop.f32.mrb[2].mxu0 }
  0xdf   :  { %v96_v15 = vadd.f32 %v251_v10, %v95_v14  ;;  %v278_v16 = vpop.f32.mrb[3].mxu0  ;;  %v99_v17 = vmax.f32 %v93_v12, 0.0 }
  0xe1   :  { %v100_v18 = vmax.f32 %v96_v15, 0.0 }
  0xe3   :  { %v101_v19 = vpack.c.bf16 %v100_v18, %v99_v17 }
  0xe5   :  { %288 = vmatmul.mubr.msk.bf16.vlgmr.msra.gmra.mrb[0].mxu1 %vm141_vm2, %v101_v19 }
 0x1b8   :  { %v179_v21 = vpop.f32.mrb[0].mxu1 }
 0x1b9   :  { %v180_v22 = vadd.f32 %v255_v20, %v179_v21  ;;  %v289_v23 = vpop.f32.mrb[1].mxu1 }
 0x1ba   :  { %v182_v24 = vpop.f32.mrb[2].mxu1 }
 0x1bb   :  { %v183_v25 = vadd.f32 %v255_v20, %v182_v24  ;;  %v290_v26 = vpop.f32.mrb[3].mxu1  ;;  %v186_v27 = vadd.f32 %v180_v22, %v28_v3 }
 0x1bd   :  { %v188_v28 = vsel %vm54_vm1, %v186_v27, 0.0  ;;  %v187_v29 = vadd.f32 %v183_v25, %v29_v4 }
 0x1be   :  { %189 = vadd.xlane.f32.xlu0 %v188_v28 }
 0x1bf   :  { %v191_v30 = vsel %vm54_vm1, %v187_v29, 0.0 }
 0x1c2   :  { %192 = vadd.xlane.f32.xlu0 %v191_v30 }
 0x24b   :  { %v190_v31 = vpop.xlane.xlu0 %189 }
 0x24c   :  { %v195_v32 = vmul.f32 0.03125, %v190_v31 }
 0x24e   :  { %v197_v33 = vsub.f32 %v186_v27, %v195_v32 }
 0x24f   :  { %v193_v34 = vpop.xlane.xlu0 %192 }
 0x250   :  { %v196_v35 = vmul.f32 0.03125, %v193_v34  ;;  %v199_v36 = vmul.f32 %v197_v33, %v197_v33 }
 0x252   :  { %v198_v37 = vsub.f32 %v187_v29, %v196_v35  ;;  %v201_v38 = vsel %vm54_vm1, %v199_v36, 0.0 }
 0x253   :  { %202 = vadd.xlane.f32.xlu1 %v201_v38 }
 0x254   :  { %v200_v39 = vmul.f32 %v198_v37, %v198_v37 }
 0x256   :  { %v204_v40 = vsel %vm54_vm1, %v200_v39, 0.0 }
 0x257   :  { %205 = vadd.xlane.f32.xlu1 %v204_v40 }
 0x2e0   :  { %v203_v41 = vpop.xlane.xlu1 %202 }
 0x2e1   :  { %v207_v42 = vmul.f32 0.03125, %v203_v41 }
 0x2e3   :  { %v209_v43 = vadd.f32 1e-05, %v207_v42 }
 0x2e4   :  { %v206_v44 = vpop.xlane.xlu1 %205 }
 0x2e5   :  { %302 = vrsqrt.f32 %v209_v43  ;;  %v208_v45 = vmul.f32 0.03125, %v206_v44 }
 0x2e7   :  { %v210_v46 = vadd.f32 1e-05, %v208_v45 }
 0x2e9   :  { %304 = vrsqrt.f32 %v210_v46 }
 0x2ef   :  { %v303_v47 = vpop.eup %302 }
 0x2f0   :  { %v213_v49 = vmul.f32 %v303_v47, %v197_v33 }
 0x2f2   :  { %v222_v51 = vmul.f32 %v261_v48, %v213_v49 }
 0x2f3   :  { %v305_v52 = vpop.eup %304 }
 0x2f4   :  { %v214_v53 = vmul.f32 %v305_v52, %v198_v37  ;;  %v231_v54 = vadd.f32 %v262_v50, %v222_v51 }
 0x2f6   :  { %v223_v55 = vmul.f32 %v261_v48, %v214_v53  ;;  %233 = vst.msk [vmem:[#allocation2] sm:$0xff] %vm54_vm1, %v231_v54 }
 0x2f8   :  { %v232_v56 = vadd.f32 %v262_v50, %v223_v55 }
 0x2fa   :  { %234 = vst.msk [vmem:[#allocation2 + $0x8] sm:$0xff] %vm54_vm1, %v232_v56 }
 0x2fb   :  { %317 = shalt.err (!%p314_p4)
}
 0x2fc   :  { %s318_s23 = scalar_lea.hbm %s437_s7, 256 }
 0x2fd   :  { %p319_p5 = scmp.ne.s32.totalorder %s437_s7, %s318_s23  ;;  %p322_p6 = scmp.lt.u32.totalorder %s318_s23, %s437_s7 }
 0x2ff   :  { %p324_p7 = pnand %p322_p6, %p319_p5 }
 0x301   :  { %327 = shalt.err (!%p324_p7)
}
 0x302   :  { %s333_s28 = smov 128   ;;  %s334_s29 = smov 8  }
 0x303   :  { %246 = dma.vmem_to_hbm [thread:$0]  %s241_s21, 256, %s437_s7, [#allocation3], %s333_s28, %s333_s28, %s334_s29  }
 0x304   :  { %328 = dma.done.wait [#allocation3], 256  }
 0x305   :  { %329 = vsyncadd [#allocation3], 4294967040 }
 0x306   :  { %250 = vsyncpa [#allocation3], 1 }

// kernel: deformable_decoder_layer_forward.6
= control target key start
LH: loop header
LB: loop body
LE: loop exit
PB: predicated region body
PF: predicated region fallthrough
CT: control target
= control target key end

     0   :  { %s1912_s27 = smov 0   ;;  %s1914_s28 = smov 0   ;;  %s2591_s0 = inlined_call_operand.vmem [shape: s32[2,4,8,16], index: 0, kind: input, shape index: {}]   ;;  %s2592_s1 = inlined_call_operand.vmem [shape: f32[2,4,8,16], index: 1, kind: input, shape index: {}]   ;;  %s2593_s2 = inlined_call_operand.vmem [shape: bf16[2,96,32], index: 2, kind: input, shape index: {}]   ;;  %s2594_s3 = inlined_call_operand.vmem [shape: f32[2,8,32], index: 3, kind: input, shape index: {}]   ;;  %s2595_s4 = inlined_call_operand.vmem [shape: bf16[32,32], index: 4, kind: input, shape index: {}]   ;;  %s2596_s5 = inlined_call_operand.vmem [shape: f32[1,32], index: 5, kind: input, shape index: {}]   ;;  %s2597_s6 = inlined_call_operand.vmem [shape: f32[1,32], index: 6, kind: input, shape index: {}]   ;;  %s2598_s7 = inlined_call_operand.vmem [shape: f32[1,32], index: 7, kind: input, shape index: {}]   ;;  %s2599_s8 = inlined_call_operand.vmem [shape: f32[2,8,32], index: 8, kind: output, shape index: {}]  }
   0x1   :  { %2627 = sst [smem:[#allocation17_spill]] %s2591_s0  ;;  %s1916_s29 = smov 0  }
   0x2   :  { %s1918_s30 = smov 0   ;;  %s1920_s9 = smov 0  }
   0x3 LB: > { %s27_s10 = sadd.s32 1, %s1830_s29  ;;  %s30_s11 = sadd.s32 1, %s1834_s30  ;;  %s1838_s9 = sphi %s1920_s9, %s18_s9   ;;  %s1834_s30 = sphi %s1918_s30, %s2678_s30   ;;  %s1830_s29 = sphi %s1916_s29, %s2677_s29   ;;  %s1826_s28 = sphi %s1914_s28, %s2676_s28   ;;  %s1822_s27 = sphi %s1912_s27, %s2675_s27  }
   0x4   : > { %p28_p0 = scmp.ge.s32.totalorder %s27_s10, 2  ;;  %p1530_p1 = scmp.ge.s32.totalorder %s1838_s9, 1 }
   0x5   : > { %p310_p2 = scmp.lt.s32.totalorder %s1838_s9, 5 }
   0x6   : > { %s2680_s10 = smov (%p28_p0, %s27_s10), 0  ;;  %s2682_s11 = smov (!%p28_p0, %s30_s11), %s1834_s30 }
   0x7   : > { %2628 = sst [smem:[#allocation3_spill]] %s2680_s10  ;;  %p311_p3 = pnand %p1530_p1, %p310_p2 }
   0x8   : > { %p32_p4 = scmp.ge.s32.totalorder %s2682_s11, 2 }
   0x9   : > { %314 = sbr.rel (%p311_p3) target bundleno = 1466 (0x5ba), region = 52 }
   0xa   : > { %s2684_s11 = smov (%p32_p4, %s2682_s11), 0 }
   0xb   : > { %2629 = sst [smem:[#allocation4_spill]] %s2684_s11 }
  0x10   : > { %p361_p5 = scmp.lt.s32.totalorder %s1826_s28, 1  ;;  %s371_s12 = smul.u32 6, %s1822_s27 }
  0x11   : > { %s2630_s0 = sld [smem:[#allocation17_spill]]  ;;  %p1538_p7 = scmp.ne.s32.totalorder %s1822_s27, 0 }
  0x12   : > { %s2686_s28 = smov (!%p361_p5, %s1826_s28), 1  ;;  %p374_p6 = scmp.lt.s32.totalorder %s371_s12, 11  ;;  %vm394_vm0 = vcmask (!%p1538_p7), 261120   ;;  %v1840_v0 = vmov (!%p1538_p7), 0.0  }
  0x13   : > { %s1561_s13 = sshll.u32 %s2686_s28, 5  ;;  %s1630_s14 = smul.u32 12, %s2686_s28  ;;  %395 = vst.msk [vmem:[#allocation2] sm:$0xff] (!%p1538_p7), %vm394_vm0, %v1840_v0 }
  0x14   : > { %s1953_s20 = scalar_lea.vmem %s2592_s1, %s1561_s13  ;;  %s2688_s12 = smov (!%p374_p6, %s371_s12), 11 }
  0x15   : > { %s1536_s21 = sshll.u32 %s2686_s28, 3  ;;  %s377_s22 = sadd.s32 %s1630_s14, %s2688_s12 }
  0x16   : > { %s1958_s25 = scalar_lea.vmem %s2594_s3, %s1536_s21  ;;  %s1535_s26 = sshll.u32 %s377_s22, 2 }
  0x17   : > { %s1948_s17 = scalar_lea.vmem %s2630_s0, %s1561_s13  ;;  %s1963_s15 = scalar_lea.vmem %s2599_s8, %s1536_s21 }
  0x18   : > { %s1968_s18 = scalar_lea.vmem %s2593_s2, %s1535_s26  ;;  %393 = sbr.rel (%p1538_p7) target bundleno = 31 (0x1f), region = 56 }
  0x1f PF: > { %v1972_v1 = vld [vmem:[%s1953_s20] sm:$0xff]  ;;  %s396_s28 = smul.u32 48, %s1822_s27  ;;  %v2624_v3 = vmov 1   ;;  %v2617_v4 = vmov 5   ;;  %v2615_v7 = vmov 8   ;;  %v2625_v8 = vmov 2  }
  0x20   : > { %v405_v2 = vld [vmem:[%s1948_s17] sm:$0xff]  ;;  %1698 = vset.pattern.permute.xlu1 %v2624_v3  ;;  %1702 = vset.pattern.permute.xlu0 %v2617_v4  ;;  %v2612_v9 = vmov 11   ;;  %v2603_v10 = vmov 3   ;;  %v2619_v11 = vmov 14   ;;  %v2621_v12 = vmov 4   ;;  %v2002_v13 = vld [vmem:[%s1953_s20 + $0x8] sm:$0xff] }
  0x21   : > { %424 = vperm.xlu1 %1698, %v1972_v1   ;;  %v1979_v5 = vstv %s396_s28  ;;  %v1543_v14 = vld [vmem:[%s1948_s17 + $0x8] sm:$0xff]  ;;  %v2614_v15 = vmov 12   ;;  %v2611_v16 = vmov 6   ;;  %v2608_v18 = vmov 7   ;;  %v2023_v20 = vld [vmem:[%s1968_s18] sm:$0xff]   ;;  %s1853_s0 = smov 120  }
  0x22   : > { %v1982_v6 = vsub.s32 %v405_v2, %v1979_v5  ;;  %v2012_v17 = vsub.s32 %v1543_v14, %v1979_v5  ;;  %v2623_v19 = vmov 15   ;;  %v2030_v21 = vld [vmem:[%s1953_s20 + $0x10] sm:$0xff]  ;;  %v2610_v22 = vmov 9   ;;  %v1549_v26 = vld [vmem:[%s1948_s17 + $0x18] sm:$0xff]  ;;  %s1856_s10 = smov 112   ;;  %v2177_v54 = vld [vmem:[%s1968_s18 + $0x8] sm:$0xff]  }
  0x23   : > { %v1546_v23 = vld [vmem:[%s1948_s17 + $0x10] sm:$0xff]  ;;  %v2606_v24 = vmov 10   ;;  %v2051_v27 = vsub.s32 %v1549_v26, %v1979_v5  ;;  %v2604_v28 = vmov 13   ;;  %v2602_v29 = vmov 0   ;;  %v2110_v35 = vld [vmem:[%s1953_s20 + $0x18] sm:$0xff]  ;;  %s1861_s11 = smov 104  }
  0x24   : > { %456 = vperm.xlu0 %1702, %v1982_v6   ;;  %v2041_v25 = vsub.s32 %v1546_v23, %v1979_v5  ;;  %v2600_v52 = vmov 0.0   ;;  %v2190_v57 = vld [vmem:[%s1968_s18 + $0x10] sm:$0xff]   ;;  %vm1860_vm1 = vmmov 0   ;;  %s1862_s12 = smov 8   ;;  %s1863_s13 = smov 16  }
  0x25   : > { %420 = vperm.xlu1 %1698, %v1982_v6   ;;  %1582 = vmatprep.subr.bf16.mxu0 %v2600_v52  ;;  %s1864_s14 = smov 24   ;;  %p1552_p8 = scmp.ne.s32.totalorder %s1822_s27, 1 }
  0x26   : > { %1583 = vmatpush3.bf16.msra.mxu0 %v2023_v20  ;;  %1592 = vmatprep.subr.bf16.mxu1 %v2600_v52 }
  0x27   : > { %1584 = vmatprep.subr.bf16.mxu0 %v2600_v52  ;;  %1588 = vmatprep.mubr.msk.bf16.mxu0 %vm1860_vm1, %v2600_v52 }
  0x28   : > { %1706 = vset.pattern.permute.xlu0 %v2615_v7  ;;  %1598 = vmatprep.mubr.msk.bf16.mxu1 %vm1860_vm1, %v2600_v52 }
  0x29   : > { %483 = vperm.xlu0 %1706, %v1982_v6   ;;  %1699 = vset.pattern.permute.xlu1 %v2625_v8 }
  0x2a   : > { %433 = vperm.xlu1 %1699, %v1972_v1   ;;  %1585 = vmatpush3.bf16.msra.mxu0 %v2177_v54 }
  0x2b   : > { %1586 = vmatprep.subr.bf16.mxu0 %v2600_v52 }
  0x2d   : > { %1710 = vset.pattern.permute.xlu0 %v2612_v9 }
  0x2e   : > { %510 = vperm.xlu0 %1710, %v1982_v6   ;;  %1700 = vset.pattern.permute.xlu1 %v2603_v10 }
  0x2f   : > { %438 = vperm.xlu1 %1700, %v1982_v6   ;;  %1587 = vmatpush3.bf16.msra.mxu0 %v2190_v57 }
  0x30   : > { %1602 = vmatprep.subr.bf16.mxu0 %v2600_v52 }
  0x32   : > { %1714 = vset.pattern.permute.xlu0 %v2619_v11 }
  0x33   : > { %537 = vperm.xlu0 %1714, %v1982_v6   ;;  %1701 = vset.pattern.permute.xlu1 %v2621_v12 }
  0x34   : > { %447 = vperm.xlu1 %1701, %v1982_v6  }
  0x37   : > { %1715 = vset.pattern.permute.xlu0 %v2625_v8 }
  0x38   : > { %429 = vperm.xlu0 %1715, %v1982_v6   ;;  %451 = vperm.xlu1 %1701, %v1972_v1  }
  0x3c   : > { %665 = vperm.xlu0 %1715, %v2002_v13   ;;  %1703 = vset.pattern.permute.xlu1 %v2617_v4 }
  0x3d   : > { %460 = vperm.xlu1 %1703, %v1972_v1  }
  0x40   : > { %1721 = vset.pattern.permute.xlu0 %v2614_v15 }
  0x41   : > { %523 = vperm.xlu0 %1721, %v1972_v1   ;;  %1704 = vset.pattern.permute.xlu1 %v2611_v16 }
  0x42   : > { %465 = vperm.xlu1 %1704, %v1982_v6  }
  0x45   : > { %751 = vperm.xlu0 %1721, %v2012_v17  }
  0x46   : > { %1705 = vset.pattern.permute.xlu1 %v2608_v18 }
  0x47   : > { %474 = vperm.xlu1 %1705, %v1982_v6  }
  0x49   : > { %1729 = vset.pattern.permute.xlu0 %v2623_v19 }
  0x4a   : > { %550 = vperm.xlu0 %1729, %v1972_v1  }
  0x4b   : > { %478 = vperm.xlu1 %1705, %v1972_v1  }
  0x4e   : > { %778 = vperm.xlu0 %1729, %v2012_v17  }
  0x4f   : > { %1707 = vset.pattern.permute.xlu1 %v2615_v7 }
  0x50   : > { %487 = vperm.xlu1 %1707, %v1972_v1  }
  0x52   : > { %803 = vrot.lane.b32.xlu0 %v2023_v20, %s1853_s0 }
  0x54   : > { %1708 = vset.pattern.permute.xlu1 %v2610_v22 }
  0x55   : > { %492 = vperm.xlu1 %1708, %v1982_v6  }
  0x56   : > { %1008 = vperm.xlu0 %1729, %v2030_v21  }
  0x59   : > { %1709 = vset.pattern.permute.xlu1 %v2606_v24 }
  0x5a   : > { %1761 = vset.pattern.permute.xlu0 %v2624_v3  ;;  %501 = vperm.xlu1 %1709, %v1982_v6  }
  0x5b   : > { %652 = vperm.xlu0 %1761, %v2012_v17  }
  0x5e   : > { %505 = vperm.xlu1 %1709, %v1972_v1  }
  0x5f   : > { %878 = vperm.xlu0 %1761, %v2041_v25  }
  0x62   : > { %1711 = vset.pattern.permute.xlu1 %v2612_v9 }
  0x63   : > { %1029 = vrot.lane.b32.xlu0 %v2023_v20, %s1856_s10  ;;  %514 = vperm.xlu1 %1711, %v1972_v1  }
  0x67   : > { %1104 = vperm.xlu0 %1761, %v2051_v27   ;;  %1712 = vset.pattern.permute.xlu1 %v2614_v15 }
  0x68   : > { %519 = vperm.xlu1 %1712, %v1982_v6  }
  0x6b   : > { %1763 = vset.pattern.permute.xlu0 %v2621_v12 }
  0x6c   : > { %679 = vperm.xlu0 %1763, %v2012_v17   ;;  %1713 = vset.pattern.permute.xlu1 %v2604_v28 }
  0x6d   : > { %528 = vperm.xlu1 %1713, %v1982_v6  }
  0x70   : > { %905 = vperm.xlu0 %1763, %v2041_v25  }
  0x71   : > { %532 = vperm.xlu1 %1713, %v1972_v1  }
  0x74   : > { %1131 = vperm.xlu0 %1763, %v2051_v27  }
  0x75   : > { %1716 = vset.pattern.permute.xlu1 %v2619_v11 }
  0x76   : > { %541 = vperm.xlu1 %1716, %v1972_v1  }
  0x78   : > { %1766 = vset.pattern.permute.xlu0 %v2608_v18 }
  0x79   : > { %710 = vperm.xlu0 %1766, %v2002_v13  }
  0x7a   : > { %1717 = vset.pattern.permute.xlu1 %v2623_v19 }
  0x7b   : > { %546 = vperm.xlu1 %1717, %v1982_v6  }
  0x7d   : > { %932 = vperm.xlu0 %1766, %v2041_v25  }
  0x7f   : > { %1718 = vset.pattern.permute.xlu1 %v2602_v29 }
  0x80   : > { %642 = vperm.xlu1 %1718, %v2012_v17  }
  0x81   : > { %1158 = vperm.xlu0 %1766, %v2051_v27  }
  0x84   : > { %647 = vperm.xlu1 %1718, %v2002_v13  }
  0x85   : > { %1769 = vset.pattern.permute.xlu0 %v2606_v24 }
  0x86   : > { %737 = vperm.xlu0 %1769, %v2002_v13  }
  0x88   : > { %1719 = vset.pattern.permute.xlu1 %v2624_v3 }
  0x89   : > { %656 = vperm.xlu1 %1719, %v2002_v13  }
  0x8a   : > { %959 = vperm.xlu0 %1769, %v2041_v25  }
  0x8d   : > { %1720 = vset.pattern.permute.xlu1 %v2625_v8 }
  0x8e   : > { %1185 = vperm.xlu0 %1769, %v2051_v27   ;;  %661 = vperm.xlu1 %1720, %v2012_v17  }
  0x92   : > { %1772 = vset.pattern.permute.xlu0 %v2604_v28  ;;  %1722 = vset.pattern.permute.xlu1 %v2603_v10 }
  0x93   : > { %764 = vperm.xlu0 %1772, %v2002_v13   ;;  %670 = vperm.xlu1 %1722, %v2012_v17  }
  0x97   : > { %986 = vperm.xlu0 %1772, %v2041_v25   ;;  %674 = vperm.xlu1 %1722, %v2002_v13  }
  0x9b   : > { %1212 = vperm.xlu0 %1772, %v2051_v27   ;;  %1723 = vset.pattern.permute.xlu1 %v2621_v12 }
  0x9c   : > { %683 = vperm.xlu1 %1723, %v2002_v13  }
  0x9f   : > { %1775 = vset.pattern.permute.xlu0 %v2602_v29 }
  0xa0   : > { %v2092_v30 = vpop.permute.xlu1 %424  ;;  %410 = vperm.xlu0 %1775, %v1982_v6   ;;  %1724 = vset.pattern.permute.xlu1 %v2617_v4 }
  0xa1   : > { %688 = vperm.xlu1 %1724, %v2012_v17  }
  0xa3   : > { %v2097_v31 = vpop.permute.xlu0 %456 }
  0xa4   : > { %415 = vperm.xlu0 %1775, %v1972_v1   ;;  %v2100_v32 = vpop.permute.xlu1 %420 }
  0xa5   : > { %1725 = vset.pattern.permute.xlu1 %v2608_v18 }
  0xa6   : > { %706 = vperm.xlu1 %1725, %v2012_v17  }
  0xa8   : > { %873 = vperm.xlu0 %1775, %v2030_v21   ;;  %v2105_v33 = vpop.permute.xlu0 %483 }
  0xa9   : > { %v2107_v34 = vpop.permute.xlu1 %433 }
  0xaa   : > { %1726 = vset.pattern.permute.xlu1 %v2615_v7 }
  0xab   : > { %715 = vperm.xlu1 %1726, %v2012_v17  }
  0xac   : > { %1099 = vperm.xlu0 %1775, %v2110_v35  }
  0xad   : > { %v2115_v36 = vpop.permute.xlu0 %510 }
  0xae   : > { %v2117_v37 = vpop.permute.xlu1 %438 }
  0xaf   : > { %1727 = vset.pattern.permute.xlu1 %v2606_v24 }
  0xb0   : > { %1778 = vset.pattern.permute.xlu0 %v2603_v10  ;;  %733 = vperm.xlu1 %1727, %v2012_v17  }
  0xb1   : > { %442 = vperm.xlu0 %1778, %v1972_v1  }
  0xb2   : > { %v2123_v38 = vpop.permute.xlu0 %537 }
  0xb3   : > { %v2125_v39 = vpop.permute.xlu1 %447 }
  0xb4   : > { %1728 = vset.pattern.permute.xlu1 %v2612_v9 }
  0xb5   : > { %900 = vperm.xlu0 %1778, %v2030_v21   ;;  %742 = vperm.xlu1 %1728, %v2012_v17  }
  0xb7   : > { %v2130_v40 = vpop.permute.xlu0 %429  ;;  %v2132_v41 = vpop.permute.xlu1 %451 }
  0xb9   : > { %1126 = vperm.xlu0 %1778, %v2110_v35   ;;  %1730 = vset.pattern.permute.xlu1 %v2604_v28 }
  0xba   : > { %760 = vperm.xlu1 %1730, %v2012_v17  }
  0xbb   : > { %v2137_v42 = vpop.permute.xlu0 %665 }
  0xbc   : > { %v2139_v43 = vpop.permute.xlu1 %460 }
  0xbd   : > { %1781 = vset.pattern.permute.xlu0 %v2611_v16 }
  0xbe   : > { %469 = vperm.xlu0 %1781, %v1972_v1   ;;  %1731 = vset.pattern.permute.xlu1 %v2619_v11 }
  0xbf   : > { %769 = vperm.xlu1 %1731, %v2012_v17  }
  0xc0   : > { %v2145_v44 = vpop.permute.xlu0 %523 }
  0xc1   : > { %v2147_v45 = vpop.permute.xlu1 %465 }
  0xc2   : > { %697 = vperm.xlu0 %1781, %v2012_v17  }
  0xc3   : > { %1732 = vset.pattern.permute.xlu1 %v2617_v4 }
  0xc4   : > { %692 = vperm.xlu1 %1732, %v2002_v13   ;;  %v2152_v46 = vpop.permute.xlu0 %751 }
  0xc6   : > { %927 = vperm.xlu0 %1781, %v2030_v21   ;;  %v2155_v47 = vpop.permute.xlu1 %474 }
  0xc8   : > { %1733 = vset.pattern.permute.xlu1 %v2611_v16 }
  0xc9   : > { %701 = vperm.xlu1 %1733, %v2002_v13   ;;  %v2159_v48 = vpop.permute.xlu0 %550 }
  0xca   : > { %1153 = vperm.xlu0 %1781, %v2110_v35   ;;  %v2162_v49 = vpop.permute.xlu1 %478 }
  0xcd   : > { %1734 = vset.pattern.permute.xlu1 %v2615_v7  ;;  %v2165_v50 = vpop.permute.xlu0 %778 }
  0xce   : > { %1784 = vset.pattern.permute.xlu0 %v2610_v22  ;;  %719 = vperm.xlu1 %1734, %v2002_v13  }
  0xcf   : > { %496 = vperm.xlu0 %1784, %v1972_v1   ;;  %v2170_v51 = vpop.permute.xlu1 %487 }
  0xd1   : > { %v804_v53 = vpop.permute.xlu0 %803 }
  0xd2   : > { %1735 = vset.pattern.permute.xlu1 %v2610_v22  ;;  %1593 = vmatpush3.bf16.msra.mxu1 %v804_v53 }
  0xd3   : > { %724 = vperm.xlu0 %1784, %v2012_v17   ;;  %728 = vperm.xlu1 %1735, %v2002_v13  }
  0xd4   : > { %v2182_v55 = vpop.permute.xlu1 %492  ;;  %1594 = vmatprep.subr.bf16.mxu1 %v2600_v52 }
  0xd5   : > { %v2186_v56 = vpop.permute.xlu0 %1008 }
  0xd6   : > { %2631 = vst [vmem:[#allocation5_spill] sm:$0xff] %v2186_v56 }
  0xd7   : > { %1736 = vset.pattern.permute.xlu1 %v2612_v9  ;;  %954 = vperm.xlu0 %1784, %v2030_v21  }
  0xd8   : > { %746 = vperm.xlu1 %1736, %v2002_v13  }
  0xd9   : > { %v2196_v58 = vpop.permute.xlu1 %501 }
  0xda   : > { %v2201_v59 = vpop.permute.xlu0 %652 }
  0xdb   : > { %1180 = vperm.xlu0 %1784, %v2110_v35  }
  0xdc   : > { %1737 = vset.pattern.permute.xlu1 %v2614_v15 }
  0xdd   : > { %755 = vperm.xlu1 %1737, %v2002_v13   ;;  %v2208_v60 = vpop.permute.xlu1 %505 }
  0xde   : > { %v2210_v61 = vpop.permute.xlu0 %878 }
  0xdf   : > { %1787 = vset.pattern.permute.xlu0 %v2614_v15 }
  0xe0   : > { %981 = vperm.xlu0 %1787, %v2030_v21  }
  0xe1   : > { %1738 = vset.pattern.permute.xlu1 %v2619_v11 }
  0xe2   : > { %773 = vperm.xlu1 %1738, %v2002_v13   ;;  %v2216_v62 = vpop.permute.xlu1 %514  ;;  %v2218_v63 = vpop.permute.xlu0 %1029 }
  0xe4   : > { %1207 = vperm.xlu0 %1787, %v2110_v35  }
  0xe6   : > { %1739 = vset.pattern.permute.xlu1 %v2623_v19  ;;  %v2222_v0 = vpop.permute.xlu0 %1104 }
  0xe7   : > { %2632 = vst [vmem:[#allocation6_spill] sm:$0xff] %v2222_v0  ;;  %782 = vperm.xlu1 %1739, %v2002_v13   ;;  %v520_v1 = vpop.permute.xlu1 %519  ;;  %v397_v13 = vlaneseq }
  0xe8   : > { %1792 = vset.pattern.permute.xlu0 %v2623_v19 }
  0xe9   : > { %1234 = vperm.xlu0 %1792, %v2110_v35   ;;  %v2239_v26 = vand.u32 127, %v397_v13 }
  0xeb   : > { %1740 = vset.pattern.permute.xlu1 %v2602_v29  ;;  %v2228_v2 = vpop.permute.xlu0 %679  ;;  %vm539_vm2 = vcmp.eq.s32.totalorder %v2123_v38, %v2239_v26  ;;  %vm521_vm3 = vcmp.eq.s32.totalorder %v520_v1, %v2239_v26  ;;  %vm458_vm6 = vcmp.eq.s32.totalorder %v2097_v31, %v2239_v26  ;;  %vm431_vm7 = vcmp.eq.s32.totalorder %v2130_v40, %v2239_v26 }
  0xec   : > { %868 = vperm.xlu1 %1740, %v2041_v25   ;;  %v529_v5 = vpop.permute.xlu1 %528  ;;  %v526_v13 = vsel %vm521_vm3, %v2145_v44, 0.0  ;;  %vm440_vm9 = vcmp.eq.s32.totalorder %v2117_v37, %v2239_v26  ;;  %vm422_vm10 = vcmp.eq.s32.totalorder %v2100_v32, %v2239_v26  ;;  %v463_v31 = vsel %vm458_vm6, %v2139_v43, 0.0 }
  0xed   : > { %vm530_vm4 = vcmp.eq.s32.totalorder %v529_v5, %v2239_v26  ;;  %vm449_vm11 = vcmp.eq.s32.totalorder %v2125_v39, %v2239_v26  ;;  %vm476_vm12 = vcmp.eq.s32.totalorder %v2155_v47, %v2239_v26  ;;  %vm467_vm13 = vcmp.eq.s32.totalorder %v2147_v45, %v2239_v26  ;;  %1255 = vrot.lane.b32.xlu0 %v2023_v20, %s1861_s11 }
  0xee   : > { %v454_v32 = vsel %vm449_vm11, %v2132_v41, 0.0  ;;  %v427_v37 = vsel %vm422_vm10, %v2092_v30, 0.0  ;;  %vm654_vm14 = vcmp.eq.s32.totalorder %v2201_v59, %v2239_v26  ;;  %v2648_v41 = vmov 11  }
  0xef   : > { %v2231_v6 = vpop.permute.xlu0 %905  ;;  %v556_v43 = vadd.f32 %v463_v31, %v454_v32  ;;  %vm494_vm10 = vcmp.eq.s32.totalorder %v2182_v55, %v2239_v26  ;;  %vm589_vm11 = vcmask 392192   ;;  %v2652_v20 = vmov 0.0  }
  0xf0   : > { %2633 = vst [vmem:[#allocation7_spill] sm:$0xff] %v2231_v6  ;;  %1741 = vset.pattern.permute.xlu1 %v2625_v8  ;;  %v533_v14 = vpop.permute.xlu1 %532  ;;  %v2647_v6 = vmov 10  }
  0xf1   : > { %887 = vperm.xlu1 %1741, %v2041_v25   ;;  %v535_v52 = vsel %vm530_vm4, %v533_v14, 0.0  ;;  %1259 = vrot.lane.b32.xlu0 %v2190_v57, %s1861_s11 }
  0xf2   : > { %v560_v38 = vadd.f32 %v535_v52, %v526_v13 }
  0xf3   : > { %v2235_v17 = vpop.permute.xlu0 %1131 }
  0xf4   : > { %2634 = vst [vmem:[#allocation8_spill] sm:$0xff] %v2235_v17  ;;  %v2644_v17 = vmov 7  }
  0xf5   : > { %1742 = vset.pattern.permute.xlu1 %v2603_v10  ;;  %v542_v23 = vpop.permute.xlu1 %541 }
  0xf6   : > { %896 = vperm.xlu1 %1742, %v2041_v25   ;;  %v544_v10 = vsel %vm539_vm2, %v542_v23, 0.0  ;;  %vm681_vm2 = vcmp.eq.s32.totalorder %v2228_v2, %v2239_v26 }
  0xf8   : > { %v2241_v53 = vpop.permute.xlu0 %710 }
  0xfa   : > { %1743 = vset.pattern.permute.xlu1 %v2617_v4  ;;  %v547_v29 = vpop.permute.xlu1 %546 }
  0xfb   : > { %vm548_vm5 = vcmp.eq.s32.totalorder %v547_v29, %v2239_v26  ;;  %914 = vperm.xlu1 %1743, %v2041_v25  }
  0xfc   : > { %v553_v28 = vsel %vm548_vm5, %v2159_v48, 0.0  ;;  %v2252_v24 = vpop.permute.xlu0 %932 }
  0xfd   : > { %2635 = vst [vmem:[#allocation9_spill] sm:$0xff] %v2252_v24  ;;  %v561_v18 = vadd.f32 %v553_v28, %v544_v10 }
  0xff   : > { %v2254_v1 = vadd.f32 %v561_v18, %v560_v38  ;;  %1744 = vset.pattern.permute.xlu1 %v2611_v16  ;;  %v2257_v5 = vpop.permute.xlu1 %642 }
 0x100   : > { %923 = vperm.xlu1 %1744, %v2041_v25   ;;  %v2260_v29 = vpop.permute.xlu0 %1158  ;;  %vm644_vm6 = vcmp.eq.s32.totalorder %v2257_v5, %v2239_v26 }
 0x101   : > { %2636 = vst [vmem:[#allocation10_spill] sm:$0xff] %v2260_v29 }
 0x103   : > { %v2262_v14 = vpop.permute.xlu1 %647 }
 0x104   : > { %1745 = vset.pattern.permute.xlu1 %v2615_v7 }
 0x105   : > { %941 = vperm.xlu1 %1745, %v2041_v25   ;;  %v2266_v44 = vpop.permute.xlu0 %737 }
 0x108   : > { %v2268_v48 = vpop.permute.xlu1 %656 }
 0x109   : > { %1746 = vset.pattern.permute.xlu1 %v2610_v22  ;;  %v2271_v10 = vpop.permute.xlu0 %959 }
 0x10a   : > { %2637 = vst [vmem:[#allocation11_spill] sm:$0xff] %v2271_v10  ;;  %950 = vperm.xlu1 %1746, %v2041_v25  }
 0x10d   : > { %v2274_v18 = vpop.permute.xlu1 %661  ;;  %v2276_v28 = vpop.permute.xlu0 %1185 }
 0x10e   : > { %2638 = vst [vmem:[#allocation12_spill] sm:$0xff] %v2276_v28  ;;  %1747 = vset.pattern.permute.xlu1 %v2612_v9  ;;  %v2643_v28 = vmov 5   ;;  %vm663_vm15 = vcmp.eq.s32.totalorder %v2274_v18, %v2239_v26 }
 0x10f   : > { %968 = vperm.xlu1 %1747, %v2041_v25   ;;  %v668_v59 = vsel %vm663_vm15, %v2137_v42, 0.0 }
 0x112   : > { %v2280_v52 = vpop.permute.xlu1 %670  ;;  %v2282_v23 = vpop.permute.xlu0 %764 }
 0x113   : > { %1748 = vset.pattern.permute.xlu1 %v2614_v15  ;;  %vm672_vm0 = vcmp.eq.s32.totalorder %v2280_v52, %v2239_v26  ;;  %v650_v52 = vsel %vm644_vm6, %v2262_v14, 0.0 }
 0x114   : > { %977 = vperm.xlu1 %1748, %v2041_v25  }
 0x116   : > { %v2286_v13 = vpop.permute.xlu1 %674  ;;  %v2288_v38 = vpop.permute.xlu0 %986 }
 0x117   : > { %2639 = vst [vmem:[#allocation13_spill] sm:$0xff] %v2288_v38  ;;  %v2646_v38 = vmov 8   ;;  %v677_v30 = vsel %vm672_vm0, %v2286_v13, 0.0 }
 0x118   : > { %1749 = vset.pattern.permute.xlu1 %v2619_v11  ;;  %v787_v18 = vadd.f32 %v677_v30, %v668_v59 }
 0x119   : > { %995 = vperm.xlu1 %1749, %v2041_v25  }
 0x11a   : > { %v2292_v22 = vpop.permute.xlu0 %1212 }
 0x11b   : > { %2640 = vst [vmem:[#allocation14_spill] sm:$0xff] %v2292_v22  ;;  %v2294_v16 = vpop.permute.xlu1 %683 }
 0x11d   : > { %1750 = vset.pattern.permute.xlu1 %v2623_v19 }
 0x11e   : > { %1004 = vperm.xlu1 %1750, %v2041_v25   ;;  %v2642_v25 = vmov 4  }
 0x11f   : > { %v411_v9 = vpop.permute.xlu0 %410 }
 0x120   : > { %v2298_v15 = vpop.permute.xlu1 %688  ;;  %vm412_vm8 = vcmp.eq.s32.totalorder %v411_v9, %v2239_v26 }
 0x121   : > { %vm690_vm3 = vcmp.eq.s32.totalorder %v2298_v15, %v2239_v26  ;;  %v686_v15 = vsel %vm681_vm2, %v2294_v16, 0.0  ;;  %vm780_vm2 = vcmp.eq.s32.totalorder %v2165_v50, %v2239_v26 }
 0x122   : > { %1751 = vset.pattern.permute.xlu1 %v2624_v3 }
 0x123   : > { %v416_v7 = vpop.permute.xlu0 %415  ;;  %882 = vperm.xlu1 %1751, %v2030_v21  }
 0x124   : > { %v418_v10 = vsel %vm412_vm8, %v416_v7, 0.0  ;;  %vm485_vm8 = vcmp.eq.s32.totalorder %v2105_v33, %v2239_v26 }
 0x125   : > { %v2302_v4 = vpop.permute.xlu1 %706  ;;  %v554_v24 = vadd.f32 %v427_v37, %v418_v10  ;;  %v490_v32 = vsel %vm485_vm8, %v2170_v51, 0.0 }
 0x126   : > { %vm708_vm4 = vcmp.eq.s32.totalorder %v2302_v4, %v2239_v26 }
 0x127   : > { %1752 = vset.pattern.permute.xlu1 %v2625_v8  ;;  %v2305_v11 = vpop.permute.xlu0 %873  ;;  %v713_v4 = vsel %vm708_vm4, %v2241_v53, 0.0 }
 0x128   : > { %891 = vperm.xlu1 %1752, %v2030_v21  }
 0x12a   : > { %v2308_v12 = vpop.permute.xlu1 %715 }
 0x12b   : > { %v2310_v19 = vpop.permute.xlu0 %1099 }
 0x12c   : > { %2641 = vst [vmem:[#allocation15_spill] sm:$0xff] %v2310_v19  ;;  %1753 = vset.pattern.permute.xlu1 %v2642_v25 }
 0x12d   : > { %909 = vperm.xlu1 %1753, %v2030_v21  }
 0x12f   : > { %v2314_v3 = vpop.permute.xlu1 %733 }
 0x130   : > { %v443_v22 = vpop.permute.xlu0 %442 }
 0x131   : > { %1754 = vset.pattern.permute.xlu1 %v2643_v28  ;;  %v445_v56 = vsel %vm440_vm9, %v443_v22, 0.0  ;;  %vm503_vm9 = vcmp.eq.s32.totalorder %v2196_v58, %v2239_v26 }
 0x132   : > { %918 = vperm.xlu1 %1754, %v2030_v21  }
 0x134   : > { %v2318_v8 = vpop.permute.xlu1 %742  ;;  %v2320_v29 = vpop.permute.xlu0 %900 }
 0x135   : > { %vm744_vm15 = vcmp.eq.s32.totalorder %v2318_v8, %v2239_v26 }
 0x136   : > { %1755 = vset.pattern.permute.xlu1 %v2644_v17 }
 0x137   : > { %936 = vperm.xlu1 %1755, %v2030_v21  }
 0x138   : > { %v2324_v19 = vpop.permute.xlu0 %1126 }
 0x139   : > { %2645 = vst [vmem:[#allocation16_spill] sm:$0xff] %v2324_v19  ;;  %v2333_v0 = vpop.permute.xlu1 %760  ;;  %v436_v19 = vsel %vm431_vm7, %v2107_v34, 0.0  ;;  %v481_v34 = vsel %vm476_vm12, %v2162_v49, 0.0  ;;  %v659_v49 = vsel %vm654_vm14, %v2268_v48, 0.0  ;;  %vm512_vm7 = vcmp.eq.s32.totalorder %v2115_v36, %v2239_v26 }
 0x13a   : > { %v555_v9 = vadd.f32 %v445_v56, %v436_v19  ;;  %v786_v48 = vadd.f32 %v659_v49, %v650_v52  ;;  %v517_v53 = vsel %vm512_vm7, %v2216_v62, 0.0  ;;  %vm753_vm12 = vcmp.eq.s32.totalorder %v2152_v46, %v2239_v26 }
 0x13b   : > { %1756 = vset.pattern.permute.xlu1 %v2646_v38  ;;  %vm735_vm14 = vcmp.eq.s32.totalorder %v2314_v3, %v2239_v26  ;;  %v2654_v49 = vmov 3  }
 0x13c   : > { %945 = vperm.xlu1 %1756, %v2030_v21   ;;  %v562_v47 = vadd.f32 %v555_v9, %v554_v24  ;;  %v2649_v9 = vmov 13   ;;  %v794_v5 = vadd.f32 %v787_v18, %v786_v48 }
 0x13d   : > { %v470_v22 = vpop.permute.xlu0 %469 }
 0x13e   : > { %v472_v7 = vsel %vm467_vm13, %v470_v22, 0.0  ;;  %v2350_v40 = vpop.permute.xlu1 %769  ;;  %vm762_vm13 = vcmp.eq.s32.totalorder %v2333_v0, %v2239_v26 }
 0x13f   : > { %v557_v39 = vadd.f32 %v481_v34, %v472_v7  ;;  %v508_v34 = vsel %vm503_vm9, %v2208_v60, 0.0  ;;  %v2650_v7 = vmov 14   ;;  %vm771_vm4 = vcmp.eq.s32.totalorder %v2350_v40, %v2239_v26 }
 0x140   : > { %1757 = vset.pattern.permute.xlu1 %v2647_v6  ;;  %v559_v33 = vadd.f32 %v517_v53, %v508_v34  ;;  %v2655_v40 = vmov 6   ;;  %vm880_vm9 = vcmp.eq.s32.totalorder %v2210_v61, %v2239_v26 }
 0x141   : > { %v563_v19 = vadd.f32 %v557_v39, %v556_v43  ;;  %963 = vperm.xlu1 %1757, %v2030_v21   ;;  %v698_v56 = vpop.permute.xlu0 %697 }
 0x142   : > { %vm699_vm5 = vcmp.eq.s32.totalorder %v698_v56, %v2239_v26 }
 0x143   : > { %v566_v45 = vadd.f32 %v563_v19, %v562_v47  ;;  %v693_v17 = vpop.permute.xlu1 %692  ;;  %v2651_v47 = vmov 0  }
 0x144   : > { %v695_v10 = vsel %vm690_vm3, %v693_v17, 0.0  ;;  %vm717_vm3 = vcmp.eq.s32.totalorder %v2308_v12, %v2239_v26 }
 0x145   : > { %1758 = vset.pattern.permute.xlu1 %v2648_v41  ;;  %v2362_v24 = vpop.permute.xlu0 %927  ;;  %v788_v42 = vadd.f32 %v695_v10, %v686_v15 }
 0x146   : > { %972 = vperm.xlu1 %1758, %v2030_v21  }
 0x148   : > { %v702_v2 = vpop.permute.xlu1 %701 }
 0x149   : > { %v704_v13 = vsel %vm699_vm5, %v702_v2, 0.0  ;;  %v2379_v31 = vpop.permute.xlu0 %1153 }
 0x14a   : > { %v789_v17 = vadd.f32 %v713_v4, %v704_v13  ;;  %1759 = vset.pattern.permute.xlu1 %v2649_v9 }
 0x14b   : > { %990 = vperm.xlu1 %1759, %v2030_v21  }
 0x14c   : > { %v795_v16 = vadd.f32 %v789_v17, %v788_v42  ;;  %v2656_v17 = vmov 9  }
 0x14d   : > { %v720_v14 = vpop.permute.xlu1 %719 }
 0x14e   : > { %v798_v22 = vadd.f32 %v795_v16, %v794_v5  ;;  %v497_v36 = vpop.permute.xlu0 %496  ;;  %v722_v59 = vsel %vm717_vm3, %v720_v14, 0.0  ;;  %v2657_v14 = vmov 12  }
 0x14f   : > { %v499_v37 = vsel %vm494_vm10, %v497_v36, 0.0  ;;  %1760 = vset.pattern.permute.xlu1 %v2650_v7 }
 0x150   : > { %v558_v43 = vadd.f32 %v499_v37, %v490_v32  ;;  %999 = vperm.xlu1 %1760, %v2030_v21   ;;  %v2658_v37 = vmov 15  }
 0x152   : > { %v564_v62 = vadd.f32 %v559_v33, %v558_v43  ;;  %v729_v39 = vpop.permute.xlu1 %728  ;;  %v725_v46 = vpop.permute.xlu0 %724  ;;  %v2659_v33 = vmov 1  }
 0x153   : > { %vm726_vm0 = vcmp.eq.s32.totalorder %v725_v46, %v2239_v26 }
 0x154   : > { %v567_v58 = vadd.f32 %v2254_v1, %v564_v62  ;;  %805 = vrot.lane.b32.xlu1 %v2177_v54, %s1853_s0  ;;  %v767_v1 = vsel %vm762_vm13, %v2282_v23, 0.0  ;;  %v740_v23 = vsel %vm735_vm14, %v2266_v44, 0.0  ;;  %v731_v30 = vsel %vm726_vm0, %v729_v39, 0.0 }
 0x155   : > { %1762 = vset.pattern.permute.xlu1 %v2651_v47  ;;  %v790_v2 = vadd.f32 %v731_v30, %v722_v59 }
 0x156   : > { %v568_v51 = vadd.f32 %v567_v58, %v566_v45  ;;  %v2653_v45 = vmov 2  }
 0x157   : > { %v747_v55 = vpop.permute.xlu1 %746 }
 0x158   : > { %807 = vrot.lane.b32.xlu1 %v2190_v57, %s1853_s0  ;;  %v570_v21 = vpack.c.bf16 %v568_v51, %v568_v51 }
 0x15a   : > { %1589 = vmatmul.mubr.msk.bf16.vlgmr.msra.gmra.mrb[0].mxu0 %vm589_vm11, %v570_v21 }
 0x15b   : > { %1603 = vmatpush3.bf16.msra.mxu0 %v2218_v63  ;;  %1608 = vmatprep.mubr.msk.bf16.mxu0 %vm1860_vm1, %v2652_v20  ;;  %v749_v63 = vsel %vm744_vm15, %v747_v55, 0.0 }
 0x15c   : > { %1094 = vperm.xlu1 %1762, %v2051_v27   ;;  %v756_v60 = vpop.permute.xlu1 %755  ;;  %1604 = vmatprep.subr.bf16.mxu0 %v2652_v20  ;;  %v791_v3 = vadd.f32 %v749_v63, %v740_v23  ;;  %v2662_v63 = vld [vmem:[#allocation9_spill] sm:$0xff] }
 0x15d   : > { %v758_v19 = vsel %vm753_vm12, %v756_v60, 0.0  ;;  %v2660_v60 = vmov 7   ;;  %vm934_vm15 = vcmp.eq.s32.totalorder %v2662_v63, %v2239_v26 }
 0x15e   : > { %v792_v56 = vadd.f32 %v767_v1, %v758_v19  ;;  %v796_v52 = vadd.f32 %v791_v3, %v790_v2  ;;  %v2661_v19 = vld [vmem:[#allocation7_spill] sm:$0xff] }
 0x15f   : > { %vm907_vm13 = vcmp.eq.s32.totalorder %v2661_v19, %v2239_v26 }
 0x160   : > { %1764 = vset.pattern.permute.xlu1 %v2653_v45 }
 0x161   : > { %1113 = vperm.xlu1 %1764, %v2051_v27   ;;  %v774_v0 = vpop.permute.xlu1 %773 }
 0x162   : > { %v776_v10 = vsel %vm771_vm4, %v774_v0, 0.0 }
 0x165   : > { %1765 = vset.pattern.permute.xlu1 %v2654_v49 }
 0x166   : > { %1122 = vperm.xlu1 %1765, %v2051_v27   ;;  %v783_v8 = vpop.permute.xlu1 %782 }
 0x167   : > { %v785_v18 = vsel %vm780_vm2, %v783_v8, 0.0 }
 0x168   : > { %v793_v50 = vadd.f32 %v785_v18, %v776_v10  ;;  %v2663_v10 = vld [vmem:[#allocation11_spill] sm:$0xff] }
 0x169   : > { %vm961_vm2 = vcmp.eq.s32.totalorder %v2663_v10, %v2239_v26 }
 0x16a   : > { %v797_v44 = vadd.f32 %v793_v50, %v792_v56  ;;  %1767 = vset.pattern.permute.xlu1 %v2643_v28 }
 0x16b   : > { %1140 = vperm.xlu1 %1767, %v2051_v27   ;;  %v869_v15 = vpop.permute.xlu1 %868 }
 0x16c   : > { %v799_v12 = vadd.f32 %v797_v44, %v796_v52  ;;  %vm870_vm10 = vcmp.eq.s32.totalorder %v869_v15, %v2239_v26  ;;  %v2664_v52 = vld [vmem:[#allocation13_spill] sm:$0xff] }
 0x16d   : > { %v876_v51 = vsel %vm870_vm10, %v2305_v11, 0.0  ;;  %vm988_vm4 = vcmp.eq.s32.totalorder %v2664_v52, %v2239_v26 }
 0x16e   : > { %v2435_v4 = vadd.f32 %v799_v12, %v798_v22 }
 0x16f   : > { %1768 = vset.pattern.permute.xlu1 %v2655_v40  ;;  %v2665_v40 = vld [vmem:[#allocation5_spill] sm:$0xff] }
 0x170   : > { %1149 = vperm.xlu1 %1768, %v2051_v27   ;;  %v888_v13 = vpop.permute.xlu1 %887 }
 0x171   : > { %vm889_vm12 = vcmp.eq.s32.totalorder %v888_v13, %v2239_v26 }
 0x174   : > { %1770 = vset.pattern.permute.xlu1 %v2646_v38 }
 0x175   : > { %1167 = vperm.xlu1 %1770, %v2051_v27   ;;  %v897_v48 = vpop.permute.xlu1 %896 }
 0x176   : > { %vm898_vm5 = vcmp.eq.s32.totalorder %v897_v48, %v2239_v26 }
 0x177   : > { %v903_v42 = vsel %vm898_vm5, %v2320_v29, 0.0  ;;  %v955_v29 = vpop.permute.xlu0 %954 }
 0x179   : > { %1771 = vset.pattern.permute.xlu1 %v2656_v17 }
 0x17a   : > { %1176 = vperm.xlu1 %1771, %v2051_v27   ;;  %v915_v5 = vpop.permute.xlu1 %914 }
 0x17b   : > { %v2454_v34 = vpop.permute.xlu0 %1180  ;;  %vm916_vm14 = vcmp.eq.s32.totalorder %v915_v5, %v2239_v26 }
 0x17e   : > { %1773 = vset.pattern.permute.xlu1 %v2648_v41 }
 0x17f   : > { %1194 = vperm.xlu1 %1773, %v2051_v27   ;;  %v924_v16 = vpop.permute.xlu1 %923  ;;  %v982_v43 = vpop.permute.xlu0 %981 }
 0x180   : > { %vm925_vm6 = vcmp.eq.s32.totalorder %v924_v16, %v2239_v26 }
 0x181   : > { %v930_v53 = vsel %vm925_vm6, %v2362_v24, 0.0 }
 0x183   : > { %1774 = vset.pattern.permute.xlu1 %v2657_v14  ;;  %v2507_v17 = vpop.permute.xlu0 %1207 }
 0x184   : > { %1203 = vperm.xlu1 %1774, %v2051_v27   ;;  %v942_v22 = vpop.permute.xlu1 %941 }
 0x185   : > { %vm943_vm0 = vcmp.eq.s32.totalorder %v942_v22, %v2239_v26  ;;  %v802_v22 = vpack.c.bf16 %v2435_v4, %v2435_v4 }
 0x188   : > { %1776 = vset.pattern.permute.xlu1 %v2650_v7 }
 0x189   : > { %1221 = vperm.xlu1 %1776, %v2051_v27   ;;  %v951_v36 = vpop.permute.xlu1 %950 }
 0x18a   : > { %vm952_vm7 = vcmp.eq.s32.totalorder %v951_v36, %v2239_v26 }
 0x18b   : > { %v957_v32 = vsel %vm952_vm7, %v955_v29, 0.0 }
 0x18d   : > { %1777 = vset.pattern.permute.xlu1 %v2658_v37 }
 0x18e   : > { %1230 = vperm.xlu1 %1777, %v2051_v27   ;;  %v969_v24 = vpop.permute.xlu1 %968 }
 0x18f   : > { %vm970_vm3 = vcmp.eq.s32.totalorder %v969_v24, %v2239_v26 }
 0x192   : > { %1779 = vset.pattern.permute.xlu1 %v2659_v33 }
 0x193   : > { %1108 = vperm.xlu1 %1779, %v2110_v35   ;;  %v978_v62 = vpop.permute.xlu1 %977 }
 0x194   : > { %vm979_vm8 = vcmp.eq.s32.totalorder %v978_v62, %v2239_v26 }
 0x195   : > { %v984_v39 = vsel %vm979_vm8, %v982_v43, 0.0 }
 0x197   : > { %1780 = vset.pattern.permute.xlu1 %v2653_v45 }
 0x198   : > { %1117 = vperm.xlu1 %1780, %v2110_v35   ;;  %v2463_v58 = vpop.permute.xlu1 %995 }
 0x199   : > { %vm997_vm6 = vcmp.eq.s32.totalorder %v2463_v58, %v2239_v26 }
 0x19c   : > { %1782 = vset.pattern.permute.xlu1 %v2642_v25 }
 0x19d   : > { %1135 = vperm.xlu1 %1782, %v2110_v35   ;;  %v1005_v27 = vpop.permute.xlu1 %1004 }
 0x19e   : > { %vm1006_vm5 = vcmp.eq.s32.totalorder %v1005_v27, %v2239_v26 }
 0x19f   : > { %v1011_v13 = vsel %vm1006_vm5, %v2665_v40, 0.0 }
 0x1a1   : > { %1783 = vset.pattern.permute.xlu1 %v2643_v28 }
 0x1a2   : > { %1144 = vperm.xlu1 %1783, %v2110_v35   ;;  %v883_v47 = vpop.permute.xlu1 %882 }
 0x1a3   : > { %v885_v55 = vsel %vm880_vm9, %v883_v47, 0.0  ;;  %v2666_v47 = vld [vmem:[#allocation6_spill] sm:$0xff] }
 0x1a4   : > { %v1012_v21 = vadd.f32 %v885_v55, %v876_v51  ;;  %vm1106_vm8 = vcmp.eq.s32.totalorder %v2666_v47, %v2239_v26  ;;  %v2667_v55 = vld [vmem:[#allocation15_spill] sm:$0xff] }
 0x1a6   : > { %1785 = vset.pattern.permute.xlu1 %v2660_v60 }
 0x1a7   : > { %1162 = vperm.xlu1 %1785, %v2110_v35   ;;  %v892_v25 = vpop.permute.xlu1 %891 }
 0x1a8   : > { %v894_v1 = vsel %vm889_vm12, %v892_v25, 0.0 }
 0x1a9   : > { %v1013_v61 = vadd.f32 %v903_v42, %v894_v1 }
 0x1ab   : > { %v1020_v28 = vadd.f32 %v1013_v61, %v1012_v21  ;;  %1786 = vset.pattern.permute.xlu1 %v2646_v38  ;;  %v2668_v61 = vld [vmem:[#allocation16_spill] sm:$0xff] }
 0x1ac   : > { %1171 = vperm.xlu1 %1786, %v2110_v35   ;;  %v910_v11 = vpop.permute.xlu1 %909 }
 0x1ad   : > { %v912_v56 = vsel %vm907_vm13, %v910_v11, 0.0 }
 0x1b0   : > { %1788 = vset.pattern.permute.xlu1 %v2647_v6 }
 0x1b1   : > { %1189 = vperm.xlu1 %1788, %v2110_v35   ;;  %v919_v46 = vpop.permute.xlu1 %918 }
 0x1b2   : > { %v921_v45 = vsel %vm916_vm14, %v919_v46, 0.0 }
 0x1b3   : > { %v1014_v0 = vadd.f32 %v921_v45, %v912_v56  ;;  %v2669_v45 = vld [vmem:[#allocation8_spill] sm:$0xff] }
 0x1b4   : > { %vm1133_vm10 = vcmp.eq.s32.totalorder %v2669_v45, %v2239_v26 }
 0x1b5   : > { %1789 = vset.pattern.permute.xlu1 %v2648_v41 }
 0x1b6   : > { %1198 = vperm.xlu1 %1789, %v2110_v35   ;;  %v937_v38 = vpop.permute.xlu1 %936 }
 0x1b7   : > { %v939_v23 = vsel %vm934_vm15, %v937_v38, 0.0  ;;  %vm634_vm15 = vcmask 64512  }
 0x1b8   : > { %v1015_v30 = vadd.f32 %v939_v23, %v930_v53  ;;  %v2510_v53 = vpop.permute.xlu0 %1234 }
 0x1ba   : > { %v1021_v49 = vadd.f32 %v1015_v30, %v1014_v0  ;;  %1790 = vset.pattern.permute.xlu1 %v2649_v9  ;;  %v2670_v30 = vld [vmem:[#allocation10_spill] sm:$0xff] }
 0x1bb   : > { %1216 = vperm.xlu1 %1790, %v2110_v35   ;;  %v946_v6 = vpop.permute.xlu1 %945  ;;  %vm1160_vm14 = vcmp.eq.s32.totalorder %v2670_v30, %v2239_v26  ;;  %v1865_v30 = vmov (!%p1552_p8), 0.0  }
 0x1bc   : > { %v1024_v3 = vadd.f32 %v1021_v49, %v1020_v28  ;;  %v948_v8 = vsel %vm943_vm0, %v946_v6, 0.0  ;;  %v1256_v29 = vpop.permute.xlu0 %1255 }
 0x1bd   : > { %v1016_v59 = vadd.f32 %v957_v32, %v948_v8 }
 0x1bf   : > { %1791 = vset.pattern.permute.xlu1 %v2650_v7 }
 0x1c0   : > { %1225 = vperm.xlu1 %1791, %v2110_v35   ;;  %v964_v41 = vpop.permute.xlu1 %963 }
 0x1c1   : > { %v966_v18 = vsel %vm961_vm2, %v964_v41, 0.0  ;;  %v569_v41 = vld [vmem:[#allocation2] sm:$0xff] }
 0x1c4   : > { %1031 = vrot.lane.b32.xlu1 %v2177_v54, %s1856_s10 }
 0x1c5   : > { %v973_v9 = vpop.permute.xlu1 %972 }
 0x1c6   : > { %v975_v2 = vsel %vm970_vm3, %v973_v9, 0.0 }
 0x1c7   : > { %v1017_v50 = vadd.f32 %v975_v2, %v966_v18 }
 0x1c8   : > { %1033 = vrot.lane.b32.xlu1 %v2190_v57, %s1856_s10 }
 0x1c9   : > { %v1022_v44 = vadd.f32 %v1017_v50, %v1016_v59 }
 0x1ca   : > { %v991_v7 = vpop.permute.xlu1 %990 }
 0x1cb   : > { %v993_v15 = vsel %vm988_vm4, %v991_v7, 0.0 }
 0x1cc   : > { %v1018_v35 = vadd.f32 %v993_v15, %v984_v39  ;;  %1257 = vrot.lane.b32.xlu1 %v2177_v54, %s1861_s11 }
 0x1cf   : > { %v1000_v12 = vpop.permute.xlu1 %999 }
 0x1d0   : > { %v1002_v48 = vsel %vm997_vm6, %v1000_v12, 0.0 }
 0x1d1   : > { %v1019_v42 = vadd.f32 %v1011_v13, %v1002_v48 }
 0x1d3   : > { %v1023_v57 = vadd.f32 %v1019_v42, %v1018_v35  ;;  %v806_v5 = vpop.permute.xlu1 %805 }
 0x1d4   : > { %1595 = vmatpush3.bf16.msra.mxu1 %v806_v5 }
 0x1d5   : > { %v1025_v16 = vadd.f32 %v1023_v57, %v1022_v44  ;;  %1596 = vmatprep.subr.bf16.mxu1 %v2652_v20 }
 0x1d7   : > { %v2512_v54 = vadd.f32 %v1025_v16, %v1024_v3  ;;  %v808_v14 = vpop.permute.xlu1 %807  ;;  %v2672_v16 = vld [vmem:[#allocation14_spill] sm:$0xff] }
 0x1d8   : > { %1597 = vmatpush3.bf16.msra.mxu1 %v808_v14  ;;  %vm1214_vm5 = vcmp.eq.s32.totalorder %v2672_v16, %v2239_v26 }
 0x1d9   : > { %1612 = vmatprep.subr.bf16.mxu1 %v2652_v20 }
 0x1db   : > { %1599 = vmatmul.mubr.msk.bf16.vlgmr.msra.gmra.mrb[0].mxu1 %vm589_vm11, %v802_v22  ;;  %v1095_v36 = vpop.permute.xlu1 %1094 }
 0x1dc   : > { %1613 = vmatpush3.bf16.msra.mxu1 %v1256_v29  ;;  %1618 = vmatprep.mubr.msk.bf16.mxu1 %vm1860_vm1, %v2652_v20  ;;  %vm1096_vm7 = vcmp.eq.s32.totalorder %v1095_v36, %v2239_v26 }
 0x1dd   : > { %1614 = vmatprep.subr.bf16.mxu1 %v2652_v20  ;;  %v1102_v21 = vsel %vm1096_vm7, %v2667_v55, 0.0 }
 0x1e0   : > { %v1114_v32 = vpop.permute.xlu1 %1113 }
 0x1e1   : > { %vm1115_vm9 = vcmp.eq.s32.totalorder %v1114_v32, %v2239_v26 }
 0x1e5   : > { %v1123_v37 = vpop.permute.xlu1 %1122 }
 0x1e6   : > { %vm1124_vm1 = vcmp.eq.s32.totalorder %v1123_v37, %v2239_v26 }
 0x1e7   : > { %v1129_v19 = vsel %vm1124_vm1, %v2668_v61, 0.0  ;;  %vm860_vm1 = vcmask 130112  }
 0x1ea   : > { %v1141_v24 = vpop.permute.xlu1 %1140 }
 0x1eb   : > { %vm1142_vm12 = vcmp.eq.s32.totalorder %v1141_v24, %v2239_v26 }
 0x1ef   : > { %v1150_v33 = vpop.permute.xlu1 %1149 }
 0x1f0   : > { %vm1151_vm13 = vcmp.eq.s32.totalorder %v1150_v33, %v2239_v26 }
 0x1f1   : > { %v1156_v6 = vsel %vm1151_vm13, %v2379_v31, 0.0  ;;  %v2671_v31 = vld [vmem:[#allocation12_spill] sm:$0xff] }
 0x1f2   : > { %vm1187_vm3 = vcmp.eq.s32.totalorder %v2671_v31, %v2239_v26 }
 0x1f4   : > { %v1168_v43 = vpop.permute.xlu1 %1167 }
 0x1f5   : > { %vm1169_vm0 = vcmp.eq.s32.totalorder %v1168_v43, %v2239_v26 }
 0x1f9   : > { %v1177_v62 = vpop.permute.xlu1 %1176 }
 0x1fa   : > { %vm1178_vm2 = vcmp.eq.s32.totalorder %v1177_v62, %v2239_v26 }
 0x1fb   : > { %v1183_v12 = vsel %vm1178_vm2, %v2454_v34, 0.0 }
 0x1fe   : > { %v1195_v39 = vpop.permute.xlu1 %1194 }
 0x1ff   : > { %vm1196_vm4 = vcmp.eq.s32.totalorder %v1195_v39, %v2239_v26 }
 0x203   : > { %v1204_v4 = vpop.permute.xlu1 %1203 }
 0x204   : > { %vm1205_vm6 = vcmp.eq.s32.totalorder %v1204_v4, %v2239_v26 }
 0x205   : > { %v1210_v29 = vsel %vm1205_vm6, %v2507_v17, 0.0 }
 0x208   : > { %v1222_v58 = vpop.permute.xlu1 %1221 }
 0x20d   : > { %v1231_v27 = vpop.permute.xlu1 %1230 }
 0x20e   : > { %vm1232_vm7 = vcmp.eq.s32.totalorder %v1231_v27, %v2239_v26 }
 0x20f   : > { %v1237_v34 = vsel %vm1232_vm7, %v2510_v53, 0.0  ;;  %v1260_v53 = vpop.permute.xlu0 %1259 }
 0x212   : > { %v1109_v51 = vpop.permute.xlu1 %1108 }
 0x213   : > { %v1111_v60 = vsel %vm1106_vm8, %v1109_v51, 0.0  ;;  %vm1223_vm8 = vcmp.eq.s32.totalorder %v1222_v58, %v2239_v26  ;;  %v1028_v26 = vpack.c.bf16 %v2512_v54, %v2512_v54 }
 0x214   : > { %v1238_v25 = vadd.f32 %v1111_v60, %v1102_v21 }
 0x217   : > { %v1118_v1 = vpop.permute.xlu1 %1117 }
 0x218   : > { %v1120_v28 = vsel %vm1115_vm9, %v1118_v1, 0.0  ;;  %vm1312_vm9 = vcmask 261312  }
 0x219   : > { %v1239_v11 = vadd.f32 %v1129_v19, %v1120_v28 }
 0x21b   : > { %v1246_v56 = vadd.f32 %v1239_v11, %v1238_v25 }
 0x21c   : > { %v1136_v46 = vpop.permute.xlu1 %1135 }
 0x21d   : > { %v1138_v63 = vsel %vm1133_vm10, %v1136_v46, 0.0  ;;  %vm1866_vm10 = vmmov (!%p1552_p8), 0  }
 0x221   : > { %v1145_v0 = vpop.permute.xlu1 %1144 }
 0x222   : > { %v1147_v38 = vsel %vm1142_vm12, %v1145_v0, 0.0  ;;  %vm1343_vm12 = vcmask (!%p1552_p8), 261120  }
 0x223   : > { %v1240_v23 = vadd.f32 %v1147_v38, %v1138_v63 }
 0x226   : > { %v1163_v49 = vpop.permute.xlu1 %1162 }
 0x227   : > { %v1165_v3 = vsel %vm1160_vm14, %v1163_v49, 0.0  ;;  %v1797_v49 = vld [vmem:[%s2595_s4 + $0x8] sm:$0xff] (!%p1552_p8)  }
 0x228   : > { %v1241_v8 = vadd.f32 %v1165_v3, %v1156_v6 }
 0x22a   : > { %v1247_v59 = vadd.f32 %v1241_v8, %v1240_v23  ;;  %v1796_v23 = vld [vmem:[%s2595_s4] sm:$0xff] (!%p1552_p8)  }
 0x22b   : > { %v1172_v10 = vpop.permute.xlu1 %1171  ;;  %v1553_v8 = vld [vmem:[%s2596_s5] ss:$0 sm:$0xff] (!%p1552_p8) }
 0x22c   : > { %v1250_v18 = vadd.f32 %v1247_v59, %v1246_v56  ;;  %v1174_v15 = vsel %vm1169_vm0, %v1172_v10, 0.0  ;;  %v1387_v10 = vld [vmem:[%s1958_s25] sm:$0xff] (!%p1552_p8) }
 0x22d   : > { %v627_v9 = vpop.f32.mrb[0].mxu0  ;;  %v1242_v48 = vadd.f32 %v1183_v12, %v1174_v15 }
 0x22e   : > { %v633_v2 = vadd.f32 %v627_v9, %v569_v41  ;;  %v1590_v50 = vpop.f32.mrb[1].mxu0 }
 0x22f   : > { %v630_v52 = vpop.f32.mrb[2].mxu0 }
 0x230   : > { %635 = vst.msk [vmem:[#allocation2] sm:$0xff] %vm634_vm15, %v633_v2  ;;  %v1591_v44 = vpop.f32.mrb[3].mxu0  ;;  %v1190_v7 = vpop.permute.xlu1 %1189 }
 0x231   : > { %v1192_v40 = vsel %vm1187_vm3, %v1190_v7, 0.0 }
 0x235   : > { %v1199_v35 = vpop.permute.xlu1 %1198 }
 0x236   : > { %v1201_v13 = vsel %vm1196_vm4, %v1199_v35, 0.0 }
 0x237   : > { %v1243_v42 = vadd.f32 %v1201_v13, %v1192_v40  ;;  %v801_v25 = vld [vmem:[#allocation2] sm:$0xff] }
 0x239   : > { %v1248_v57 = vadd.f32 %v1243_v42, %v1242_v48  ;;  %v1557_v42 = vld [vmem:[%s2597_s6] ss:$0 sm:$0xff] (!%p1552_p8) }
 0x23a   : > { %v1217_v5 = vpop.permute.xlu1 %1216 }
 0x23b   : > { %v1219_v14 = vsel %vm1214_vm5, %v1217_v5, 0.0  ;;  %v1558_v5 = vld [vmem:[%s2598_s7] ss:$0 sm:$0xff] (!%p1552_p8) }
 0x23c   : > { %v1244_v32 = vadd.f32 %v1219_v14, %v1210_v29 }
 0x23f   : > { %v1226_v22 = vpop.permute.xlu1 %1225 }
 0x240   : > { %v1228_v36 = vsel %vm1223_vm8, %v1226_v22, 0.0 }
 0x241   : > { %v1245_v37 = vadd.f32 %v1237_v34, %v1228_v36 }
 0x243   : > { %v1249_v24 = vadd.f32 %v1245_v37, %v1244_v32  ;;  %v1032_v33 = vpop.permute.xlu1 %1031 }
 0x244   : > { %1605 = vmatpush3.bf16.msra.mxu0 %v1032_v33 }
 0x245   : > { %v1251_v43 = vadd.f32 %v1249_v24, %v1248_v57  ;;  %1606 = vmatprep.subr.bf16.mxu0 %v2652_v20 }
 0x247   : > { %v1252_v62 = vadd.f32 %v1251_v43, %v1250_v18  ;;  %v1034_v39 = vpop.permute.xlu1 %1033 }
 0x248   : > { %1607 = vmatpush3.bf16.msra.mxu0 %v1034_v39 }
 0x249   : > { %v1254_v4 = vpack.c.bf16 %v1252_v62, %v1252_v62  ;;  %1622 = vmatprep.subr.bf16.mxu0 (!%p1552_p8), %v1865_v30 }
 0x24b   : > { %1609 = vmatmul.mubr.msk.bf16.vlgmr.msra.gmra.mrb[4].mxu0 %vm589_vm11, %v1028_v26  ;;  %v1258_v17 = vpop.permute.xlu1 %1257 }
 0x24c   : > { %1615 = vmatpush3.bf16.msra.mxu1 %v1258_v17  ;;  %1623 = vmatpush3.bf16.msra.mxu0 (!%p1552_p8), %v1796_v23 }
 0x24d   : > { %1616 = vmatprep.subr.bf16.mxu1 %v2652_v20  ;;  %1626 = vmatprep.mubr.msk.bf16.mxu0 (!%p1552_p8), %vm1866_vm10, %v1865_v30 }
 0x24e   : > { %1624 = vmatprep.subr.bf16.mxu0 (!%p1552_p8), %v1865_v30 }
 0x250   : > { %1617 = vmatpush3.bf16.msra.mxu1 %v1260_v53  ;;  %1625 = vmatpush3.bf16.msra.mxu0 (!%p1552_p8), %v1797_v49 }
 0x253   : > { %1619 = vmatmul.mubr.msk.bf16.vlgmr.msra.gmra.mrb[4].mxu1 %vm589_vm11, %v1254_v4  ;;  %vm1086_vm11 = vcmask 195712  }
 0x2ae   : > { %v849_v58 = vpop.f32.mrb[0].mxu1 }
 0x2af   : > { %856 = vrot.lane.b32.xlu1 %v849_v58, %s1862_s12  ;;  %v1600_v27 = vpop.f32.mrb[1].mxu1 }
 0x2b0   : > { %v852_v47 = vpop.f32.mrb[2].mxu1 }
 0x2b1   : > { %v1601_v51 = vpop.f32.mrb[3].mxu1 }
 0x31e   : > { %v1075_v55 = vpop.f32.mrb[4].mxu0 }
 0x31f   : > { %1082 = vrot.lane.b32.xlu0 %v1075_v55, %s1863_s13  ;;  %v1610_v54 = vpop.f32.mrb[5].mxu0 }
 0x320   : > { %v1078_v21 = vpop.f32.mrb[6].mxu0 }
 0x321   : > { %v1611_v60 = vpop.f32.mrb[7].mxu0  ;;  %v857_v1 = vpop.permute.xlu1 %856 }
 0x322   : > { %v859_v20 = vadd.f32 %v857_v1, %v801_v25 }
 0x324   : > { %861 = vst.msk [vmem:[#allocation2] sm:$0xff] %vm860_vm1, %v859_v20 }
 0x326   : > { %v1301_v61 = vpop.f32.mrb[4].mxu1 }
 0x327   : > { %1308 = vrot.lane.b32.xlu1 %v1301_v61, %s1864_s14  ;;  %v1620_v19 = vpop.f32.mrb[5].mxu1 }
 0x328   : > { %v1304_v28 = vpop.f32.mrb[6].mxu1 }
 0x329   : > { %v1621_v11 = vpop.f32.mrb[7].mxu1 }
 0x32b   : > { %v1027_v46 = vld [vmem:[#allocation2] sm:$0xff] }
 0x391   : > { %v1083_v56 = vpop.permute.xlu0 %1082 }
 0x392   : > { %v1085_v45 = vadd.f32 %v1083_v56, %v1027_v46 }
 0x394   : > { %1087 = vst.msk [vmem:[#allocation2] sm:$0xff] %vm1086_vm11, %v1085_v45 }
 0x398   : > { %1317 = sbr.rel (%p1552_p8) target bundleno = 1466 (0x5ba), region = 60 }
 0x399   : > { %v1309_v63 = vpop.permute.xlu1 %1308 }
 0x39b   : > { %v1253_v0 = vld [vmem:[#allocation2] sm:$0xff] }
 0x39c   : > { %v1311_v38 = vadd.f32 %v1309_v63, %v1253_v0 }
 0x39e   : > { %1313 = vst.msk [vmem:[#allocation2] sm:$0xff] %vm1312_vm9, %v1311_v38 }
 0x3a5   : > { %v1318_v6 = vld [vmem:[#allocation2] sm:$0xff] }
 0x3a6   : > { %v1319_v3 = vpack.c.bf16 %v1318_v6, %v1318_v6 }
 0x3a8   : > { %1627 = vmatmul.mubr.msk.bf16.vlgmr.msra.gmra.mrb[0].mxu0 %vm1343_vm12, %v1319_v3 }
 0x47b   : > { %v1381_v59 = vpop.f32.mrb[0].mxu0 }
 0x47c   : > { %v1382_v41 = vadd.f32 %v1553_v8, %v1381_v59  ;;  %v1628_v18 = vpop.f32.mrb[1].mxu0 }
 0x47d   : > { %v1384_v9 = vpop.f32.mrb[2].mxu0 }
 0x47e   : > { %v1629_v2 = vpop.f32.mrb[3].mxu0  ;;  %v1388_v50 = vadd.f32 %v1387_v10, %v1382_v41 }
 0x480   : > { %v1389_v52 = vsel %vm1343_vm12, %v1388_v50, 0.0 }
 0x481   : > { %1390 = vadd.xlane.f32.xlu0 %v1389_v52 }
 0x50e   : > { %v1391_v44 = vpop.xlane.xlu0 %1390 }
 0x50f   : > { %v1393_v7 = vmul.f32 0.03125, %v1391_v44 }
 0x511   : > { %v1394_v15 = vsub.f32 %v1388_v50, %v1393_v7 }
 0x513   : > { %v1395_v31 = vmul.f32 %v1394_v15, %v1394_v15 }
 0x515   : > { %v1396_v35 = vsel %vm1343_vm12, %v1395_v31, 0.0 }
 0x516   : > { %1397 = vadd.xlane.f32.xlu0 %v1396_v35 }
 0x5a3   : > { %v1398_v12 = vpop.xlane.xlu0 %1397 }
 0x5a4   : > { %v1399_v40 = vmul.f32 0.03125, %v1398_v12 }
 0x5a6   : > { %v1400_v13 = vadd.f32 1e-05, %v1399_v40 }
 0x5a8   : > { %1798 = vrsqrt.f32 %v1400_v13 }
 0x5b2   : > { %v1799_v48 = vpop.eup %1798 }
 0x5b3   : > { %v1402_v57 = vmul.f32 %v1799_v48, %v1394_v15 }
 0x5b5   : > { %v1410_v16 = vmul.f32 %v1557_v42, %v1402_v57 }
 0x5b7   : > { %v1418_v14 = vadd.f32 %v1558_v5, %v1410_v16 }
 0x5b9   : > { %1419 = vst.msk [vmem:[%s1963_s15] sm:$0xff] %vm1343_vm12, %v1418_v14 }
 0x5ba PF: > { %s18_s9 = sadd.s32 1, %s1838_s9   ;;  %s2673_s16 = sld [smem:[#allocation3_spill]] }
 0x5bb   : > { %p15_p9 = scmp.ge.s32.totalorder %s18_s9, 6   ;;  %s2674_s18 = sld [smem:[#allocation4_spill]] }
 0x5bc   : > { %s2675_s27 = smov %s1830_s29  ;;  %s2676_s28 = smov %s1834_s30 }
 0x5bd   :  { %17 = sbr.rel (!%p15_p9) target bundleno = 3 (0x3), region = 105 }
 0x5c0   : > { %s2677_s29 = smov %s2673_s16 }
 0x5c1   : > { %s2678_s30 = smov %s2674_s18 }

</bundles_post_ra>
